<compile_context>
chip_gen: v6e
topology: v6e:2x2x1
jax: 0.10.0
libtpu: 0.0.40
codegen_flags: <defaults>
</compile_context>

<pallas_src>
import functools

import jax
import jax.numpy as jnp
from jax.experimental import pallas as pl
from jax.experimental.pallas import tpu as pltpu


# ----------------------------------------------------------------------------
# Shape helpers / parameter init (PyTorch-layout parameters)
# ----------------------------------------------------------------------------
def _conv_out(size, k, s):
    return (size - k) // s + 1


def conv_output_size(state_h, state_w):
    h, w = state_h, state_w
    h, w = _conv_out(h, 8, 4), _conv_out(w, 8, 4)
    h, w = _conv_out(h, 4, 2), _conv_out(w, 4, 2)
    h, w = _conv_out(h, 3, 1), _conv_out(w, 3, 1)
    return 64 * h * w


def init_params(key, state_h, state_w, action_size):
    ks = jax.random.split(key, 10)

    def conv_init(kw_key, kb_key, oc, c, kh, kw_):
        fan_in = c * kh * kw_
        w = jax.random.normal(kw_key, (oc, c, kh, kw_), jnp.float32) / jnp.sqrt(fan_in)
        b = 0.01 * jax.random.normal(kb_key, (oc,), jnp.float32)
        return w, b

    def fc_init(kw_key, kb_key, din, dout):
        w = jax.random.normal(kw_key, (din, dout), jnp.float32) / jnp.sqrt(din)
        b = 0.01 * jax.random.normal(kb_key, (dout,), jnp.float32)
        return w, b

    p = {}
    p["conv1_w"], p["conv1_b"] = conv_init(ks[0], ks[1], 32, 2, 8, 8)
    p["conv2_w"], p["conv2_b"] = conv_init(ks[2], ks[3], 64, 32, 4, 4)
    p["conv3_w"], p["conv3_b"] = conv_init(ks[4], ks[5], 64, 64, 3, 3)
    flat = conv_output_size(state_h, state_w)
    p["fc1_w"], p["fc1_b"] = fc_init(ks[6], ks[7], flat, 512)
    p["fc2_w"], p["fc2_b"] = fc_init(ks[8], ks[9], 512, action_size)
    return p


_FC2_PAD = 128  # pad fc2 output to a full lane width for a lane-dense store


def prepare_params(params):
    """One-time layout prep:
      * conv weights -> channels-last tap order, flattened so every conv layer
        is a single matmul rhs (conv1: (128,32), conv2: (512,64), conv3: (576,64)),
      * all matmul weights cast to bf16 (MXU-native; accumulation stays f32),
      * biases -> (1, N) f32,
      * fc2 padded to 128 output lanes (lane-dense store inside the kernel).
    """
    bf16 = jnp.bfloat16
    action_size = params["fc2_w"].shape[1]
    pp = {}
    pp["w1"] = jnp.transpose(params["conv1_w"], (2, 3, 1, 0)).reshape(8 * 8 * 2, 32).astype(bf16)
    pp["b1"] = params["conv1_b"].reshape(1, 32)
    pp["w2"] = jnp.transpose(params["conv2_w"], (2, 3, 1, 0)).reshape(4 * 4 * 32, 64).astype(bf16)
    pp["b2"] = params["conv2_b"].reshape(1, 64)
    pp["w3"] = jnp.transpose(params["conv3_w"], (2, 3, 1, 0)).reshape(3 * 3 * 64, 64).astype(bf16)
    pp["b3"] = params["conv3_b"].reshape(1, 64)
    pp["w4"] = params["fc1_w"].astype(bf16)                  # (64, 512)
    pp["b4"] = params["fc1_b"].reshape(1, 512)
    pp["w5"] = (jnp.zeros((512, _FC2_PAD), jnp.float32)
                .at[:, :action_size].set(params["fc2_w"])).astype(bf16)
    pp["b5"] = (jnp.zeros((1, _FC2_PAD), jnp.float32)
                .at[0, :action_size].set(params["fc2_b"]))
    pp["action_size"] = int(action_size)
    return pp


# ----------------------------------------------------------------------------
# Fused Pallas kernel: conv1 -> conv2 -> conv3 -> fc1 -> fc2 (all in VMEM)
# Exactly ONE MXU matmul per layer; bf16 operands, f32 accumulation.
# ----------------------------------------------------------------------------
def _dqn_fused_kernel(p1_ref, w1_ref, b1_ref, w2_ref, b2_ref, w3_ref, b3_ref,
                      w4_ref, b4_ref, w5_ref, b5_ref, out_ref,
                      act1_ref, p2_ref, p3_ref,
                      *, batch, oh1, ow1, oh2, ow2):
    f32 = jnp.float32
    bf16 = jnp.bfloat16

    # ---- conv1 + ReLU: ONE matmul over pre-built im2col patches -------------
    # p1 rows: (n, oy1, even ox1 first then odd ox1); cols: (di, dj, c).
    y1 = jnp.dot(p1_ref[...], w1_ref[...], preferred_element_type=f32)
    act1_ref[...] = jnp.maximum(y1 + b1_ref[...], 0.0)       # (batch*64, 32) f32

    # ---- conv2 im2col: copy 16 tap slices into one (batch*9, 512) slab ------
    # act1's even/odd ox ordering makes every stride-2 tap a CONTIGUOUS (3,32)
    # row window, so each copy is a plain static load + store (no gathers).
    half = ow1 // 2
    for n in range(batch):
        for oy in range(oh2):
            dst = n * (oh2 * ow2) + oy * ow2
            for di in range(4):
                row0 = n * (oh1 * ow1) + (2 * oy + di) * ow1
                for dj in range(4):
                    src = row0 + (dj % 2) * half + dj // 2
                    p2_ref[pl.ds(dst, ow2), pl.ds((di * 4 + dj) * 32, 32)] = (
                        act1_ref[pl.ds(src, ow2), :])

    # ---- conv2 + ReLU: ONE (batch*9, 512) @ (512, 64) matmul ----------------
    y2 = jnp.dot(p2_ref[...].astype(bf16), w2_ref[...],
                 preferred_element_type=f32)
    y2 = jnp.maximum(y2 + b2_ref[...], 0.0)                   # (batch*9, 64)

    # ---- fold conv2 rows into lanes: (batch*9, 64) -> (batch, 576) ----------
    n_pos = oh2 * ow2                                          # 9
    for n in range(batch):
        for p in range(n_pos):
            r = n * n_pos + p
            p3_ref[pl.ds(n, 1), pl.ds(p * 64, 64)] = y2[r:r + 1, :]

    # ---- conv3 + ReLU: ONE (batch, 576) @ (576, 64) matmul ------------------
    h3 = jnp.maximum(
        jnp.dot(p3_ref[...].astype(bf16), w3_ref[...],
                preferred_element_type=f32) + b3_ref[...], 0.0)   # (batch, 64)

    # ---- fc1 + ReLU, fc2 (all in registers; lane-dense 128-wide output) -----
    h4 = jnp.maximum(
        jnp.dot(h3.astype(bf16), w4_ref[...], preferred_element_type=f32)
        + b4_ref[...], 0.0)                                    # (batch, 512)
    out_ref[...] = (jnp.dot(h4.astype(bf16), w5_ref[...],
                            preferred_element_type=f32) + b5_ref[...])


# ----------------------------------------------------------------------------
# Wrapper: gather-free conv1 im2col (bf16) + single pallas_call
# ----------------------------------------------------------------------------
def _full_block(arr):
    zeros = (0,) * arr.ndim
    return pl.BlockSpec(arr.shape, lambda i, _z=zeros: _z)


def _conv1_patches(x_nhwc, oh1, ow1):
    """im2col for conv1 (8x8, stride 4) on the NHWC (bf16) input.

    Rows: (n, oy1, even ox1 columns, then odd ox1 columns) so conv2's stride-2
    taps read contiguous row windows inside the kernel.
    Cols: (di, dj, c), matching the prepped conv1 weight.
    Built from static strided slices + concat only (no XLA gather).
    """
    n = x_nhwc.shape[0]
    slabs = []
    for di in range(8):
        for dj in range(8):
            slabs.append(x_nhwc[:, di:di + 4 * oh1:4, dj:dj + 4 * ow1:4, :])
    p = jnp.stack(slabs, axis=3).reshape(n, oh1, ow1, 8 * 8 * 2)
    p = jnp.concatenate([p[:, :, 0::2, :], p[:, :, 1::2, :]], axis=2)
    return p.reshape(n * oh1 * ow1, 8 * 8 * 2)


def dqn_forward_prepared(pp, x):
    """x: (N, 2, H, W) float32 -> Q-values (N, action_size) float32."""
    n, c, h, w = x.shape
    assert c == 2, "DQNNetwork expects 2 input channels"
    oh1, ow1 = _conv_out(h, 8, 4), _conv_out(w, 8, 4)
    oh2, ow2 = _conv_out(oh1, 4, 2), _conv_out(ow1, 4, 2)
    oh3, ow3 = _conv_out(oh2, 3, 1), _conv_out(ow2, 3, 1)
    # TODO(synk): general geometry (larger observations / large batch) needs a
    # flatten-order permutation of fc1_w, an M-tiled "parallel" batch grid axis
    # (uses v7x's 2nd TensorCore; halve the M tile for its 64 MiB VMEM), and on
    # v5e a 2-step grid so the fc-weight DMA overlaps the conv phase.
    assert (oh1, ow1, oh2, ow2, oh3, ow3) == (8, 8, 3, 3, 1, 1), (
        "fused kernel supports 36x36-class inputs only")

    x_nhwc = jnp.transpose(x, (0, 2, 3, 1)).astype(jnp.bfloat16)  # one layout change
    p1 = _conv1_patches(x_nhwc, oh1, ow1)                # (n*64, 128) bf16, 32 KiB

    kernel = functools.partial(_dqn_fused_kernel, batch=n,
                               oh1=oh1, ow1=ow1, oh2=oh2, ow2=ow2)
    args = (p1, pp["w1"], pp["b1"], pp["w2"], pp["b2"], pp["w3"], pp["b3"],
            pp["w4"], pp["b4"], pp["w5"], pp["b5"])
    out = pl.pallas_call(
        kernel,
        out_shape=jax.ShapeDtypeStruct((n, _FC2_PAD), jnp.float32),
        grid=(1,),
        in_specs=[_full_block(a) for a in args],
        out_specs=pl.BlockSpec((n, _FC2_PAD), lambda i: (0, 0)),
        scratch_shapes=[
            pltpu.VMEM((n * oh1 * ow1, 32), jnp.float32),    # conv1 activations
            pltpu.VMEM((n * oh2 * ow2, 512), jnp.float32),   # conv2 im2col slab
            pltpu.VMEM((n, 576), jnp.float32),               # conv3 input (folded)
        ],
        compiler_params=pltpu.CompilerParams(
            dimension_semantics=("arbitrary",)),
    )(*args)
    return out[:, :pp["action_size"]]


def dqn_forward(params, x):
    return dqn_forward_prepared(prepare_params(params), x)


# ----------------------------------------------------------------------------
# Pure-JAX reference (numerical sanity check, f32)
# ----------------------------------------------------------------------------
def _ref_forward(params, x):
    dn = ("NCHW", "OIHW", "NCHW")

    def conv(x, w, b, s):
        y = jax.lax.conv_general_dilated(x, w, (s, s), "VALID",
                                         dimension_numbers=dn)
        return jax.nn.relu(y + b[None, :, None, None])

    x = conv(x, params["conv1_w"], params["conv1_b"], 4)
    x = conv(x, params["conv2_w"], params["conv2_b"], 2)
    x = conv(x, params["conv3_w"], params["conv3_b"], 1)
    x = x.reshape(x.shape[0], -1)
    x = jax.nn.relu(x @ params["fc1_w"] + params["fc1_b"])
    return x @ params["fc2_w"] + params["fc2_b"]


if __name__ == "__main__":
    # batch=2, 2 input channels (module-fixed), 36x36 spatial (smallest size the
    # conv stack accepts: 8x8 -> 3x3 -> 1x1 -> flat 64), 4 actions.
    batch, in_ch, H, W, action_size = 2, 2, 36, 36, 4

    key = jax.random.PRNGKey(0)
    pkey, xkey = jax.random.split(key)
    params = init_params(pkey, H, W, action_size)
    x = jax.random.normal(xkey, (batch, in_ch, H, W), jnp.float32)

    prepped = prepare_params(params)                  # one-time layout prep
    fwd = jax.jit(functools.partial(dqn_forward_prepared, prepped))

    q = jax.block_until_ready(fwd(x))
    assert q.shape == (batch, action_size), q.shape
    assert q.dtype == jnp.float32

    q_ref = _ref_forward(params, x)
    max_err = float(jnp.max(jnp.abs(q - q_ref)))
    # bf16 MXU operands with f32 accumulation -> tolerance loosened vs pure f32.
    assert jnp.allclose(q, q_ref, rtol=5e-2, atol=5e-2), max_err

    print("KERNEL_OK")
</pallas_src>

<mosaic_0001>
module attributes {stable_mosaic.version = 11 : i64} {
  func.func @_dqn_fused_kernel(%arg0: i32, %arg1: memref<128x128xbf16, #tpu.memory_space<vmem>>, %arg2: memref<128x32xbf16, #tpu.memory_space<vmem>>, %arg3: memref<1x32xf32, #tpu.memory_space<vmem>>, %arg4: memref<512x64xbf16, #tpu.memory_space<vmem>>, %arg5: memref<1x64xf32, #tpu.memory_space<vmem>>, %arg6: memref<576x64xbf16, #tpu.memory_space<vmem>>, %arg7: memref<1x64xf32, #tpu.memory_space<vmem>>, %arg8: memref<64x512xbf16, #tpu.memory_space<vmem>>, %arg9: memref<1x512xf32, #tpu.memory_space<vmem>>, %arg10: memref<512x128xbf16, #tpu.memory_space<vmem>>, %arg11: memref<1x128xf32, #tpu.memory_space<vmem>>, %arg12: memref<2x128xf32, #tpu.memory_space<vmem>>, %arg13: memref<128x32xf32, #tpu.memory_space<vmem>>, %arg14: memref<18x512xf32, #tpu.memory_space<vmem>>, %arg15: memref<2x576xf32, #tpu.memory_space<vmem>>) attributes {dimension_semantics = [#tpu.dimension_semantics<arbitrary>], iteration_bounds = array<i64: 1>, scalar_prefetch = 0 : i64, scratch_operands = 3 : i64, tpu.core_type = #tpu.core_type<tc>, window_params = [{pipeline_mode = #tpu.pipeline_mode<synchronous>, transform_indices = @transform_0, window_bounds = array<i64: 128, 128>}, {pipeline_mode = #tpu.pipeline_mode<synchronous>, transform_indices = @transform_1, window_bounds = array<i64: 128, 32>}, {pipeline_mode = #tpu.pipeline_mode<synchronous>, transform_indices = @transform_2, window_bounds = array<i64: 1, 32>}, {pipeline_mode = #tpu.pipeline_mode<synchronous>, transform_indices = @transform_3, window_bounds = array<i64: 512, 64>}, {pipeline_mode = #tpu.pipeline_mode<synchronous>, transform_indices = @transform_4, window_bounds = array<i64: 1, 64>}, {pipeline_mode = #tpu.pipeline_mode<synchronous>, transform_indices = @transform_5, window_bounds = array<i64: 576, 64>}, {pipeline_mode = #tpu.pipeline_mode<synchronous>, transform_indices = @transform_6, window_bounds = array<i64: 1, 64>}, {pipeline_mode = #tpu.pipeline_mode<synchronous>, transform_indices = @transform_7, window_bounds = array<i64: 64, 512>}, {pipeline_mode = #tpu.pipeline_mode<synchronous>, transform_indices = @transform_8, window_bounds = array<i64: 1, 512>}, {pipeline_mode = #tpu.pipeline_mode<synchronous>, transform_indices = @transform_9, window_bounds = array<i64: 512, 128>}, {pipeline_mode = #tpu.pipeline_mode<synchronous>, transform_indices = @transform_10, window_bounds = array<i64: 1, 128>}, {pipeline_mode = #tpu.pipeline_mode<synchronous>, transform_indices = @transform_11, window_bounds = array<i64: 2, 128>}]} {
    %c0 = arith.constant 0 : index
    %c0_0 = arith.constant 0 : index
    %0 = vector.load %arg1[%c0, %c0_0] : memref<128x128xbf16, #tpu.memory_space<vmem>>, vector<128x128xbf16>
    %c0_1 = arith.constant 0 : index
    %c0_2 = arith.constant 0 : index
    %1 = vector.load %arg2[%c0_1, %c0_2] : memref<128x32xbf16, #tpu.memory_space<vmem>>, vector<128x32xbf16>
    %cst = arith.constant dense<0.000000e+00> : vector<128x32xf32>
    %2 = tpu.matmul %0, %1, %cst {dimension_numbers = #tpu.dot_dimension_numbers<[1], [0], [0], [1], [0, 0, 1, 1], [], []>} : vector<128x128xbf16>, vector<128x32xbf16>, vector<128x32xf32> -> vector<128x32xf32>
    %c0_3 = arith.constant 0 : index
    %c0_4 = arith.constant 0 : index
    %3 = vector.load %arg3[%c0_3, %c0_4] : memref<1x32xf32, #tpu.memory_space<vmem>>, vector<1x32xf32>
    %4 = vector.broadcast %3 : vector<1x32xf32> to vector<128x32xf32>
    %5 = arith.addf %2, %4 : vector<128x32xf32>
    %cst_5 = arith.constant 0.000000e+00 : f32
    %6 = vector.broadcast %cst_5 : f32 to vector<128x32xf32>
    %7 = arith.maximumf %5, %6 : vector<128x32xf32>
    %c0_6 = arith.constant 0 : index
    %c0_7 = arith.constant 0 : index
    %8 = vector.load %arg13[%c0_6, %c0_7] : memref<128x32xf32, #tpu.memory_space<vmem>>, vector<128x32xf32>
    tpu.vector_store %arg13[%c0_6, %c0_7], %7 {strides = array<i32>} : memref<128x32xf32, #tpu.memory_space<vmem>>, vector<128x32xf32>,
    %c0_8 = arith.constant 0 : index
    %c0_9 = arith.constant 0 : index
    %9 = vector.load %arg13[%c0_8, %c0_9] : memref<128x32xf32, #tpu.memory_space<vmem>>, vector<3x32xf32>
    %c0_10 = arith.constant 0 : index
    %c0_11 = arith.constant 0 : index
    %10 = vector.load %arg14[%c0_10, %c0_11] : memref<18x512xf32, #tpu.memory_space<vmem>>, vector<3x32xf32>
    tpu.vector_store %arg14[%c0_10, %c0_11], %9 {strides = array<i32>} : memref<18x512xf32, #tpu.memory_space<vmem>>, vector<3x32xf32>,
    %c4 = arith.constant 4 : index
    %c0_12 = arith.constant 0 : index
    %11 = vector.load %arg13[%c4, %c0_12] : memref<128x32xf32, #tpu.memory_space<vmem>>, vector<3x32xf32>
    %c0_13 = arith.constant 0 : index
    %c32 = arith.constant 32 : index
    %12 = vector.load %arg14[%c0_13, %c32] : memref<18x512xf32, #tpu.memory_space<vmem>>, vector<3x32xf32>
    tpu.vector_store %arg14[%c0_13, %c32], %11 {strides = array<i32>} : memref<18x512xf32, #tpu.memory_space<vmem>>, vector<3x32xf32>,
    %c1 = arith.constant 1 : index
    %c0_14 = arith.constant 0 : index
    %13 = vector.load %arg13[%c1, %c0_14] : memref<128x32xf32, #tpu.memory_space<vmem>>, vector<3x32xf32>
    %c0_15 = arith.constant 0 : index
    %c64 = arith.constant 64 : index
    %14 = vector.load %arg14[%c0_15, %c64] : memref<18x512xf32, #tpu.memory_space<vmem>>, vector<3x32xf32>
    tpu.vector_store %arg14[%c0_15, %c64], %13 {strides = array<i32>} : memref<18x512xf32, #tpu.memory_space<vmem>>, vector<3x32xf32>,
    %c5 = arith.constant 5 : index
    %c0_16 = arith.constant 0 : index
    %15 = vector.load %arg13[%c5, %c0_16] : memref<128x32xf32, #tpu.memory_space<vmem>>, vector<3x32xf32>
    %c0_17 = arith.constant 0 : index
    %c96 = arith.constant 96 : index
    %16 = vector.load %arg14[%c0_17, %c96] : memref<18x512xf32, #tpu.memory_space<vmem>>, vector<3x32xf32>
    tpu.vector_store %arg14[%c0_17, %c96], %15 {strides = array<i32>} : memref<18x512xf32, #tpu.memory_space<vmem>>, vector<3x32xf32>,
    %c8 = arith.constant 8 : index
    %c0_18 = arith.constant 0 : index
    %17 = vector.load %arg13[%c8, %c0_18] : memref<128x32xf32, #tpu.memory_space<vmem>>, vector<3x32xf32>
    %c0_19 = arith.constant 0 : index
    %c128 = arith.constant 128 : index
    %18 = vector.load %arg14[%c0_19, %c128] : memref<18x512xf32, #tpu.memory_space<vmem>>, vector<3x32xf32>
    tpu.vector_store %arg14[%c0_19, %c128], %17 {strides = array<i32>} : memref<18x512xf32, #tpu.memory_space<vmem>>, vector<3x32xf32>,
    %c12 = arith.constant 12 : index
    %c0_20 = arith.constant 0 : index
    %19 = vector.load %arg13[%c12, %c0_20] : memref<128x32xf32, #tpu.memory_space<vmem>>, vector<3x32xf32>
    %c0_21 = arith.constant 0 : index
    %c160 = arith.constant 160 : index
    %20 = vector.load %arg14[%c0_21, %c160] : memref<18x512xf32, #tpu.memory_space<vmem>>, vector<3x32xf32>
    tpu.vector_store %arg14[%c0_21, %c160], %19 {strides = array<i32>} : memref<18x512xf32, #tpu.memory_space<vmem>>, vector<3x32xf32>,
    %c9 = arith.constant 9 : index
    %c0_22 = arith.constant 0 : index
    %21 = vector.load %arg13[%c9, %c0_22] : memref<128x32xf32, #tpu.memory_space<vmem>>, vector<3x32xf32>
    %c0_23 = arith.constant 0 : index
    %c192 = arith.constant 192 : index
    %22 = vector.load %arg14[%c0_23, %c192] : memref<18x512xf32, #tpu.memory_space<vmem>>, vector<3x32xf32>
    tpu.vector_store %arg14[%c0_23, %c192], %21 {strides = array<i32>} : memref<18x512xf32, #tpu.memory_space<vmem>>, vector<3x32xf32>,
    %c13 = arith.constant 13 : index
    %c0_24 = arith.constant 0 : index
    %23 = vector.load %arg13[%c13, %c0_24] : memref<128x32xf32, #tpu.memory_space<vmem>>, vector<3x32xf32>
    %c0_25 = arith.constant 0 : index
    %c224 = arith.constant 224 : index
    %24 = vector.load %arg14[%c0_25, %c224] : memref<18x512xf32, #tpu.memory_space<vmem>>, vector<3x32xf32>
    tpu.vector_store %arg14[%c0_25, %c224], %23 {strides = array<i32>} : memref<18x512xf32, #tpu.memory_space<vmem>>, vector<3x32xf32>,
    %c16 = arith.constant 16 : index
    %c0_26 = arith.constant 0 : index
    %25 = vector.load %arg13[%c16, %c0_26] : memref<128x32xf32, #tpu.memory_space<vmem>>, vector<3x32xf32>
    %c0_27 = arith.constant 0 : index
    %c256 = arith.constant 256 : index
    %26 = vector.load %arg14[%c0_27, %c256] : memref<18x512xf32, #tpu.memory_space<vmem>>, vector<3x32xf32>
    tpu.vector_store %arg14[%c0_27, %c256], %25 {strides = array<i32>} : memref<18x512xf32, #tpu.memory_space<vmem>>, vector<3x32xf32>,
    %c20 = arith.constant 20 : index
    %c0_28 = arith.constant 0 : index
    %27 = vector.load %arg13[%c20, %c0_28] : memref<128x32xf32, #tpu.memory_space<vmem>>, vector<3x32xf32>
    %c0_29 = arith.constant 0 : index
    %c288 = arith.constant 288 : index
    %28 = vector.load %arg14[%c0_29, %c288] : memref<18x512xf32, #tpu.memory_space<vmem>>, vector<3x32xf32>
    tpu.vector_store %arg14[%c0_29, %c288], %27 {strides = array<i32>} : memref<18x512xf32, #tpu.memory_space<vmem>>, vector<3x32xf32>,
    %c17 = arith.constant 17 : index
    %c0_30 = arith.constant 0 : index
    %29 = vector.load %arg13[%c17, %c0_30] : memref<128x32xf32, #tpu.memory_space<vmem>>, vector<3x32xf32>
    %c0_31 = arith.constant 0 : index
    %c320 = arith.constant 320 : index
    %30 = vector.load %arg14[%c0_31, %c320] : memref<18x512xf32, #tpu.memory_space<vmem>>, vector<3x32xf32>
    tpu.vector_store %arg14[%c0_31, %c320], %29 {strides = array<i32>} : memref<18x512xf32, #tpu.memory_space<vmem>>, vector<3x32xf32>,
    %c21 = arith.constant 21 : index
    %c0_32 = arith.constant 0 : index
    %31 = vector.load %arg13[%c21, %c0_32] : memref<128x32xf32, #tpu.memory_space<vmem>>, vector<3x32xf32>
    %c0_33 = arith.constant 0 : index
    %c352 = arith.constant 352 : index
    %32 = vector.load %arg14[%c0_33, %c352] : memref<18x512xf32, #tpu.memory_space<vmem>>, vector<3x32xf32>
    tpu.vector_store %arg14[%c0_33, %c352], %31 {strides = array<i32>} : memref<18x512xf32, #tpu.memory_space<vmem>>, vector<3x32xf32>,
    %c24 = arith.constant 24 : index
    %c0_34 = arith.constant 0 : index
    %33 = vector.load %arg13[%c24, %c0_34] : memref<128x32xf32, #tpu.memory_space<vmem>>, vector<3x32xf32>
    %c0_35 = arith.constant 0 : index
    %c384 = arith.constant 384 : index
    %34 = vector.load %arg14[%c0_35, %c384] : memref<18x512xf32, #tpu.memory_space<vmem>>, vector<3x32xf32>
    tpu.vector_store %arg14[%c0_35, %c384], %33 {strides = array<i32>} : memref<18x512xf32, #tpu.memory_space<vmem>>, vector<3x32xf32>,
    %c28 = arith.constant 28 : index
    %c0_36 = arith.constant 0 : index
    %35 = vector.load %arg13[%c28, %c0_36] : memref<128x32xf32, #tpu.memory_space<vmem>>, vector<3x32xf32>
    %c0_37 = arith.constant 0 : index
    %c416 = arith.constant 416 : index
    %36 = vector.load %arg14[%c0_37, %c416] : memref<18x512xf32, #tpu.memory_space<vmem>>, vector<3x32xf32>
    tpu.vector_store %arg14[%c0_37, %c416], %35 {strides = array<i32>} : memref<18x512xf32, #tpu.memory_space<vmem>>, vector<3x32xf32>,
    %c25 = arith.constant 25 : index
    %c0_38 = arith.constant 0 : index
    %37 = vector.load %arg13[%c25, %c0_38] : memref<128x32xf32, #tpu.memory_space<vmem>>, vector<3x32xf32>
    %c0_39 = arith.constant 0 : index
    %c448 = arith.constant 448 : index
    %38 = vector.load %arg14[%c0_39, %c448] : memref<18x512xf32, #tpu.memory_space<vmem>>, vector<3x32xf32>
    tpu.vector_store %arg14[%c0_39, %c448], %37 {strides = array<i32>} : memref<18x512xf32, #tpu.memory_space<vmem>>, vector<3x32xf32>,
    %c29 = arith.constant 29 : index
    %c0_40 = arith.constant 0 : index
    %39 = vector.load %arg13[%c29, %c0_40] : memref<128x32xf32, #tpu.memory_space<vmem>>, vector<3x32xf32>
    %c0_41 = arith.constant 0 : index
    %c480 = arith.constant 480 : index
    %40 = vector.load %arg14[%c0_41, %c480] : memref<18x512xf32, #tpu.memory_space<vmem>>, vector<3x32xf32>
    tpu.vector_store %arg14[%c0_41, %c480], %39 {strides = array<i32>} : memref<18x512xf32, #tpu.memory_space<vmem>>, vector<3x32xf32>,
    %c16_42 = arith.constant 16 : index
    %c0_43 = arith.constant 0 : index
    %41 = vector.load %arg13[%c16_42, %c0_43] : memref<128x32xf32, #tpu.memory_space<vmem>>, vector<3x32xf32>
    %c3 = arith.constant 3 : index
    %c0_44 = arith.constant 0 : index
    %42 = vector.load %arg14[%c3, %c0_44] : memref<18x512xf32, #tpu.memory_space<vmem>>, vector<3x32xf32>
    tpu.vector_store %arg14[%c3, %c0_44], %41 {strides = array<i32>} : memref<18x512xf32, #tpu.memory_space<vmem>>, vector<3x32xf32>,
    %c20_45 = arith.constant 20 : index
    %c0_46 = arith.constant 0 : index
    %43 = vector.load %arg13[%c20_45, %c0_46] : memref<128x32xf32, #tpu.memory_space<vmem>>, vector<3x32xf32>
    %c3_47 = arith.constant 3 : index
    %c32_48 = arith.constant 32 : index
    %44 = vector.load %arg14[%c3_47, %c32_48] : memref<18x512xf32, #tpu.memory_space<vmem>>, vector<3x32xf32>
    tpu.vector_store %arg14[%c3_47, %c32_48], %43 {strides = array<i32>} : memref<18x512xf32, #tpu.memory_space<vmem>>, vector<3x32xf32>,
    %c17_49 = arith.constant 17 : index
    %c0_50 = arith.constant 0 : index
    %45 = vector.load %arg13[%c17_49, %c0_50] : memref<128x32xf32, #tpu.memory_space<vmem>>, vector<3x32xf32>
    %c3_51 = arith.constant 3 : index
    %c64_52 = arith.constant 64 : index
    %46 = vector.load %arg14[%c3_51, %c64_52] : memref<18x512xf32, #tpu.memory_space<vmem>>, vector<3x32xf32>
    tpu.vector_store %arg14[%c3_51, %c64_52], %45 {strides = array<i32>} : memref<18x512xf32, #tpu.memory_space<vmem>>, vector<3x32xf32>,
    %c21_53 = arith.constant 21 : index
    %c0_54 = arith.constant 0 : index
    %47 = vector.load %arg13[%c21_53, %c0_54] : memref<128x32xf32, #tpu.memory_space<vmem>>, vector<3x32xf32>
    %c3_55 = arith.constant 3 : index
    %c96_56 = arith.constant 96 : index
    %48 = vector.load %arg14[%c3_55, %c96_56] : memref<18x512xf32, #tpu.memory_space<vmem>>, vector<3x32xf32>
    tpu.vector_store %arg14[%c3_55, %c96_56], %47 {strides = array<i32>} : memref<18x512xf32, #tpu.memory_space<vmem>>, vector<3x32xf32>,
    %c24_57 = arith.constant 24 : index
    %c0_58 = arith.constant 0 : index
    %49 = vector.load %arg13[%c24_57, %c0_58] : memref<128x32xf32, #tpu.memory_space<vmem>>, vector<3x32xf32>
    %c3_59 = arith.constant 3 : index
    %c128_60 = arith.constant 128 : index
    %50 = vector.load %arg14[%c3_59, %c128_60] : memref<18x512xf32, #tpu.memory_space<vmem>>, vector<3x32xf32>
    tpu.vector_store %arg14[%c3_59, %c128_60], %49 {strides = array<i32>} : memref<18x512xf32, #tpu.memory_space<vmem>>, vector<3x32xf32>,
    %c28_61 = arith.constant 28 : index
    %c0_62 = arith.constant 0 : index
    %51 = vector.load %arg13[%c28_61, %c0_62] : memref<128x32xf32, #tpu.memory_space<vmem>>, vector<3x32xf32>
    %c3_63 = arith.constant 3 : index
    %c160_64 = arith.constant 160 : index
    %52 = vector.load %arg14[%c3_63, %c160_64] : memref<18x512xf32, #tpu.memory_space<vmem>>, vector<3x32xf32>
    tpu.vector_store %arg14[%c3_63, %c160_64], %51 {strides = array<i32>} : memref<18x512xf32, #tpu.memory_space<vmem>>, vector<3x32xf32>,
    %c25_65 = arith.constant 25 : index
    %c0_66 = arith.constant 0 : index
    %53 = vector.load %arg13[%c25_65, %c0_66] : memref<128x32xf32, #tpu.memory_space<vmem>>, vector<3x32xf32>
    %c3_67 = arith.constant 3 : index
    %c192_68 = arith.constant 192 : index
    %54 = vector.load %arg14[%c3_67, %c192_68] : memref<18x512xf32, #tpu.memory_space<vmem>>, vector<3x32xf32>
    tpu.vector_store %arg14[%c3_67, %c192_68], %53 {strides = array<i32>} : memref<18x512xf32, #tpu.memory_space<vmem>>, vector<3x32xf32>,
    %c29_69 = arith.constant 29 : index
    %c0_70 = arith.constant 0 : index
    %55 = vector.load %arg13[%c29_69, %c0_70] : memref<128x32xf32, #tpu.memory_space<vmem>>, vector<3x32xf32>
    %c3_71 = arith.constant 3 : index
    %c224_72 = arith.constant 224 : index
    %56 = vector.load %arg14[%c3_71, %c224_72] : memref<18x512xf32, #tpu.memory_space<vmem>>, vector<3x32xf32>
    tpu.vector_store %arg14[%c3_71, %c224_72], %55 {strides = array<i32>} : memref<18x512xf32, #tpu.memory_space<vmem>>, vector<3x32xf32>,
    %c32_73 = arith.constant 32 : index
    %c0_74 = arith.constant 0 : index
    %57 = vector.load %arg13[%c32_73, %c0_74] : memref<128x32xf32, #tpu.memory_space<vmem>>, vector<3x32xf32>
    %c3_75 = arith.constant 3 : index
    %c256_76 = arith.constant 256 : index
    %58 = vector.load %arg14[%c3_75, %c256_76] : memref<18x512xf32, #tpu.memory_space<vmem>>, vector<3x32xf32>
    tpu.vector_store %arg14[%c3_75, %c256_76], %57 {strides = array<i32>} : memref<18x512xf32, #tpu.memory_space<vmem>>, vector<3x32xf32>,
    %c36 = arith.constant 36 : index
    %c0_77 = arith.constant 0 : index
    %59 = vector.load %arg13[%c36, %c0_77] : memref<128x32xf32, #tpu.memory_space<vmem>>, vector<3x32xf32>
    %c3_78 = arith.constant 3 : index
    %c288_79 = arith.constant 288 : index
    %60 = vector.load %arg14[%c3_78, %c288_79] : memref<18x512xf32, #tpu.memory_space<vmem>>, vector<3x32xf32>
    tpu.vector_store %arg14[%c3_78, %c288_79], %59 {strides = array<i32>} : memref<18x512xf32, #tpu.memory_space<vmem>>, vector<3x32xf32>,
    %c33 = arith.constant 33 : index
    %c0_80 = arith.constant 0 : index
    %61 = vector.load %arg13[%c33, %c0_80] : memref<128x32xf32, #tpu.memory_space<vmem>>, vector<3x32xf32>
    %c3_81 = arith.constant 3 : index
    %c320_82 = arith.constant 320 : index
    %62 = vector.load %arg14[%c3_81, %c320_82] : memref<18x512xf32, #tpu.memory_space<vmem>>, vector<3x32xf32>
    tpu.vector_store %arg14[%c3_81, %c320_82], %61 {strides = array<i32>} : memref<18x512xf32, #tpu.memory_space<vmem>>, vector<3x32xf32>,
    %c37 = arith.constant 37 : index
    %c0_83 = arith.constant 0 : index
    %63 = vector.load %arg13[%c37, %c0_83] : memref<128x32xf32, #tpu.memory_space<vmem>>, vector<3x32xf32>
    %c3_84 = arith.constant 3 : index
    %c352_85 = arith.constant 352 : index
    %64 = vector.load %arg14[%c3_84, %c352_85] : memref<18x512xf32, #tpu.memory_space<vmem>>, vector<3x32xf32>
    tpu.vector_store %arg14[%c3_84, %c352_85], %63 {strides = array<i32>} : memref<18x512xf32, #tpu.memory_space<vmem>>, vector<3x32xf32>,
    %c40 = arith.constant 40 : index
    %c0_86 = arith.constant 0 : index
    %65 = vector.load %arg13[%c40, %c0_86] : memref<128x32xf32, #tpu.memory_space<vmem>>, vector<3x32xf32>
    %c3_87 = arith.constant 3 : index
    %c384_88 = arith.constant 384 : index
    %66 = vector.load %arg14[%c3_87, %c384_88] : memref<18x512xf32, #tpu.memory_space<vmem>>, vector<3x32xf32>
    tpu.vector_store %arg14[%c3_87, %c384_88], %65 {strides = array<i32>} : memref<18x512xf32, #tpu.memory_space<vmem>>, vector<3x32xf32>,
    %c44 = arith.constant 44 : index
    %c0_89 = arith.constant 0 : index
    %67 = vector.load %arg13[%c44, %c0_89] : memref<128x32xf32, #tpu.memory_space<vmem>>, vector<3x32xf32>
    %c3_90 = arith.constant 3 : index
    %c416_91 = arith.constant 416 : index
    %68 = vector.load %arg14[%c3_90, %c416_91] : memref<18x512xf32, #tpu.memory_space<vmem>>, vector<3x32xf32>
    tpu.vector_store %arg14[%c3_90, %c416_91], %67 {strides = array<i32>} : memref<18x512xf32, #tpu.memory_space<vmem>>, vector<3x32xf32>,
    %c41 = arith.constant 41 : index
    %c0_92 = arith.constant 0 : index
    %69 = vector.load %arg13[%c41, %c0_92] : memref<128x32xf32, #tpu.memory_space<vmem>>, vector<3x32xf32>
    %c3_93 = arith.constant 3 : index
    %c448_94 = arith.constant 448 : index
    %70 = vector.load %arg14[%c3_93, %c448_94] : memref<18x512xf32, #tpu.memory_space<vmem>>, vector<3x32xf32>
    tpu.vector_store %arg14[%c3_93, %c448_94], %69 {strides = array<i32>} : memref<18x512xf32, #tpu.memory_space<vmem>>, vector<3x32xf32>,
    %c45 = arith.constant 45 : index
    %c0_95 = arith.constant 0 : index
    %71 = vector.load %arg13[%c45, %c0_95] : memref<128x32xf32, #tpu.memory_space<vmem>>, vector<3x32xf32>
    %c3_96 = arith.constant 3 : index
    %c480_97 = arith.constant 480 : index
    %72 = vector.load %arg14[%c3_96, %c480_97] : memref<18x512xf32, #tpu.memory_space<vmem>>, vector<3x32xf32>
    tpu.vector_store %arg14[%c3_96, %c480_97], %71 {strides = array<i32>} : memref<18x512xf32, #tpu.memory_space<vmem>>, vector<3x32xf32>,
    %c32_98 = arith.constant 32 : index
    %c0_99 = arith.constant 0 : index
    %73 = vector.load %arg13[%c32_98, %c0_99] : memref<128x32xf32, #tpu.memory_space<vmem>>, vector<3x32xf32>
    %c6 = arith.constant 6 : index
    %c0_100 = arith.constant 0 : index
    %74 = vector.load %arg14[%c6, %c0_100] : memref<18x512xf32, #tpu.memory_space<vmem>>, vector<3x32xf32>
    tpu.vector_store %arg14[%c6, %c0_100], %73 {strides = array<i32>} : memref<18x512xf32, #tpu.memory_space<vmem>>, vector<3x32xf32>,
    %c36_101 = arith.constant 36 : index
    %c0_102 = arith.constant 0 : index
    %75 = vector.load %arg13[%c36_101, %c0_102] : memref<128x32xf32, #tpu.memory_space<vmem>>, vector<3x32xf32>
    %c6_103 = arith.constant 6 : index
    %c32_104 = arith.constant 32 : index
    %76 = vector.load %arg14[%c6_103, %c32_104] : memref<18x512xf32, #tpu.memory_space<vmem>>, vector<3x32xf32>
    tpu.vector_store %arg14[%c6_103, %c32_104], %75 {strides = array<i32>} : memref<18x512xf32, #tpu.memory_space<vmem>>, vector<3x32xf32>,
    %c33_105 = arith.constant 33 : index
    %c0_106 = arith.constant 0 : index
    %77 = vector.load %arg13[%c33_105, %c0_106] : memref<128x32xf32, #tpu.memory_space<vmem>>, vector<3x32xf32>
    %c6_107 = arith.constant 6 : index
    %c64_108 = arith.constant 64 : index
    %78 = vector.load %arg14[%c6_107, %c64_108] : memref<18x512xf32, #tpu.memory_space<vmem>>, vector<3x32xf32>
    tpu.vector_store %arg14[%c6_107, %c64_108], %77 {strides = array<i32>} : memref<18x512xf32, #tpu.memory_space<vmem>>, vector<3x32xf32>,
    %c37_109 = arith.constant 37 : index
    %c0_110 = arith.constant 0 : index
    %79 = vector.load %arg13[%c37_109, %c0_110] : memref<128x32xf32, #tpu.memory_space<vmem>>, vector<3x32xf32>
    %c6_111 = arith.constant 6 : index
    %c96_112 = arith.constant 96 : index
    %80 = vector.load %arg14[%c6_111, %c96_112] : memref<18x512xf32, #tpu.memory_space<vmem>>, vector<3x32xf32>
    tpu.vector_store %arg14[%c6_111, %c96_112], %79 {strides = array<i32>} : memref<18x512xf32, #tpu.memory_space<vmem>>, vector<3x32xf32>,
    %c40_113 = arith.constant 40 : index
    %c0_114 = arith.constant 0 : index
    %81 = vector.load %arg13[%c40_113, %c0_114] : memref<128x32xf32, #tpu.memory_space<vmem>>, vector<3x32xf32>
    %c6_115 = arith.constant 6 : index
    %c128_116 = arith.constant 128 : index
    %82 = vector.load %arg14[%c6_115, %c128_116] : memref<18x512xf32, #tpu.memory_space<vmem>>, vector<3x32xf32>
    tpu.vector_store %arg14[%c6_115, %c128_116], %81 {strides = array<i32>} : memref<18x512xf32, #tpu.memory_space<vmem>>, vector<3x32xf32>,
    %c44_117 = arith.constant 44 : index
    %c0_118 = arith.constant 0 : index
    %83 = vector.load %arg13[%c44_117, %c0_118] : memref<128x32xf32, #tpu.memory_space<vmem>>, vector<3x32xf32>
    %c6_119 = arith.constant 6 : index
    %c160_120 = arith.constant 160 : index
    %84 = vector.load %arg14[%c6_119, %c160_120] : memref<18x512xf32, #tpu.memory_space<vmem>>, vector<3x32xf32>
    tpu.vector_store %arg14[%c6_119, %c160_120], %83 {strides = array<i32>} : memref<18x512xf32, #tpu.memory_space<vmem>>, vector<3x32xf32>,
    %c41_121 = arith.constant 41 : index
    %c0_122 = arith.constant 0 : index
    %85 = vector.load %arg13[%c41_121, %c0_122] : memref<128x32xf32, #tpu.memory_space<vmem>>, vector<3x32xf32>
    %c6_123 = arith.constant 6 : index
    %c192_124 = arith.constant 192 : index
    %86 = vector.load %arg14[%c6_123, %c192_124] : memref<18x512xf32, #tpu.memory_space<vmem>>, vector<3x32xf32>
    tpu.vector_store %arg14[%c6_123, %c192_124], %85 {strides = array<i32>} : memref<18x512xf32, #tpu.memory_space<vmem>>, vector<3x32xf32>,
    %c45_125 = arith.constant 45 : index
    %c0_126 = arith.constant 0 : index
    %87 = vector.load %arg13[%c45_125, %c0_126] : memref<128x32xf32, #tpu.memory_space<vmem>>, vector<3x32xf32>
    %c6_127 = arith.constant 6 : index
    %c224_128 = arith.constant 224 : index
    %88 = vector.load %arg14[%c6_127, %c224_128] : memref<18x512xf32, #tpu.memory_space<vmem>>, vector<3x32xf32>
    tpu.vector_store %arg14[%c6_127, %c224_128], %87 {strides = array<i32>} : memref<18x512xf32, #tpu.memory_space<vmem>>, vector<3x32xf32>,
    %c48 = arith.constant 48 : index
    %c0_129 = arith.constant 0 : index
    %89 = vector.load %arg13[%c48, %c0_129] : memref<128x32xf32, #tpu.memory_space<vmem>>, vector<3x32xf32>
    %c6_130 = arith.constant 6 : index
    %c256_131 = arith.constant 256 : index
    %90 = vector.load %arg14[%c6_130, %c256_131] : memref<18x512xf32, #tpu.memory_space<vmem>>, vector<3x32xf32>
    tpu.vector_store %arg14[%c6_130, %c256_131], %89 {strides = array<i32>} : memref<18x512xf32, #tpu.memory_space<vmem>>, vector<3x32xf32>,
    %c52 = arith.constant 52 : index
    %c0_132 = arith.constant 0 : index
    %91 = vector.load %arg13[%c52, %c0_132] : memref<128x32xf32, #tpu.memory_space<vmem>>, vector<3x32xf32>
    %c6_133 = arith.constant 6 : index
    %c288_134 = arith.constant 288 : index
    %92 = vector.load %arg14[%c6_133, %c288_134] : memref<18x512xf32, #tpu.memory_space<vmem>>, vector<3x32xf32>
    tpu.vector_store %arg14[%c6_133, %c288_134], %91 {strides = array<i32>} : memref<18x512xf32, #tpu.memory_space<vmem>>, vector<3x32xf32>,
    %c49 = arith.constant 49 : index
    %c0_135 = arith.constant 0 : index
    %93 = vector.load %arg13[%c49, %c0_135] : memref<128x32xf32, #tpu.memory_space<vmem>>, vector<3x32xf32>
    %c6_136 = arith.constant 6 : index
    %c320_137 = arith.constant 320 : index
    %94 = vector.load %arg14[%c6_136, %c320_137] : memref<18x512xf32, #tpu.memory_space<vmem>>, vector<3x32xf32>
    tpu.vector_store %arg14[%c6_136, %c320_137], %93 {strides = array<i32>} : memref<18x512xf32, #tpu.memory_space<vmem>>, vector<3x32xf32>,
    %c53 = arith.constant 53 : index
    %c0_138 = arith.constant 0 : index
    %95 = vector.load %arg13[%c53, %c0_138] : memref<128x32xf32, #tpu.memory_space<vmem>>, vector<3x32xf32>
    %c6_139 = arith.constant 6 : index
    %c352_140 = arith.constant 352 : index
    %96 = vector.load %arg14[%c6_139, %c352_140] : memref<18x512xf32, #tpu.memory_space<vmem>>, vector<3x32xf32>
    tpu.vector_store %arg14[%c6_139, %c352_140], %95 {strides = array<i32>} : memref<18x512xf32, #tpu.memory_space<vmem>>, vector<3x32xf32>,
    %c56 = arith.constant 56 : index
    %c0_141 = arith.constant 0 : index
    %97 = vector.load %arg13[%c56, %c0_141] : memref<128x32xf32, #tpu.memory_space<vmem>>, vector<3x32xf32>
    %c6_142 = arith.constant 6 : index
    %c384_143 = arith.constant 384 : index
    %98 = vector.load %arg14[%c6_142, %c384_143] : memref<18x512xf32, #tpu.memory_space<vmem>>, vector<3x32xf32>
    tpu.vector_store %arg14[%c6_142, %c384_143], %97 {strides = array<i32>} : memref<18x512xf32, #tpu.memory_space<vmem>>, vector<3x32xf32>,
    %c60 = arith.constant 60 : index
    %c0_144 = arith.constant 0 : index
    %99 = vector.load %arg13[%c60, %c0_144] : memref<128x32xf32, #tpu.memory_space<vmem>>, vector<3x32xf32>
    %c6_145 = arith.constant 6 : index
    %c416_146 = arith.constant 416 : index
    %100 = vector.load %arg14[%c6_145, %c416_146] : memref<18x512xf32, #tpu.memory_space<vmem>>, vector<3x32xf32>
    tpu.vector_store %arg14[%c6_145, %c416_146], %99 {strides = array<i32>} : memref<18x512xf32, #tpu.memory_space<vmem>>, vector<3x32xf32>,
    %c57 = arith.constant 57 : index
    %c0_147 = arith.constant 0 : index
    %101 = vector.load %arg13[%c57, %c0_147] : memref<128x32xf32, #tpu.memory_space<vmem>>, vector<3x32xf32>
    %c6_148 = arith.constant 6 : index
    %c448_149 = arith.constant 448 : index
    %102 = vector.load %arg14[%c6_148, %c448_149] : memref<18x512xf32, #tpu.memory_space<vmem>>, vector<3x32xf32>
    tpu.vector_store %arg14[%c6_148, %c448_149], %101 {strides = array<i32>} : memref<18x512xf32, #tpu.memory_space<vmem>>, vector<3x32xf32>,
    %c61 = arith.constant 61 : index
    %c0_150 = arith.constant 0 : index
    %103 = vector.load %arg13[%c61, %c0_150] : memref<128x32xf32, #tpu.memory_space<vmem>>, vector<3x32xf32>
    %c6_151 = arith.constant 6 : index
    %c480_152 = arith.constant 480 : index
    %104 = vector.load %arg14[%c6_151, %c480_152] : memref<18x512xf32, #tpu.memory_space<vmem>>, vector<3x32xf32>
    tpu.vector_store %arg14[%c6_151, %c480_152], %103 {strides = array<i32>} : memref<18x512xf32, #tpu.memory_space<vmem>>, vector<3x32xf32>,
    %c64_153 = arith.constant 64 : index
    %c0_154 = arith.constant 0 : index
    %105 = vector.load %arg13[%c64_153, %c0_154] : memref<128x32xf32, #tpu.memory_space<vmem>>, vector<3x32xf32>
    %c9_155 = arith.constant 9 : index
    %c0_156 = arith.constant 0 : index
    %106 = vector.load %arg14[%c9_155, %c0_156] : memref<18x512xf32, #tpu.memory_space<vmem>>, vector<3x32xf32>
    tpu.vector_store %arg14[%c9_155, %c0_156], %105 {strides = array<i32>} : memref<18x512xf32, #tpu.memory_space<vmem>>, vector<3x32xf32>,
    %c68 = arith.constant 68 : index
    %c0_157 = arith.constant 0 : index
    %107 = vector.load %arg13[%c68, %c0_157] : memref<128x32xf32, #tpu.memory_space<vmem>>, vector<3x32xf32>
    %c9_158 = arith.constant 9 : index
    %c32_159 = arith.constant 32 : index
    %108 = vector.load %arg14[%c9_158, %c32_159] : memref<18x512xf32, #tpu.memory_space<vmem>>, vector<3x32xf32>
    tpu.vector_store %arg14[%c9_158, %c32_159], %107 {strides = array<i32>} : memref<18x512xf32, #tpu.memory_space<vmem>>, vector<3x32xf32>,
    %c65 = arith.constant 65 : index
    %c0_160 = arith.constant 0 : index
    %109 = vector.load %arg13[%c65, %c0_160] : memref<128x32xf32, #tpu.memory_space<vmem>>, vector<3x32xf32>
    %c9_161 = arith.constant 9 : index
    %c64_162 = arith.constant 64 : index
    %110 = vector.load %arg14[%c9_161, %c64_162] : memref<18x512xf32, #tpu.memory_space<vmem>>, vector<3x32xf32>
    tpu.vector_store %arg14[%c9_161, %c64_162], %109 {strides = array<i32>} : memref<18x512xf32, #tpu.memory_space<vmem>>, vector<3x32xf32>,
    %c69 = arith.constant 69 : index
    %c0_163 = arith.constant 0 : index
    %111 = vector.load %arg13[%c69, %c0_163] : memref<128x32xf32, #tpu.memory_space<vmem>>, vector<3x32xf32>
    %c9_164 = arith.constant 9 : index
    %c96_165 = arith.constant 96 : index
    %112 = vector.load %arg14[%c9_164, %c96_165] : memref<18x512xf32, #tpu.memory_space<vmem>>, vector<3x32xf32>
    tpu.vector_store %arg14[%c9_164, %c96_165], %111 {strides = array<i32>} : memref<18x512xf32, #tpu.memory_space<vmem>>, vector<3x32xf32>,
    %c72 = arith.constant 72 : index
    %c0_166 = arith.constant 0 : index
    %113 = vector.load %arg13[%c72, %c0_166] : memref<128x32xf32, #tpu.memory_space<vmem>>, vector<3x32xf32>
    %c9_167 = arith.constant 9 : index
    %c128_168 = arith.constant 128 : index
    %114 = vector.load %arg14[%c9_167, %c128_168] : memref<18x512xf32, #tpu.memory_space<vmem>>, vector<3x32xf32>
    tpu.vector_store %arg14[%c9_167, %c128_168], %113 {strides = array<i32>} : memref<18x512xf32, #tpu.memory_space<vmem>>, vector<3x32xf32>,
    %c76 = arith.constant 76 : index
    %c0_169 = arith.constant 0 : index
    %115 = vector.load %arg13[%c76, %c0_169] : memref<128x32xf32, #tpu.memory_space<vmem>>, vector<3x32xf32>
    %c9_170 = arith.constant 9 : index
    %c160_171 = arith.constant 160 : index
    %116 = vector.load %arg14[%c9_170, %c160_171] : memref<18x512xf32, #tpu.memory_space<vmem>>, vector<3x32xf32>
    tpu.vector_store %arg14[%c9_170, %c160_171], %115 {strides = array<i32>} : memref<18x512xf32, #tpu.memory_space<vmem>>, vector<3x32xf32>,
    %c73 = arith.constant 73 : index
    %c0_172 = arith.constant 0 : index
    %117 = vector.load %arg13[%c73, %c0_172] : memref<128x32xf32, #tpu.memory_space<vmem>>, vector<3x32xf32>
    %c9_173 = arith.constant 9 : index
    %c192_174 = arith.constant 192 : index
    %118 = vector.load %arg14[%c9_173, %c192_174] : memref<18x512xf32, #tpu.memory_space<vmem>>, vector<3x32xf32>
    tpu.vector_store %arg14[%c9_173, %c192_174], %117 {strides = array<i32>} : memref<18x512xf32, #tpu.memory_space<vmem>>, vector<3x32xf32>,
    %c77 = arith.constant 77 : index
    %c0_175 = arith.constant 0 : index
    %119 = vector.load %arg13[%c77, %c0_175] : memref<128x32xf32, #tpu.memory_space<vmem>>, vector<3x32xf32>
    %c9_176 = arith.constant 9 : index
    %c224_177 = arith.constant 224 : index
    %120 = vector.load %arg14[%c9_176, %c224_177] : memref<18x512xf32, #tpu.memory_space<vmem>>, vector<3x32xf32>
    tpu.vector_store %arg14[%c9_176, %c224_177], %119 {strides = array<i32>} : memref<18x512xf32, #tpu.memory_space<vmem>>, vector<3x32xf32>,
    %c80 = arith.constant 80 : index
    %c0_178 = arith.constant 0 : index
    %121 = vector.load %arg13[%c80, %c0_178] : memref<128x32xf32, #tpu.memory_space<vmem>>, vector<3x32xf32>
    %c9_179 = arith.constant 9 : index
    %c256_180 = arith.constant 256 : index
    %122 = vector.load %arg14[%c9_179, %c256_180] : memref<18x512xf32, #tpu.memory_space<vmem>>, vector<3x32xf32>
    tpu.vector_store %arg14[%c9_179, %c256_180], %121 {strides = array<i32>} : memref<18x512xf32, #tpu.memory_space<vmem>>, vector<3x32xf32>,
    %c84 = arith.constant 84 : index
    %c0_181 = arith.constant 0 : index
    %123 = vector.load %arg13[%c84, %c0_181] : memref<128x32xf32, #tpu.memory_space<vmem>>, vector<3x32xf32>
    %c9_182 = arith.constant 9 : index
    %c288_183 = arith.constant 288 : index
    %124 = vector.load %arg14[%c9_182, %c288_183] : memref<18x512xf32, #tpu.memory_space<vmem>>, vector<3x32xf32>
    tpu.vector_store %arg14[%c9_182, %c288_183], %123 {strides = array<i32>} : memref<18x512xf32, #tpu.memory_space<vmem>>, vector<3x32xf32>,
    %c81 = arith.constant 81 : index
    %c0_184 = arith.constant 0 : index
    %125 = vector.load %arg13[%c81, %c0_184] : memref<128x32xf32, #tpu.memory_space<vmem>>, vector<3x32xf32>
    %c9_185 = arith.constant 9 : index
    %c320_186 = arith.constant 320 : index
    %126 = vector.load %arg14[%c9_185, %c320_186] : memref<18x512xf32, #tpu.memory_space<vmem>>, vector<3x32xf32>
    tpu.vector_store %arg14[%c9_185, %c320_186], %125 {strides = array<i32>} : memref<18x512xf32, #tpu.memory_space<vmem>>, vector<3x32xf32>,
    %c85 = arith.constant 85 : index
    %c0_187 = arith.constant 0 : index
    %127 = vector.load %arg13[%c85, %c0_187] : memref<128x32xf32, #tpu.memory_space<vmem>>, vector<3x32xf32>
    %c9_188 = arith.constant 9 : index
    %c352_189 = arith.constant 352 : index
    %128 = vector.load %arg14[%c9_188, %c352_189] : memref<18x512xf32, #tpu.memory_space<vmem>>, vector<3x32xf32>
    tpu.vector_store %arg14[%c9_188, %c352_189], %127 {strides = array<i32>} : memref<18x512xf32, #tpu.memory_space<vmem>>, vector<3x32xf32>,
    %c88 = arith.constant 88 : index
    %c0_190 = arith.constant 0 : index
    %129 = vector.load %arg13[%c88, %c0_190] : memref<128x32xf32, #tpu.memory_space<vmem>>, vector<3x32xf32>
    %c9_191 = arith.constant 9 : index
    %c384_192 = arith.constant 384 : index
    %130 = vector.load %arg14[%c9_191, %c384_192] : memref<18x512xf32, #tpu.memory_space<vmem>>, vector<3x32xf32>
    tpu.vector_store %arg14[%c9_191, %c384_192], %129 {strides = array<i32>} : memref<18x512xf32, #tpu.memory_space<vmem>>, vector<3x32xf32>,
    %c92 = arith.constant 92 : index
    %c0_193 = arith.constant 0 : index
    %131 = vector.load %arg13[%c92, %c0_193] : memref<128x32xf32, #tpu.memory_space<vmem>>, vector<3x32xf32>
    %c9_194 = arith.constant 9 : index
    %c416_195 = arith.constant 416 : index
    %132 = vector.load %arg14[%c9_194, %c416_195] : memref<18x512xf32, #tpu.memory_space<vmem>>, vector<3x32xf32>
    tpu.vector_store %arg14[%c9_194, %c416_195], %131 {strides = array<i32>} : memref<18x512xf32, #tpu.memory_space<vmem>>, vector<3x32xf32>,
    %c89 = arith.constant 89 : index
    %c0_196 = arith.constant 0 : index
    %133 = vector.load %arg13[%c89, %c0_196] : memref<128x32xf32, #tpu.memory_space<vmem>>, vector<3x32xf32>
    %c9_197 = arith.constant 9 : index
    %c448_198 = arith.constant 448 : index
    %134 = vector.load %arg14[%c9_197, %c448_198] : memref<18x512xf32, #tpu.memory_space<vmem>>, vector<3x32xf32>
    tpu.vector_store %arg14[%c9_197, %c448_198], %133 {strides = array<i32>} : memref<18x512xf32, #tpu.memory_space<vmem>>, vector<3x32xf32>,
    %c93 = arith.constant 93 : index
    %c0_199 = arith.constant 0 : index
    %135 = vector.load %arg13[%c93, %c0_199] : memref<128x32xf32, #tpu.memory_space<vmem>>, vector<3x32xf32>
    %c9_200 = arith.constant 9 : index
    %c480_201 = arith.constant 480 : index
    %136 = vector.load %arg14[%c9_200, %c480_201] : memref<18x512xf32, #tpu.memory_space<vmem>>, vector<3x32xf32>
    tpu.vector_store %arg14[%c9_200, %c480_201], %135 {strides = array<i32>} : memref<18x512xf32, #tpu.memory_space<vmem>>, vector<3x32xf32>,
    %c80_202 = arith.constant 80 : index
    %c0_203 = arith.constant 0 : index
    %137 = vector.load %arg13[%c80_202, %c0_203] : memref<128x32xf32, #tpu.memory_space<vmem>>, vector<3x32xf32>
    %c12_204 = arith.constant 12 : index
    %c0_205 = arith.constant 0 : index
    %138 = vector.load %arg14[%c12_204, %c0_205] : memref<18x512xf32, #tpu.memory_space<vmem>>, vector<3x32xf32>
    tpu.vector_store %arg14[%c12_204, %c0_205], %137 {strides = array<i32>} : memref<18x512xf32, #tpu.memory_space<vmem>>, vector<3x32xf32>,
    %c84_206 = arith.constant 84 : index
    %c0_207 = arith.constant 0 : index
    %139 = vector.load %arg13[%c84_206, %c0_207] : memref<128x32xf32, #tpu.memory_space<vmem>>, vector<3x32xf32>
    %c12_208 = arith.constant 12 : index
    %c32_209 = arith.constant 32 : index
    %140 = vector.load %arg14[%c12_208, %c32_209] : memref<18x512xf32, #tpu.memory_space<vmem>>, vector<3x32xf32>
    tpu.vector_store %arg14[%c12_208, %c32_209], %139 {strides = array<i32>} : memref<18x512xf32, #tpu.memory_space<vmem>>, vector<3x32xf32>,
    %c81_210 = arith.constant 81 : index
    %c0_211 = arith.constant 0 : index
    %141 = vector.load %arg13[%c81_210, %c0_211] : memref<128x32xf32, #tpu.memory_space<vmem>>, vector<3x32xf32>
    %c12_212 = arith.constant 12 : index
    %c64_213 = arith.constant 64 : index
    %142 = vector.load %arg14[%c12_212, %c64_213] : memref<18x512xf32, #tpu.memory_space<vmem>>, vector<3x32xf32>
    tpu.vector_store %arg14[%c12_212, %c64_213], %141 {strides = array<i32>} : memref<18x512xf32, #tpu.memory_space<vmem>>, vector<3x32xf32>,
    %c85_214 = arith.constant 85 : index
    %c0_215 = arith.constant 0 : index
    %143 = vector.load %arg13[%c85_214, %c0_215] : memref<128x32xf32, #tpu.memory_space<vmem>>, vector<3x32xf32>
    %c12_216 = arith.constant 12 : index
    %c96_217 = arith.constant 96 : index
    %144 = vector.load %arg14[%c12_216, %c96_217] : memref<18x512xf32, #tpu.memory_space<vmem>>, vector<3x32xf32>
    tpu.vector_store %arg14[%c12_216, %c96_217], %143 {strides = array<i32>} : memref<18x512xf32, #tpu.memory_space<vmem>>, vector<3x32xf32>,
    %c88_218 = arith.constant 88 : index
    %c0_219 = arith.constant 0 : index
    %145 = vector.load %arg13[%c88_218, %c0_219] : memref<128x32xf32, #tpu.memory_space<vmem>>, vector<3x32xf32>
    %c12_220 = arith.constant 12 : index
    %c128_221 = arith.constant 128 : index
    %146 = vector.load %arg14[%c12_220, %c128_221] : memref<18x512xf32, #tpu.memory_space<vmem>>, vector<3x32xf32>
    tpu.vector_store %arg14[%c12_220, %c128_221], %145 {strides = array<i32>} : memref<18x512xf32, #tpu.memory_space<vmem>>, vector<3x32xf32>,
    %c92_222 = arith.constant 92 : index
    %c0_223 = arith.constant 0 : index
    %147 = vector.load %arg13[%c92_222, %c0_223] : memref<128x32xf32, #tpu.memory_space<vmem>>, vector<3x32xf32>
    %c12_224 = arith.constant 12 : index
    %c160_225 = arith.constant 160 : index
    %148 = vector.load %arg14[%c12_224, %c160_225] : memref<18x512xf32, #tpu.memory_space<vmem>>, vector<3x32xf32>
    tpu.vector_store %arg14[%c12_224, %c160_225], %147 {strides = array<i32>} : memref<18x512xf32, #tpu.memory_space<vmem>>, vector<3x32xf32>,
    %c89_226 = arith.constant 89 : index
    %c0_227 = arith.constant 0 : index
    %149 = vector.load %arg13[%c89_226, %c0_227] : memref<128x32xf32, #tpu.memory_space<vmem>>, vector<3x32xf32>
    %c12_228 = arith.constant 12 : index
    %c192_229 = arith.constant 192 : index
    %150 = vector.load %arg14[%c12_228, %c192_229] : memref<18x512xf32, #tpu.memory_space<vmem>>, vector<3x32xf32>
    tpu.vector_store %arg14[%c12_228, %c192_229], %149 {strides = array<i32>} : memref<18x512xf32, #tpu.memory_space<vmem>>, vector<3x32xf32>,
    %c93_230 = arith.constant 93 : index
    %c0_231 = arith.constant 0 : index
    %151 = vector.load %arg13[%c93_230, %c0_231] : memref<128x32xf32, #tpu.memory_space<vmem>>, vector<3x32xf32>
    %c12_232 = arith.constant 12 : index
    %c224_233 = arith.constant 224 : index
    %152 = vector.load %arg14[%c12_232, %c224_233] : memref<18x512xf32, #tpu.memory_space<vmem>>, vector<3x32xf32>
    tpu.vector_store %arg14[%c12_232, %c224_233], %151 {strides = array<i32>} : memref<18x512xf32, #tpu.memory_space<vmem>>, vector<3x32xf32>,
    %c96_234 = arith.constant 96 : index
    %c0_235 = arith.constant 0 : index
    %153 = vector.load %arg13[%c96_234, %c0_235] : memref<128x32xf32, #tpu.memory_space<vmem>>, vector<3x32xf32>
    %c12_236 = arith.constant 12 : index
    %c256_237 = arith.constant 256 : index
    %154 = vector.load %arg14[%c12_236, %c256_237] : memref<18x512xf32, #tpu.memory_space<vmem>>, vector<3x32xf32>
    tpu.vector_store %arg14[%c12_236, %c256_237], %153 {strides = array<i32>} : memref<18x512xf32, #tpu.memory_space<vmem>>, vector<3x32xf32>,
    %c100 = arith.constant 100 : index
    %c0_238 = arith.constant 0 : index
    %155 = vector.load %arg13[%c100, %c0_238] : memref<128x32xf32, #tpu.memory_space<vmem>>, vector<3x32xf32>
    %c12_239 = arith.constant 12 : index
    %c288_240 = arith.constant 288 : index
    %156 = vector.load %arg14[%c12_239, %c288_240] : memref<18x512xf32, #tpu.memory_space<vmem>>, vector<3x32xf32>
    tpu.vector_store %arg14[%c12_239, %c288_240], %155 {strides = array<i32>} : memref<18x512xf32, #tpu.memory_space<vmem>>, vector<3x32xf32>,
    %c97 = arith.constant 97 : index
    %c0_241 = arith.constant 0 : index
    %157 = vector.load %arg13[%c97, %c0_241] : memref<128x32xf32, #tpu.memory_space<vmem>>, vector<3x32xf32>
    %c12_242 = arith.constant 12 : index
    %c320_243 = arith.constant 320 : index
    %158 = vector.load %arg14[%c12_242, %c320_243] : memref<18x512xf32, #tpu.memory_space<vmem>>, vector<3x32xf32>
    tpu.vector_store %arg14[%c12_242, %c320_243], %157 {strides = array<i32>} : memref<18x512xf32, #tpu.memory_space<vmem>>, vector<3x32xf32>,
    %c101 = arith.constant 101 : index
    %c0_244 = arith.constant 0 : index
    %159 = vector.load %arg13[%c101, %c0_244] : memref<128x32xf32, #tpu.memory_space<vmem>>, vector<3x32xf32>
    %c12_245 = arith.constant 12 : index
    %c352_246 = arith.constant 352 : index
    %160 = vector.load %arg14[%c12_245, %c352_246] : memref<18x512xf32, #tpu.memory_space<vmem>>, vector<3x32xf32>
    tpu.vector_store %arg14[%c12_245, %c352_246], %159 {strides = array<i32>} : memref<18x512xf32, #tpu.memory_space<vmem>>, vector<3x32xf32>,
    %c104 = arith.constant 104 : index
    %c0_247 = arith.constant 0 : index
    %161 = vector.load %arg13[%c104, %c0_247] : memref<128x32xf32, #tpu.memory_space<vmem>>, vector<3x32xf32>
    %c12_248 = arith.constant 12 : index
    %c384_249 = arith.constant 384 : index
    %162 = vector.load %arg14[%c12_248, %c384_249] : memref<18x512xf32, #tpu.memory_space<vmem>>, vector<3x32xf32>
    tpu.vector_store %arg14[%c12_248, %c384_249], %161 {strides = array<i32>} : memref<18x512xf32, #tpu.memory_space<vmem>>, vector<3x32xf32>,
    %c108 = arith.constant 108 : index
    %c0_250 = arith.constant 0 : index
    %163 = vector.load %arg13[%c108, %c0_250] : memref<128x32xf32, #tpu.memory_space<vmem>>, vector<3x32xf32>
    %c12_251 = arith.constant 12 : index
    %c416_252 = arith.constant 416 : index
    %164 = vector.load %arg14[%c12_251, %c416_252] : memref<18x512xf32, #tpu.memory_space<vmem>>, vector<3x32xf32>
    tpu.vector_store %arg14[%c12_251, %c416_252], %163 {strides = array<i32>} : memref<18x512xf32, #tpu.memory_space<vmem>>, vector<3x32xf32>,
    %c105 = arith.constant 105 : index
    %c0_253 = arith.constant 0 : index
    %165 = vector.load %arg13[%c105, %c0_253] : memref<128x32xf32, #tpu.memory_space<vmem>>, vector<3x32xf32>
    %c12_254 = arith.constant 12 : index
    %c448_255 = arith.constant 448 : index
    %166 = vector.load %arg14[%c12_254, %c448_255] : memref<18x512xf32, #tpu.memory_space<vmem>>, vector<3x32xf32>
    tpu.vector_store %arg14[%c12_254, %c448_255], %165 {strides = array<i32>} : memref<18x512xf32, #tpu.memory_space<vmem>>, vector<3x32xf32>,
    %c109 = arith.constant 109 : index
    %c0_256 = arith.constant 0 : index
    %167 = vector.load %arg13[%c109, %c0_256] : memref<128x32xf32, #tpu.memory_space<vmem>>, vector<3x32xf32>
    %c12_257 = arith.constant 12 : index
    %c480_258 = arith.constant 480 : index
    %168 = vector.load %arg14[%c12_257, %c480_258] : memref<18x512xf32, #tpu.memory_space<vmem>>, vector<3x32xf32>
    tpu.vector_store %arg14[%c12_257, %c480_258], %167 {strides = array<i32>} : memref<18x512xf32, #tpu.memory_space<vmem>>, vector<3x32xf32>,
    %c96_259 = arith.constant 96 : index
    %c0_260 = arith.constant 0 : index
    %169 = vector.load %arg13[%c96_259, %c0_260] : memref<128x32xf32, #tpu.memory_space<vmem>>, vector<3x32xf32>
    %c15 = arith.constant 15 : index
    %c0_261 = arith.constant 0 : index
    %170 = vector.load %arg14[%c15, %c0_261] : memref<18x512xf32, #tpu.memory_space<vmem>>, vector<3x32xf32>
    tpu.vector_store %arg14[%c15, %c0_261], %169 {strides = array<i32>} : memref<18x512xf32, #tpu.memory_space<vmem>>, vector<3x32xf32>,
    %c100_262 = arith.constant 100 : index
    %c0_263 = arith.constant 0 : index
    %171 = vector.load %arg13[%c100_262, %c0_263] : memref<128x32xf32, #tpu.memory_space<vmem>>, vector<3x32xf32>
    %c15_264 = arith.constant 15 : index
    %c32_265 = arith.constant 32 : index
    %172 = vector.load %arg14[%c15_264, %c32_265] : memref<18x512xf32, #tpu.memory_space<vmem>>, vector<3x32xf32>
    tpu.vector_store %arg14[%c15_264, %c32_265], %171 {strides = array<i32>} : memref<18x512xf32, #tpu.memory_space<vmem>>, vector<3x32xf32>,
    %c97_266 = arith.constant 97 : index
    %c0_267 = arith.constant 0 : index
    %173 = vector.load %arg13[%c97_266, %c0_267] : memref<128x32xf32, #tpu.memory_space<vmem>>, vector<3x32xf32>
    %c15_268 = arith.constant 15 : index
    %c64_269 = arith.constant 64 : index
    %174 = vector.load %arg14[%c15_268, %c64_269] : memref<18x512xf32, #tpu.memory_space<vmem>>, vector<3x32xf32>
    tpu.vector_store %arg14[%c15_268, %c64_269], %173 {strides = array<i32>} : memref<18x512xf32, #tpu.memory_space<vmem>>, vector<3x32xf32>,
    %c101_270 = arith.constant 101 : index
    %c0_271 = arith.constant 0 : index
    %175 = vector.load %arg13[%c101_270, %c0_271] : memref<128x32xf32, #tpu.memory_space<vmem>>, vector<3x32xf32>
    %c15_272 = arith.constant 15 : index
    %c96_273 = arith.constant 96 : index
    %176 = vector.load %arg14[%c15_272, %c96_273] : memref<18x512xf32, #tpu.memory_space<vmem>>, vector<3x32xf32>
    tpu.vector_store %arg14[%c15_272, %c96_273], %175 {strides = array<i32>} : memref<18x512xf32, #tpu.memory_space<vmem>>, vector<3x32xf32>,
    %c104_274 = arith.constant 104 : index
    %c0_275 = arith.constant 0 : index
    %177 = vector.load %arg13[%c104_274, %c0_275] : memref<128x32xf32, #tpu.memory_space<vmem>>, vector<3x32xf32>
    %c15_276 = arith.constant 15 : index
    %c128_277 = arith.constant 128 : index
    %178 = vector.load %arg14[%c15_276, %c128_277] : memref<18x512xf32, #tpu.memory_space<vmem>>, vector<3x32xf32>
    tpu.vector_store %arg14[%c15_276, %c128_277], %177 {strides = array<i32>} : memref<18x512xf32, #tpu.memory_space<vmem>>, vector<3x32xf32>,
    %c108_278 = arith.constant 108 : index
    %c0_279 = arith.constant 0 : index
    %179 = vector.load %arg13[%c108_278, %c0_279] : memref<128x32xf32, #tpu.memory_space<vmem>>, vector<3x32xf32>
    %c15_280 = arith.constant 15 : index
    %c160_281 = arith.constant 160 : index
    %180 = vector.load %arg14[%c15_280, %c160_281] : memref<18x512xf32, #tpu.memory_space<vmem>>, vector<3x32xf32>
    tpu.vector_store %arg14[%c15_280, %c160_281], %179 {strides = array<i32>} : memref<18x512xf32, #tpu.memory_space<vmem>>, vector<3x32xf32>,
    %c105_282 = arith.constant 105 : index
    %c0_283 = arith.constant 0 : index
    %181 = vector.load %arg13[%c105_282, %c0_283] : memref<128x32xf32, #tpu.memory_space<vmem>>, vector<3x32xf32>
    %c15_284 = arith.constant 15 : index
    %c192_285 = arith.constant 192 : index
    %182 = vector.load %arg14[%c15_284, %c192_285] : memref<18x512xf32, #tpu.memory_space<vmem>>, vector<3x32xf32>
    tpu.vector_store %arg14[%c15_284, %c192_285], %181 {strides = array<i32>} : memref<18x512xf32, #tpu.memory_space<vmem>>, vector<3x32xf32>,
    %c109_286 = arith.constant 109 : index
    %c0_287 = arith.constant 0 : index
    %183 = vector.load %arg13[%c109_286, %c0_287] : memref<128x32xf32, #tpu.memory_space<vmem>>, vector<3x32xf32>
    %c15_288 = arith.constant 15 : index
    %c224_289 = arith.constant 224 : index
    %184 = vector.load %arg14[%c15_288, %c224_289] : memref<18x512xf32, #tpu.memory_space<vmem>>, vector<3x32xf32>
    tpu.vector_store %arg14[%c15_288, %c224_289], %183 {strides = array<i32>} : memref<18x512xf32, #tpu.memory_space<vmem>>, vector<3x32xf32>,
    %c112 = arith.constant 112 : index
    %c0_290 = arith.constant 0 : index
    %185 = vector.load %arg13[%c112, %c0_290] : memref<128x32xf32, #tpu.memory_space<vmem>>, vector<3x32xf32>
    %c15_291 = arith.constant 15 : index
    %c256_292 = arith.constant 256 : index
    %186 = vector.load %arg14[%c15_291, %c256_292] : memref<18x512xf32, #tpu.memory_space<vmem>>, vector<3x32xf32>
    tpu.vector_store %arg14[%c15_291, %c256_292], %185 {strides = array<i32>} : memref<18x512xf32, #tpu.memory_space<vmem>>, vector<3x32xf32>,
    %c116 = arith.constant 116 : index
    %c0_293 = arith.constant 0 : index
    %187 = vector.load %arg13[%c116, %c0_293] : memref<128x32xf32, #tpu.memory_space<vmem>>, vector<3x32xf32>
    %c15_294 = arith.constant 15 : index
    %c288_295 = arith.constant 288 : index
    %188 = vector.load %arg14[%c15_294, %c288_295] : memref<18x512xf32, #tpu.memory_space<vmem>>, vector<3x32xf32>
    tpu.vector_store %arg14[%c15_294, %c288_295], %187 {strides = array<i32>} : memref<18x512xf32, #tpu.memory_space<vmem>>, vector<3x32xf32>,
    %c113 = arith.constant 113 : index
    %c0_296 = arith.constant 0 : index
    %189 = vector.load %arg13[%c113, %c0_296] : memref<128x32xf32, #tpu.memory_space<vmem>>, vector<3x32xf32>
    %c15_297 = arith.constant 15 : index
    %c320_298 = arith.constant 320 : index
    %190 = vector.load %arg14[%c15_297, %c320_298] : memref<18x512xf32, #tpu.memory_space<vmem>>, vector<3x32xf32>
    tpu.vector_store %arg14[%c15_297, %c320_298], %189 {strides = array<i32>} : memref<18x512xf32, #tpu.memory_space<vmem>>, vector<3x32xf32>,
    %c117 = arith.constant 117 : index
    %c0_299 = arith.constant 0 : index
    %191 = vector.load %arg13[%c117, %c0_299] : memref<128x32xf32, #tpu.memory_space<vmem>>, vector<3x32xf32>
    %c15_300 = arith.constant 15 : index
    %c352_301 = arith.constant 352 : index
    %192 = vector.load %arg14[%c15_300, %c352_301] : memref<18x512xf32, #tpu.memory_space<vmem>>, vector<3x32xf32>
    tpu.vector_store %arg14[%c15_300, %c352_301], %191 {strides = array<i32>} : memref<18x512xf32, #tpu.memory_space<vmem>>, vector<3x32xf32>,
    %c120 = arith.constant 120 : index
    %c0_302 = arith.constant 0 : index
    %193 = vector.load %arg13[%c120, %c0_302] : memref<128x32xf32, #tpu.memory_space<vmem>>, vector<3x32xf32>
    %c15_303 = arith.constant 15 : index
    %c384_304 = arith.constant 384 : index
    %194 = vector.load %arg14[%c15_303, %c384_304] : memref<18x512xf32, #tpu.memory_space<vmem>>, vector<3x32xf32>
    tpu.vector_store %arg14[%c15_303, %c384_304], %193 {strides = array<i32>} : memref<18x512xf32, #tpu.memory_space<vmem>>, vector<3x32xf32>,
    %c124 = arith.constant 124 : index
    %c0_305 = arith.constant 0 : index
    %195 = vector.load %arg13[%c124, %c0_305] : memref<128x32xf32, #tpu.memory_space<vmem>>, vector<3x32xf32>
    %c15_306 = arith.constant 15 : index
    %c416_307 = arith.constant 416 : index
    %196 = vector.load %arg14[%c15_306, %c416_307] : memref<18x512xf32, #tpu.memory_space<vmem>>, vector<3x32xf32>
    tpu.vector_store %arg14[%c15_306, %c416_307], %195 {strides = array<i32>} : memref<18x512xf32, #tpu.memory_space<vmem>>, vector<3x32xf32>,
    %c121 = arith.constant 121 : index
    %c0_308 = arith.constant 0 : index
    %197 = vector.load %arg13[%c121, %c0_308] : memref<128x32xf32, #tpu.memory_space<vmem>>, vector<3x32xf32>
    %c15_309 = arith.constant 15 : index
    %c448_310 = arith.constant 448 : index
    %198 = vector.load %arg14[%c15_309, %c448_310] : memref<18x512xf32, #tpu.memory_space<vmem>>, vector<3x32xf32>
    tpu.vector_store %arg14[%c15_309, %c448_310], %197 {strides = array<i32>} : memref<18x512xf32, #tpu.memory_space<vmem>>, vector<3x32xf32>,
    %c125 = arith.constant 125 : index
    %c0_311 = arith.constant 0 : index
    %199 = vector.load %arg13[%c125, %c0_311] : memref<128x32xf32, #tpu.memory_space<vmem>>, vector<3x32xf32>
    %c15_312 = arith.constant 15 : index
    %c480_313 = arith.constant 480 : index
    %200 = vector.load %arg14[%c15_312, %c480_313] : memref<18x512xf32, #tpu.memory_space<vmem>>, vector<3x32xf32>
    tpu.vector_store %arg14[%c15_312, %c480_313], %199 {strides = array<i32>} : memref<18x512xf32, #tpu.memory_space<vmem>>, vector<3x32xf32>,
    %c0_314 = arith.constant 0 : index
    %c0_315 = arith.constant 0 : index
    %201 = vector.load %arg14[%c0_314, %c0_315] : memref<18x512xf32, #tpu.memory_space<vmem>>, vector<18x512xf32>
    %202 = arith.truncf %201 : vector<18x512xf32> to vector<18x512xbf16>
    %c0_316 = arith.constant 0 : index
    %c0_317 = arith.constant 0 : index
    %203 = vector.load %arg4[%c0_316, %c0_317] : memref<512x64xbf16, #tpu.memory_space<vmem>>, vector<512x64xbf16>
    %cst_318 = arith.constant dense<0.000000e+00> : vector<18x64xf32>
    %204 = tpu.matmul %202, %203, %cst_318 {dimension_numbers = #tpu.dot_dimension_numbers<[1], [0], [0], [1], [0, 0, 1, 1], [], []>} : vector<18x512xbf16>, vector<512x64xbf16>, vector<18x64xf32> -> vector<18x64xf32>
    %c0_319 = arith.constant 0 : index
    %c0_320 = arith.constant 0 : index
    %205 = vector.load %arg5[%c0_319, %c0_320] : memref<1x64xf32, #tpu.memory_space<vmem>>, vector<1x64xf32>
    %206 = vector.broadcast %205 : vector<1x64xf32> to vector<18x64xf32>
    %207 = arith.addf %204, %206 : vector<18x64xf32>
    %cst_321 = arith.constant 0.000000e+00 : f32
    %208 = vector.broadcast %cst_321 : f32 to vector<18x64xf32>
    %209 = arith.maximumf %207, %208 : vector<18x64xf32>
    %210 = vector.extract_strided_slice %209 {offsets = [0, 0], sizes = [1, 64], strides = [1, 1]} : vector<18x64xf32> to vector<1x64xf32>
    %c0_322 = arith.constant 0 : index
    %c0_323 = arith.constant 0 : index
    %211 = vector.load %arg15[%c0_322, %c0_323] : memref<2x576xf32, #tpu.memory_space<vmem>>, vector<1x64xf32>
    tpu.vector_store %arg15[%c0_322, %c0_323], %210 {strides = array<i32>} : memref<2x576xf32, #tpu.memory_space<vmem>>, vector<1x64xf32>,
    %212 = vector.extract_strided_slice %209 {offsets = [1, 0], sizes = [1, 64], strides = [1, 1]} : vector<18x64xf32> to vector<1x64xf32>
    %c0_324 = arith.constant 0 : index
    %c64_325 = arith.constant 64 : index
    %213 = vector.load %arg15[%c0_324, %c64_325] : memref<2x576xf32, #tpu.memory_space<vmem>>, vector<1x64xf32>
    tpu.vector_store %arg15[%c0_324, %c64_325], %212 {strides = array<i32>} : memref<2x576xf32, #tpu.memory_space<vmem>>, vector<1x64xf32>,
    %214 = vector.extract_strided_slice %209 {offsets = [2, 0], sizes = [1, 64], strides = [1, 1]} : vector<18x64xf32> to vector<1x64xf32>
    %c0_326 = arith.constant 0 : index
    %c128_327 = arith.constant 128 : index
    %215 = vector.load %arg15[%c0_326, %c128_327] : memref<2x576xf32, #tpu.memory_space<vmem>>, vector<1x64xf32>
    tpu.vector_store %arg15[%c0_326, %c128_327], %214 {strides = array<i32>} : memref<2x576xf32, #tpu.memory_space<vmem>>, vector<1x64xf32>,
    %216 = vector.extract_strided_slice %209 {offsets = [3, 0], sizes = [1, 64], strides = [1, 1]} : vector<18x64xf32> to vector<1x64xf32>
    %c0_328 = arith.constant 0 : index
    %c192_329 = arith.constant 192 : index
    %217 = vector.load %arg15[%c0_328, %c192_329] : memref<2x576xf32, #tpu.memory_space<vmem>>, vector<1x64xf32>
    tpu.vector_store %arg15[%c0_328, %c192_329], %216 {strides = array<i32>} : memref<2x576xf32, #tpu.memory_space<vmem>>, vector<1x64xf32>,
    %218 = vector.extract_strided_slice %209 {offsets = [4, 0], sizes = [1, 64], strides = [1, 1]} : vector<18x64xf32> to vector<1x64xf32>
    %c0_330 = arith.constant 0 : index
    %c256_331 = arith.constant 256 : index
    %219 = vector.load %arg15[%c0_330, %c256_331] : memref<2x576xf32, #tpu.memory_space<vmem>>, vector<1x64xf32>
    tpu.vector_store %arg15[%c0_330, %c256_331], %218 {strides = array<i32>} : memref<2x576xf32, #tpu.memory_space<vmem>>, vector<1x64xf32>,
    %220 = vector.extract_strided_slice %209 {offsets = [5, 0], sizes = [1, 64], strides = [1, 1]} : vector<18x64xf32> to vector<1x64xf32>
    %c0_332 = arith.constant 0 : index
    %c320_333 = arith.constant 320 : index
    %221 = vector.load %arg15[%c0_332, %c320_333] : memref<2x576xf32, #tpu.memory_space<vmem>>, vector<1x64xf32>
    tpu.vector_store %arg15[%c0_332, %c320_333], %220 {strides = array<i32>} : memref<2x576xf32, #tpu.memory_space<vmem>>, vector<1x64xf32>,
    %222 = vector.extract_strided_slice %209 {offsets = [6, 0], sizes = [1, 64], strides = [1, 1]} : vector<18x64xf32> to vector<1x64xf32>
    %c0_334 = arith.constant 0 : index
    %c384_335 = arith.constant 384 : index
    %223 = vector.load %arg15[%c0_334, %c384_335] : memref<2x576xf32, #tpu.memory_space<vmem>>, vector<1x64xf32>
    tpu.vector_store %arg15[%c0_334, %c384_335], %222 {strides = array<i32>} : memref<2x576xf32, #tpu.memory_space<vmem>>, vector<1x64xf32>,
    %224 = vector.extract_strided_slice %209 {offsets = [7, 0], sizes = [1, 64], strides = [1, 1]} : vector<18x64xf32> to vector<1x64xf32>
    %c0_336 = arith.constant 0 : index
    %c448_337 = arith.constant 448 : index
    %225 = vector.load %arg15[%c0_336, %c448_337] : memref<2x576xf32, #tpu.memory_space<vmem>>, vector<1x64xf32>
    tpu.vector_store %arg15[%c0_336, %c448_337], %224 {strides = array<i32>} : memref<2x576xf32, #tpu.memory_space<vmem>>, vector<1x64xf32>,
    %226 = vector.extract_strided_slice %209 {offsets = [8, 0], sizes = [1, 64], strides = [1, 1]} : vector<18x64xf32> to vector<1x64xf32>
    %c0_338 = arith.constant 0 : index
    %c512 = arith.constant 512 : index
    %227 = vector.load %arg15[%c0_338, %c512] : memref<2x576xf32, #tpu.memory_space<vmem>>, vector<1x64xf32>
    tpu.vector_store %arg15[%c0_338, %c512], %226 {strides = array<i32>} : memref<2x576xf32, #tpu.memory_space<vmem>>, vector<1x64xf32>,
    %228 = vector.extract_strided_slice %209 {offsets = [9, 0], sizes = [1, 64], strides = [1, 1]} : vector<18x64xf32> to vector<1x64xf32>
    %c1_339 = arith.constant 1 : index
    %c0_340 = arith.constant 0 : index
    %229 = vector.load %arg15[%c1_339, %c0_340] : memref<2x576xf32, #tpu.memory_space<vmem>>, vector<1x64xf32>
    tpu.vector_store %arg15[%c1_339, %c0_340], %228 {strides = array<i32>} : memref<2x576xf32, #tpu.memory_space<vmem>>, vector<1x64xf32>,
    %230 = vector.extract_strided_slice %209 {offsets = [10, 0], sizes = [1, 64], strides = [1, 1]} : vector<18x64xf32> to vector<1x64xf32>
    %c1_341 = arith.constant 1 : index
    %c64_342 = arith.constant 64 : index
    %231 = vector.load %arg15[%c1_341, %c64_342] : memref<2x576xf32, #tpu.memory_space<vmem>>, vector<1x64xf32>
    tpu.vector_store %arg15[%c1_341, %c64_342], %230 {strides = array<i32>} : memref<2x576xf32, #tpu.memory_space<vmem>>, vector<1x64xf32>,
    %232 = vector.extract_strided_slice %209 {offsets = [11, 0], sizes = [1, 64], strides = [1, 1]} : vector<18x64xf32> to vector<1x64xf32>
    %c1_343 = arith.constant 1 : index
    %c128_344 = arith.constant 128 : index
    %233 = vector.load %arg15[%c1_343, %c128_344] : memref<2x576xf32, #tpu.memory_space<vmem>>, vector<1x64xf32>
    tpu.vector_store %arg15[%c1_343, %c128_344], %232 {strides = array<i32>} : memref<2x576xf32, #tpu.memory_space<vmem>>, vector<1x64xf32>,
    %234 = vector.extract_strided_slice %209 {offsets = [12, 0], sizes = [1, 64], strides = [1, 1]} : vector<18x64xf32> to vector<1x64xf32>
    %c1_345 = arith.constant 1 : index
    %c192_346 = arith.constant 192 : index
    %235 = vector.load %arg15[%c1_345, %c192_346] : memref<2x576xf32, #tpu.memory_space<vmem>>, vector<1x64xf32>
    tpu.vector_store %arg15[%c1_345, %c192_346], %234 {strides = array<i32>} : memref<2x576xf32, #tpu.memory_space<vmem>>, vector<1x64xf32>,
    %236 = vector.extract_strided_slice %209 {offsets = [13, 0], sizes = [1, 64], strides = [1, 1]} : vector<18x64xf32> to vector<1x64xf32>
    %c1_347 = arith.constant 1 : index
    %c256_348 = arith.constant 256 : index
    %237 = vector.load %arg15[%c1_347, %c256_348] : memref<2x576xf32, #tpu.memory_space<vmem>>, vector<1x64xf32>
    tpu.vector_store %arg15[%c1_347, %c256_348], %236 {strides = array<i32>} : memref<2x576xf32, #tpu.memory_space<vmem>>, vector<1x64xf32>,
    %238 = vector.extract_strided_slice %209 {offsets = [14, 0], sizes = [1, 64], strides = [1, 1]} : vector<18x64xf32> to vector<1x64xf32>
    %c1_349 = arith.constant 1 : index
    %c320_350 = arith.constant 320 : index
    %239 = vector.load %arg15[%c1_349, %c320_350] : memref<2x576xf32, #tpu.memory_space<vmem>>, vector<1x64xf32>
    tpu.vector_store %arg15[%c1_349, %c320_350], %238 {strides = array<i32>} : memref<2x576xf32, #tpu.memory_space<vmem>>, vector<1x64xf32>,
    %240 = vector.extract_strided_slice %209 {offsets = [15, 0], sizes = [1, 64], strides = [1, 1]} : vector<18x64xf32> to vector<1x64xf32>
    %c1_351 = arith.constant 1 : index
    %c384_352 = arith.constant 384 : index
    %241 = vector.load %arg15[%c1_351, %c384_352] : memref<2x576xf32, #tpu.memory_space<vmem>>, vector<1x64xf32>
    tpu.vector_store %arg15[%c1_351, %c384_352], %240 {strides = array<i32>} : memref<2x576xf32, #tpu.memory_space<vmem>>, vector<1x64xf32>,
    %242 = vector.extract_strided_slice %209 {offsets = [16, 0], sizes = [1, 64], strides = [1, 1]} : vector<18x64xf32> to vector<1x64xf32>
    %c1_353 = arith.constant 1 : index
    %c448_354 = arith.constant 448 : index
    %243 = vector.load %arg15[%c1_353, %c448_354] : memref<2x576xf32, #tpu.memory_space<vmem>>, vector<1x64xf32>
    tpu.vector_store %arg15[%c1_353, %c448_354], %242 {strides = array<i32>} : memref<2x576xf32, #tpu.memory_space<vmem>>, vector<1x64xf32>,
    %244 = vector.extract_strided_slice %209 {offsets = [17, 0], sizes = [1, 64], strides = [1, 1]} : vector<18x64xf32> to vector<1x64xf32>
    %c1_355 = arith.constant 1 : index
    %c512_356 = arith.constant 512 : index
    %245 = vector.load %arg15[%c1_355, %c512_356] : memref<2x576xf32, #tpu.memory_space<vmem>>, vector<1x64xf32>
    tpu.vector_store %arg15[%c1_355, %c512_356], %244 {strides = array<i32>} : memref<2x576xf32, #tpu.memory_space<vmem>>, vector<1x64xf32>,
    %c0_357 = arith.constant 0 : index
    %c0_358 = arith.constant 0 : index
    %246 = vector.load %arg15[%c0_357, %c0_358] : memref<2x576xf32, #tpu.memory_space<vmem>>, vector<2x576xf32>
    %247 = arith.truncf %246 : vector<2x576xf32> to vector<2x576xbf16>
    %c0_359 = arith.constant 0 : index
    %c0_360 = arith.constant 0 : index
    %248 = vector.load %arg6[%c0_359, %c0_360] : memref<576x64xbf16, #tpu.memory_space<vmem>>, vector<576x64xbf16>
    %cst_361 = arith.constant dense<0.000000e+00> : vector<2x64xf32>
    %249 = tpu.matmul %247, %248, %cst_361 {dimension_numbers = #tpu.dot_dimension_numbers<[1], [0], [0], [1], [0, 0, 1, 1], [], []>} : vector<2x576xbf16>, vector<576x64xbf16>, vector<2x64xf32> -> vector<2x64xf32>
    %c0_362 = arith.constant 0 : index
    %c0_363 = arith.constant 0 : index
    %250 = vector.load %arg7[%c0_362, %c0_363] : memref<1x64xf32, #tpu.memory_space<vmem>>, vector<1x64xf32>
    %251 = vector.broadcast %250 : vector<1x64xf32> to vector<2x64xf32>
    %252 = arith.addf %249, %251 : vector<2x64xf32>
    %cst_364 = arith.constant 0.000000e+00 : f32
    %253 = vector.broadcast %cst_364 : f32 to vector<2x64xf32>
    %254 = arith.maximumf %252, %253 : vector<2x64xf32>
    %255 = arith.truncf %254 : vector<2x64xf32> to vector<2x64xbf16>
    %c0_365 = arith.constant 0 : index
    %c0_366 = arith.constant 0 : index
    %256 = vector.load %arg8[%c0_365, %c0_366] : memref<64x512xbf16, #tpu.memory_space<vmem>>, vector<64x512xbf16>
    %cst_367 = arith.constant dense<0.000000e+00> : vector<2x512xf32>
    %257 = tpu.matmul %255, %256, %cst_367 {dimension_numbers = #tpu.dot_dimension_numbers<[1], [0], [0], [1], [0, 0, 1, 1], [], []>} : vector<2x64xbf16>, vector<64x512xbf16>, vector<2x512xf32> -> vector<2x512xf32>
    %c0_368 = arith.constant 0 : index
    %c0_369 = arith.constant 0 : index
    %258 = vector.load %arg9[%c0_368, %c0_369] : memref<1x512xf32, #tpu.memory_space<vmem>>, vector<1x512xf32>
    %259 = vector.broadcast %258 : vector<1x512xf32> to vector<2x512xf32>
    %260 = arith.addf %257, %259 : vector<2x512xf32>
    %cst_370 = arith.constant 0.000000e+00 : f32
    %261 = vector.broadcast %cst_370 : f32 to vector<2x512xf32>
    %262 = arith.maximumf %260, %261 : vector<2x512xf32>
    %263 = arith.truncf %262 : vector<2x512xf32> to vector<2x512xbf16>
    %c0_371 = arith.constant 0 : index
    %c0_372 = arith.constant 0 : index
    %264 = vector.load %arg10[%c0_371, %c0_372] : memref<512x128xbf16, #tpu.memory_space<vmem>>, vector<512x128xbf16>
    %cst_373 = arith.constant dense<0.000000e+00> : vector<2x128xf32>
    %265 = tpu.matmul %263, %264, %cst_373 {dimension_numbers = #tpu.dot_dimension_numbers<[1], [0], [0], [1], [0, 0, 1, 1], [], []>} : vector<2x512xbf16>, vector<512x128xbf16>, vector<2x128xf32> -> vector<2x128xf32>
    %c0_374 = arith.constant 0 : index
    %c0_375 = arith.constant 0 : index
    %266 = vector.load %arg11[%c0_374, %c0_375] : memref<1x128xf32, #tpu.memory_space<vmem>>, vector<1x128xf32>
    %267 = vector.broadcast %266 : vector<1x128xf32> to vector<2x128xf32>
    %268 = arith.addf %265, %267 : vector<2x128xf32>
    %c0_376 = arith.constant 0 : index
    %c0_377 = arith.constant 0 : index
    %269 = vector.load %arg12[%c0_376, %c0_377] : memref<2x128xf32, #tpu.memory_space<vmem>>, vector<2x128xf32>
    tpu.vector_store %arg12[%c0_376, %c0_377], %268 {strides = array<i32>} : memref<2x128xf32, #tpu.memory_space<vmem>>, vector<2x128xf32>,
    return
  }
  func.func @transform_0(%arg0: i32) -> (i32, i32) {
    %c0_i32 = arith.constant 0 : i32
    %c0_i32_0 = arith.constant 0 : i32
    %c0_i32_1 = arith.constant 0 : i32
    return %c0_i32, %c0_i32_0 : i32, i32
  }
  func.func @transform_1(%arg0: i32) -> (i32, i32) {
    %c0_i32 = arith.constant 0 : i32
    %c0_i32_0 = arith.constant 0 : i32
    %c0_i32_1 = arith.constant 0 : i32
    return %c0_i32, %c0_i32_0 : i32, i32
  }
  func.func @transform_2(%arg0: i32) -> (i32, i32) {
    %c0_i32 = arith.constant 0 : i32
    %c0_i32_0 = arith.constant 0 : i32
    %c0_i32_1 = arith.constant 0 : i32
    return %c0_i32, %c0_i32_0 : i32, i32
  }
  func.func @transform_3(%arg0: i32) -> (i32, i32) {
    %c0_i32 = arith.constant 0 : i32
    %c0_i32_0 = arith.constant 0 : i32
    %c0_i32_1 = arith.constant 0 : i32
    return %c0_i32, %c0_i32_0 : i32, i32
  }
  func.func @transform_4(%arg0: i32) -> (i32, i32) {
    %c0_i32 = arith.constant 0 : i32
    %c0_i32_0 = arith.constant 0 : i32
    %c0_i32_1 = arith.constant 0 : i32
    return %c0_i32, %c0_i32_0 : i32, i32
  }
  func.func @transform_5(%arg0: i32) -> (i32, i32) {
    %c0_i32 = arith.constant 0 : i32
    %c0_i32_0 = arith.constant 0 : i32
    %c0_i32_1 = arith.constant 0 : i32
    return %c0_i32, %c0_i32_0 : i32, i32
  }
  func.func @transform_6(%arg0: i32) -> (i32, i32) {
    %c0_i32 = arith.constant 0 : i32
    %c0_i32_0 = arith.constant 0 : i32
    %c0_i32_1 = arith.constant 0 : i32
    return %c0_i32, %c0_i32_0 : i32, i32
  }
  func.func @transform_7(%arg0: i32) -> (i32, i32) {
    %c0_i32 = arith.constant 0 : i32
    %c0_i32_0 = arith.constant 0 : i32
    %c0_i32_1 = arith.constant 0 : i32
    return %c0_i32, %c0_i32_0 : i32, i32
  }
  func.func @transform_8(%arg0: i32) -> (i32, i32) {
    %c0_i32 = arith.constant 0 : i32
    %c0_i32_0 = arith.constant 0 : i32
    %c0_i32_1 = arith.constant 0 : i32
    return %c0_i32, %c0_i32_0 : i32, i32
  }
  func.func @transform_9(%arg0: i32) -> (i32, i32) {
    %c0_i32 = arith.constant 0 : i32
    %c0_i32_0 = arith.constant 0 : i32
    %c0_i32_1 = arith.constant 0 : i32
    return %c0_i32, %c0_i32_0 : i32, i32
  }
  func.func @transform_10(%arg0: i32) -> (i32, i32) {
    %c0_i32 = arith.constant 0 : i32
    %c0_i32_0 = arith.constant 0 : i32
    %c0_i32_1 = arith.constant 0 : i32
    return %c0_i32, %c0_i32_0 : i32, i32
  }
  func.func @transform_11(%arg0: i32) -> (i32, i32) {
    %c0_i32 = arith.constant 0 : i32
    %c0_i32_0 = arith.constant 0 : i32
    %c0_i32_1 = arith.constant 0 : i32
    return %c0_i32, %c0_i32_0 : i32, i32
  }
}

</mosaic_0001>

<bundles_post_ra>
// kernel: dqn_forward_prepared.1
= control target key start
LH: loop header
LB: loop body
LE: loop exit
PB: predicated region body
PF: predicated region fallthrough
CT: control target
= control target key end

     0   :  { %s3789_s0 = inlined_call_operand.vmem [shape: bf16[128,128], index: 0, kind: input, shape index: {}]   ;;  %s3790_s1 = inlined_call_operand.vmem [shape: bf16[128,32], index: 1, kind: input, shape index: {}]   ;;  %s3791_s2 = inlined_call_operand.vmem [shape: f32[1,32], index: 2, kind: input, shape index: {}]   ;;  %s3792_s3 = inlined_call_operand.vmem [shape: bf16[512,64], index: 3, kind: input, shape index: {}]   ;;  %s3793_s4 = inlined_call_operand.vmem [shape: f32[1,64], index: 4, kind: input, shape index: {}]   ;;  %s3794_s5 = inlined_call_operand.vmem [shape: bf16[576,64], index: 5, kind: input, shape index: {}]   ;;  %s3795_s6 = inlined_call_operand.vmem [shape: f32[1,64], index: 6, kind: input, shape index: {}]   ;;  %s3796_s7 = inlined_call_operand.vmem [shape: bf16[64,512], index: 7, kind: input, shape index: {}]   ;;  %s3797_s8 = inlined_call_operand.vmem [shape: f32[1,512], index: 8, kind: input, shape index: {}]   ;;  %s3798_s9 = inlined_call_operand.vmem [shape: bf16[512,128], index: 9, kind: input, shape index: {}]   ;;  %s3799_s10 = inlined_call_operand.vmem [shape: f32[1,128], index: 10, kind: input, shape index: {}]   ;;  %s3800_s11 = inlined_call_operand.hbm [shape: f32[2,128], index: 11, kind: output, shape index: {}]  }
   0x1   :  { %v2859_v0 = vld [vmem:[%s3790_s1 + $0x38] sm:$0xff]   ;;  %v2860_v1 = vld [vmem:[%s3790_s1 + $0x30] sm:$0xff]   ;;  %v2861_v2 = vld [vmem:[%s3790_s1 + $0x28] sm:$0xff]  }
   0x2   :  { %2807 = vmatprep.subr.bf16.mxu0 %v2859_v0  ;;  %v2862_v3 = vld [vmem:[%s3790_s1 + $0x20] sm:$0xff]   ;;  %v2863_v5 = vld [vmem:[%s3790_s1 + $0x18] sm:$0xff]   ;;  %v2864_v6 = vld [vmem:[%s3790_s1 + $0x10] sm:$0xff]  }
   0x3   :  { %2808 = vmatpush3.bf16.msra.mxu0 %v2859_v0  ;;  %v2867_v4 = vld [vmem:[%s3789_s0] sm:$0xff]   ;;  %v2865_v7 = vld [vmem:[%s3790_s1 + $0x8] sm:$0xff]   ;;  %v2869_v10 = vld [vmem:[%s3789_s0 + $0x10] sm:$0xff]  }
   0x4   :  { %2809 = vmatprep.subr.bf16.mxu0 %v2860_v1  ;;  %2823 = vmatprep.mubr.bf16.mxu0 %v2867_v4  ;;  %v2866_v8 = vld [vmem:[%s3790_s1] sm:$0xff]   ;;  %v2868_v9 = vld [vmem:[%s3789_s0 + $0x8] sm:$0xff]   ;;  %v2870_v11 = vld [vmem:[%s3789_s0 + $0x18] sm:$0xff]  }
   0x5   :  { %v2871_v12 = vld [vmem:[%s3789_s0 + $0x20] sm:$0xff]   ;;  %v2872_v13 = vld [vmem:[%s3789_s0 + $0x28] sm:$0xff]   ;;  %v2873_v14 = vld [vmem:[%s3789_s0 + $0x30] sm:$0xff]  }
   0x6   :  { %v2874_v15 = vld [vmem:[%s3789_s0 + $0x38] sm:$0xff]  }
   0x7   :  { %2810 = vmatpush3.bf16.msra.mxu0 %v2860_v1 }
   0x8   :  { %2811 = vmatprep.subr.bf16.mxu0 %v2861_v2 }
   0xb   :  { %2812 = vmatpush3.bf16.msra.mxu0 %v2861_v2 }
   0xc   :  { %2813 = vmatprep.subr.bf16.mxu0 %v2862_v3 }
   0xf   :  { %2814 = vmatpush3.bf16.msra.mxu0 %v2862_v3 }
  0x10   :  { %2815 = vmatprep.subr.bf16.mxu0 %v2863_v5 }
  0x13   :  { %2816 = vmatpush3.bf16.msra.mxu0 %v2863_v5 }
  0x14   :  { %2817 = vmatprep.subr.bf16.mxu0 %v2864_v6 }
  0x17   :  { %2818 = vmatpush3.bf16.msra.mxu0 %v2864_v6 }
  0x18   :  { %2819 = vmatprep.subr.bf16.mxu0 %v2865_v7 }
  0x1b   :  { %2820 = vmatpush3.bf16.msra.mxu0 %v2865_v7 }
  0x1c   :  { %2821 = vmatprep.subr.bf16.mxu0 %v2866_v8 }
  0x1f   :  { %2822 = vmatpush3.bf16.msra.mxu0 %v2866_v8 }
  0x22   :  { %2824 = vmatmul.mubr.bf16.vlgmr.msra.gmra.mxu0 %v2868_v9 }
  0x23   :  { %2827 = vmatprep.mubr.bf16.mxu0 %v2869_v10 }
  0x2a   :  { %2828 = vmatmul.mubr.bf16.gmra.mxu0 %v2870_v11 }
  0x2b   :  { %2831 = vmatprep.mubr.bf16.mxu0 %v2871_v12 }
  0x32   :  { %2832 = vmatmul.mubr.bf16.gmra.mxu0 %v2872_v13 }
  0x33   :  { %2835 = vmatprep.mubr.bf16.mxu0 %v2873_v14 }
  0x3a   :  { %2836 = vmatmul.mubr.bf16.gmra.mxu0 %v2874_v15 }
  0x3b   :  { %16 = vsyncpa [#allocation6], 0  ;;  %v3141_v16 = vld [vmem:[%s3791_s2] ss:$0 sm:$0xff]  ;;  %vm288_vm0 = vcmask 261120   ;;  %s3022_s0 = smov 64  }
  0x3c   :  { %s3023_s2 = smov 32   ;;  %s3024_s12 = smov 96   ;;  %vm306_vm1 = vcmask 256000   ;;  %vm393_vm2 = vcmask 259075   ;;  %vm501_vm3 = vcmask 261126   ;;  %vm503_vm4 = vcmask 253952  }
  0x3d   :  { %vm629_vm5 = vcmask 257025   ;;  %vm737_vm6 = vcmask 260100   ;;  %vm845_vm7 = vcmask 261127   ;;  %vm847_vm8 = vcmask 254976   ;;  %s3029_s17 = smov [#allocation5]  }
  0x3e   :  { %vm313_vm9 = vcmask 518400   ;;  %vm320_vm10 = vcmask 780800   ;;  %vm327_vm11 = vcmask 1043200   ;;  %vm401_vm12 = vcmask 521475   ;;  %s2485_s18 = sshll.u32 %s3029_s17, 4  ;;  %s2486_s18 = int_to_ptr.vmem [resolvable:$true] %s2485_s18 }
  0x3f   :  { %vm409_vm13 = vcmask 783875   ;;  %vm417_vm14 = vcmask 1046275   ;;  %vm511_vm15 = vcmask 523526   ;;  %p3005_p1 = scmp.lt.s32.totalorder %s2486_s18, %s2486_s18 }
  0xe2   :  { %v2825_v17 = vpop.f32.mrf.mxu0 }
  0xe3   :  { %v218_v18 = vadd.f32 %v2825_v17, %v3141_v16 }
  0xe4   :  { %v209_v19 = vpop.f32.mrf.mxu0 }
  0xe5   :  { %v274_v20 = vmax.f32 %v218_v18, 0.0  ;;  %v210_v21 = vadd.f32 %v3141_v16, %v209_v19 }
  0xe6   :  { %v2826_v22 = vpop.f32.mrf.mxu0 }
  0xe7   :  { %291 = vst.msk [vmem:[#allocation2 + $0x10] sm:$0xff] %vm288_vm0, %v274_v20  ;;  %v272_v23 = vmax.f32 %v210_v21, 0.0  ;;  %v221_v24 = vadd.f32 %v2826_v22, %v3141_v16 }
  0xe8   :  { %v212_v25 = vpop.f32.mrf.mxu0 }
  0xe9   :  { %289 = vst.msk [vmem:[#allocation2] sm:$0xff] %vm288_vm0, %v272_v23  ;;  %v275_v26 = vmax.f32 %v221_v24, 0.0  ;;  %v213_v27 = vadd.f32 %v3141_v16, %v212_v25 }
  0xea   :  { %v2829_v28 = vpop.f32.mrf.mxu0 }
  0xeb   :  { %292 = vst.msk [vmem:[#allocation2 + $0x18] sm:$0xff] %vm288_vm0, %v275_v26  ;;  %v273_v29 = vmax.f32 %v213_v27, 0.0  ;;  %v234_v30 = vadd.f32 %v2829_v28, %v3141_v16 }
  0xec   :  { %v225_v31 = vpop.f32.mrf.mxu0 }
  0xed   :  { %290 = vst.msk [vmem:[#allocation2 + $0x8] sm:$0xff] %vm288_vm0, %v273_v29  ;;  %v278_v32 = vmax.f32 %v234_v30, 0.0  ;;  %v226_v33 = vadd.f32 %v3141_v16, %v225_v31 }
  0xee   :  { %v357_v34 = vld [vmem:[#allocation2 + $0x11] sm:$0x7]  ;;  %v351_v35 = vld [vmem:[#allocation2 + $0x14] sm:$0x7]  ;;  %v2830_v36 = vpop.f32.mrf.mxu0 }
  0xef   :  { %359 = vrot.lane.b32.xlu0 %v357_v34, %s3022_s0  ;;  %353 = vrot.lane.b32.xlu1 %v351_v35, %s3023_s2  ;;  %v403_v37 = vld [vmem:[#allocation2 + $0x11] sm:$0x7]  ;;  %295 = vst.msk [vmem:[#allocation2 + $0x30] sm:$0xff] %vm288_vm0, %v278_v32  ;;  %v276_v38 = vmax.f32 %v226_v33, 0.0  ;;  %v237_v39 = vadd.f32 %v2830_v36, %v3141_v16  ;;  %v363_v44 = vld [vmem:[#allocation2 + $0x15] sm:$0x7] }
  0xf0   :  { %v228_v40 = vpop.f32.mrf.mxu0  ;;  %v405_v41 = vrot.slane %v403_v37, 5  ;;  %v411_v45 = vld [vmem:[#allocation2 + $0x15] sm:$0x7]  ;;  %v349_v53 = vld [vmem:[#allocation2 + $0x10] sm:$0x7] }
  0xf1   :  { %293 = vst.msk [vmem:[#allocation2 + $0x20] sm:$0xff] %vm288_vm0, %v276_v38  ;;  %v279_v42 = vmax.f32 %v237_v39, 0.0  ;;  %v229_v43 = vadd.f32 %v3141_v16, %v228_v40  ;;  %v413_v50 = vrot.slane %v411_v45, 5  ;;  %v308_v54 = vld [vmem:[#allocation2 + $0x4] sm:$0x7] }
  0xf2   :  { %v2833_v46 = vpop.f32.mrf.mxu0  ;;  %v395_v55 = vld [vmem:[#allocation2 + $0x14] sm:$0x7]  ;;  %350 = vst.msk [vmem:[#allocation3 + $0x10] sm:$0x7] %vm306_vm1, %v349_v53  ;;  %v383_v63 = vld [vmem:[#allocation2 + $0x1d] sm:$0x7] }
  0xf3   :  { %365 = vrot.lane.b32.xlu0 %v363_v44, %s3024_s12  ;;  %406 = vrot.lane.b32.xlu1 %v405_v41, %s3022_s0  ;;  %296 = vst.msk [vmem:[#allocation2 + $0x38] sm:$0xff] %vm288_vm0, %v279_v42  ;;  %v277_v47 = vmax.f32 %v229_v43, 0.0  ;;  %v250_v48 = vadd.f32 %v2833_v46, %v3141_v16  ;;  %v397_v60 = vrot.slane %v395_v55, 5  ;;  %v315_v4 = vld [vmem:[#allocation2 + $0x1] sm:$0x7] }
  0xf4   :  { %v241_v49 = vpop.f32.mrf.mxu0  ;;  %v337_v5 = vld [vmem:[#allocation2 + $0x9] sm:$0x7]  ;;  %v431_v6 = vld [vmem:[#allocation2 + $0x19] sm:$0x7]  ;;  %v322_v14 = vld [vmem:[#allocation2 + $0x5] sm:$0x7] }
  0xf5   :  { %294 = vst.msk [vmem:[#allocation2 + $0x28] sm:$0xff] %vm288_vm0, %v277_v47  ;;  %v282_v51 = vmax.f32 %v250_v48, 0.0  ;;  %v242_v52 = vadd.f32 %v3141_v16, %v241_v49  ;;  %v433_v12 = vrot.slane %v431_v6, 5  ;;  %v343_v20 = vld [vmem:[#allocation2 + $0xd] sm:$0x7] }
  0xf6   :  { %v2834_v56 = vpop.f32.mrf.mxu0  ;;  %v571_v18 = vld [vmem:[#allocation2 + $0x34] sm:$0x7]  ;;  %v371_v21 = vld [vmem:[#allocation2 + $0x1c] sm:$0x7]  ;;  %v377_v22 = vld [vmem:[#allocation2 + $0x19] sm:$0x7] }
  0xf7   :  { %414 = vrot.lane.b32.xlu1 %v413_v50, %s3024_s12  ;;  %310 = vrot.lane.b32.xlu0 %v308_v54, %s3023_s2  ;;  %299 = vst.msk [vmem:[#allocation2 + $0x50] sm:$0xff] %vm288_vm0, %v282_v51  ;;  %v280_v57 = vmax.f32 %v242_v52, 0.0  ;;  %v253_v58 = vadd.f32 %v2834_v56, %v3141_v16  ;;  %v305_v24 = vld [vmem:[#allocation2] sm:$0x7]  ;;  %v389_v25 = vld [vmem:[#allocation2 + $0x10] sm:$0x7] }
  0xf8   :  { %v244_v59 = vpop.f32.mrf.mxu0  ;;  %v464_v23 = vld [vmem:[#allocation2 + $0x25] sm:$0x7]  ;;  %307 = vst.msk [vmem:[#allocation3] sm:$0x7] %vm306_vm1, %v305_v24  ;;  %v391_v27 = vrot.slane %v389_v25, 5 }
  0xf9   :  { %297 = vst.msk [vmem:[#allocation2 + $0x40] sm:$0xff] %vm288_vm0, %v280_v57  ;;  %v283_v61 = vmax.f32 %v253_v58, 0.0  ;;  %v245_v62 = vadd.f32 %v3141_v16, %v244_v59  ;;  %v466_v26 = vrot.slane %v464_v23, 5  ;;  %v331_v28 = vld [vmem:[#allocation2 + $0xc] sm:$0x7] }
  0xfa   :  { %v2837_v0 = vpop.f32.mrf.mxu0  ;;  %v617_v29 = vld [vmem:[#allocation2 + $0x3d] sm:$0x7]  ;;  %394 = vst.msk [vmem:[#allocation3] sm:$0x38] %vm393_vm2, %v391_v27  ;;  %v579_v36 = vld [vmem:[#allocation2 + $0x31] sm:$0x7] }
  0xfb   :  { %385 = vrot.lane.b32.xlu1 %v383_v63, %s3024_s12  ;;  %398 = vrot.lane.b32.xlu0 %v397_v60, %s3023_s2  ;;  %300 = vst.msk [vmem:[#allocation2 + $0x58] sm:$0xff] %vm288_vm0, %v283_v61  ;;  %v281_v1 = vmax.f32 %v245_v62, 0.0  ;;  %v266_v2 = vadd.f32 %v2837_v0, %v3141_v16  ;;  %v424_v30 = vld [vmem:[#allocation2 + $0x1c] sm:$0x7]  ;;  %v619_v32 = vrot.slane %v617_v29, 2  ;;  %v581_v46 = vrot.slane %v579_v36, 2 }
  0xfc   :  { %v257_v3 = vpop.f32.mrf.mxu0  ;;  %v438_v31 = vld [vmem:[#allocation2 + $0x1d] sm:$0x7]  ;;  %v426_v33 = vrot.slane %v424_v30, 5  ;;  %v541_v34 = vld [vmem:[#allocation2 + $0x2c] sm:$0x7] }
  0xfd   :  { %298 = vst.msk [vmem:[#allocation2 + $0x48] sm:$0xff] %vm288_vm0, %v281_v1  ;;  %v286_v7 = vmax.f32 %v266_v2, 0.0  ;;  %v258_v9 = vadd.f32 %v3141_v16, %v257_v3  ;;  %v440_v35 = vrot.slane %v438_v31, 5  ;;  %v3198_v37 = vld [vmem:[#allocation2 + $0x35] sm:$0x7]  ;;  %v543_v42 = vrot.slane %v541_v34, 2 }
  0xfe   :  { %v2838_v8 = vpop.f32.mrf.mxu0  ;;  %v369_v38 = vld [vmem:[#allocation2 + $0x18] sm:$0x7]  ;;  %v549_v39 = vld [vmem:[#allocation2 + $0x29] sm:$0x7]  ;;  %v3200_v40 = vld [vmem:[#allocation2 + $0x2c] sm:$0x7] }
  0xff   :  { %339 = vrot.lane.b32.xlu1 %v337_v5, %s3022_s0  ;;  %317 = vrot.lane.b32.xlu0 %v315_v4, %s3022_s0  ;;  %v269_v10 = vadd.f32 %v2838_v8, %v3141_v16  ;;  %303 = vst.msk [vmem:[#allocation2 + $0x70] sm:$0xff] %vm288_vm0, %v286_v7  ;;  %v284_v15 = vmax.f32 %v258_v9, 0.0  ;;  %v565_v41 = vld [vmem:[#allocation2 + $0x30] sm:$0x7]  ;;  %v329_v44 = vld [vmem:[#allocation2 + $0x8] sm:$0x7] }
 0x100   :  { %v260_v11 = vpop.f32.mrf.mxu0  ;;  %370 = vst.msk [vmem:[#allocation3 + $0x18] sm:$0x7] %vm306_vm1, %v369_v38  ;;  %v567_v43 = vrot.slane %v565_v41, 2  ;;  %v419_v45 = vld [vmem:[#allocation2 + $0x18] sm:$0x7]  ;;  %v589_v47 = vrot.slane %v3198_v37, 2 }
 0x101   :  { %v261_v13 = vadd.f32 %v3141_v16, %v260_v11  ;;  %v287_v17 = vmax.f32 %v269_v10, 0.0  ;;  %301 = vst.msk [vmem:[#allocation2 + $0x60] sm:$0xff] %vm288_vm0, %v284_v15  ;;  %v573_v16 = vrot.slane %v571_v18, 2  ;;  %v421_v48 = vrot.slane %v419_v45, 5  ;;  %v535_v49 = vld [vmem:[#allocation2 + $0x28] sm:$0x7] }
 0x102   :  { %330 = vst.msk [vmem:[#allocation3 + $0x8] sm:$0x7] %vm306_vm1, %v329_v44  ;;  %v551_v50 = vrot.slane %v549_v39, 2  ;;  %v537_v51 = vrot.slane %v535_v49, 2  ;;  %v471_v52 = vld [vmem:[#allocation2 + $0x28] sm:$0x7] }
 0x103   :  { %434 = vrot.lane.b32.xlu1 %v433_v12, %s3022_s0  ;;  %324 = vrot.lane.b32.xlu0 %v322_v14, %s3024_s12  ;;  %v285_v19 = vmax.f32 %v261_v13, 0.0  ;;  %304 = vst.msk [vmem:[#allocation2 + $0x78] sm:$0xff] %vm288_vm0, %v287_v17  ;;  %v478_v53 = vrot.slane %v3200_v40, 5  ;;  %v473_v54 = vrot.slane %v471_v52, 5  ;;  %v497_v55 = vld [vmem:[#allocation2 + $0x20] sm:$0x7] }
 0x104   :  { %569 = vst.msk [vmem:[#allocation3 + $0x10] sm:$0xc0] %vm501_vm3, %v567_v43  ;;  %v445_v56 = vld [vmem:[#allocation2 + $0x20] sm:$0x7]  ;;  %539 = vst.msk [vmem:[#allocation3 + $0x8] sm:$0xc0] %vm501_vm3, %v537_v51 }
 0x105   :  { %302 = vst.msk [vmem:[#allocation2 + $0x68] sm:$0xff] %vm288_vm0, %v285_v19  ;;  %v499_v57 = vrot.slane %v497_v55, 2  ;;  %v447_v58 = vrot.slane %v445_v56, 5  ;;  %v595_v59 = vld [vmem:[#allocation2 + $0x38] sm:$0x7]  ;;  %vm513_vm0 = vcmask 516352  }
 0x106   :  { %570 = vst.msk [vmem:[#allocation3 + $0x30] sm:$0x1] %vm503_vm4, %v567_v43  ;;  %540 = vst.msk [vmem:[#allocation3 + $0x28] sm:$0x1] %vm503_vm4, %v537_v51  ;;  %v707_v60 = vld [vmem:[#allocation2 + $0x58] sm:$0x7] }
 0x107   :  { %345 = vrot.lane.b32.xlu1 %v343_v20, %s3024_s12  ;;  %373 = vrot.lane.b32.xlu0 %v371_v21, %s3023_s2  ;;  %423 = vst.msk [vmem:[#allocation3 + $0x8] sm:$0x38] %vm393_vm2, %v421_v48  ;;  %475 = vst.msk [vmem:[#allocation3 + $0x18] sm:$0x38] %vm393_vm2, %v473_v54  ;;  %v597_v61 = vrot.slane %v595_v59, 2  ;;  %v709_v62 = vrot.slane %v707_v60, 7 }
 0x108   :  { %v733_v63 = vld [vmem:[#allocation2 + $0x50] sm:$0x7]  ;;  %502 = vst.msk [vmem:[#allocation3] sm:$0xc0] %vm501_vm3, %v499_v57  ;;  %v655_v3 = vld [vmem:[#allocation2 + $0x48] sm:$0x7] }
 0x109   :  { %v681_v0 = vld [vmem:[#allocation2 + $0x50] sm:$0x7]  ;;  %504 = vst.msk [vmem:[#allocation3 + $0x20] sm:$0x1] %vm503_vm4, %v499_v57  ;;  %v735_v1 = vrot.slane %v733_v63, 4  ;;  %v657_v7 = vrot.slane %v655_v3, 7 }
 0x10a   :  { %449 = vst.msk [vmem:[#allocation3 + $0x10] sm:$0x38] %vm393_vm2, %v447_v58  ;;  %v683_v2 = vrot.slane %v681_v0, 7  ;;  %v625_v4 = vld [vmem:[#allocation2 + $0x40] sm:$0x7]  ;;  %vm521_vm1 = vcmask 785926  }
 0x10b   :  { %574 = vrot.lane.b32.xlu1 %v573_v16, %s3023_s2  ;;  %379 = vrot.lane.b32.xlu0 %v377_v22, %s3022_s0  ;;  %v557_v5 = vld [vmem:[#allocation2 + $0x2d] sm:$0x7]  ;;  %v505_v6 = vld [vmem:[#allocation2 + $0x24] sm:$0x7]  ;;  %599 = vst.msk [vmem:[#allocation3 + $0x18] sm:$0xc0] %vm501_vm3, %v597_v61 }
 0x10c   :  { %600 = vst.msk [vmem:[#allocation3 + $0x38] sm:$0x1] %vm503_vm4, %v597_v61  ;;  %v627_v8 = vrot.slane %v625_v4, 7  ;;  %v763_v9 = vld [vmem:[#allocation2 + $0x58] sm:$0x7]  ;;  %v559_v23 = vrot.slane %v557_v5, 2 }
 0x10d   :  { %711 = vst.msk [vmem:[#allocation3 + $0x38] sm:$0xe] %vm629_vm5, %v709_v62  ;;  %v789_v10 = vld [vmem:[#allocation2 + $0x60] sm:$0x7]  ;;  %685 = vst.msk [vmem:[#allocation3 + $0x30] sm:$0xe] %vm629_vm5, %v683_v2 }
 0x10e   :  { %738 = vst.msk [vmem:[#allocation3 + $0x20] sm:$0x70] %vm737_vm6, %v735_v1  ;;  %v765_v11 = vrot.slane %v763_v9, 4  ;;  %v791_v12 = vrot.slane %v789_v10, 4  ;;  %v909_v13 = vld [vmem:[#allocation2 + $0x70] sm:$0x7] }
 0x10f   :  { %467 = vrot.lane.b32.xlu1 %v466_v26, %s3024_s12  ;;  %333 = vrot.lane.b32.xlu0 %v331_v28, %s3023_s2  ;;  %v939_v14 = vld [vmem:[#allocation2 + $0x78] sm:$0x7]  ;;  %659 = vst.msk [vmem:[#allocation3 + $0x28] sm:$0xe] %vm629_vm5, %v657_v7  ;;  %630 = vst.msk [vmem:[#allocation3 + $0x20] sm:$0xe] %vm629_vm5, %v627_v8 }
 0x110   :  { %v911_v15 = vrot.slane %v909_v13, 1  ;;  %v941_v17 = vrot.slane %v939_v14, 1  ;;  %v841_v18 = vld [vmem:[#allocation2 + $0x60] sm:$0x7]  ;;  %v879_v19 = vld [vmem:[#allocation2 + $0x68] sm:$0x7] }
 0x111   :  { %767 = vst.msk [vmem:[#allocation3 + $0x28] sm:$0x70] %vm737_vm6, %v765_v11  ;;  %793 = vst.msk [vmem:[#allocation3 + $0x30] sm:$0x70] %vm737_vm6, %v791_v12  ;;  %v843_v20 = vrot.slane %v841_v18, 1  ;;  %v881_v21 = vrot.slane %v879_v19, 1 }
 0x112   :  { %v815_v16 = vld [vmem:[#allocation2 + $0x68] sm:$0x7]  ;;  %913 = vst.msk [vmem:[#allocation3 + $0x30] sm:$0x80] %vm845_vm7, %v911_v15  ;;  %943 = vst.msk [vmem:[#allocation3 + $0x38] sm:$0x80] %vm845_vm7, %v941_v17 }
 0x113   :  { %620 = vrot.lane.b32.xlu1 %v619_v32, %s3024_s12  ;;  %427 = vrot.lane.b32.xlu0 %v426_v33, %s3023_s2  ;;  %914 = vst.msk [vmem:[#allocation3 + $0x50] sm:$0x3] %vm847_vm8, %v911_v15  ;;  %944 = vst.msk [vmem:[#allocation3 + $0x58] sm:$0x3] %vm847_vm8, %v941_v17  ;;  %v817_v22 = vrot.slane %v815_v16, 4  ;;  %v507_v24 = vrot.slane %v505_v6, 2 }
 0x114   :  { %846 = vst.msk [vmem:[#allocation3 + $0x20] sm:$0x80] %vm845_vm7, %v843_v20  ;;  %883 = vst.msk [vmem:[#allocation3 + $0x28] sm:$0x80] %vm845_vm7, %v881_v21  ;;  %v483_v25 = vld [vmem:[#allocation2 + $0x29] sm:$0x7] }
 0x115   :  { %848 = vst.msk [vmem:[#allocation3 + $0x40] sm:$0x3] %vm847_vm8, %v843_v20  ;;  %884 = vst.msk [vmem:[#allocation3 + $0x48] sm:$0x3] %vm847_vm8, %v881_v21  ;;  %v515_v26 = vld [vmem:[#allocation2 + $0x21] sm:$0x7] }
 0x116   :  { %819 = vst.msk [vmem:[#allocation3 + $0x38] sm:$0x70] %vm737_vm6, %v817_v22  ;;  %v485_v27 = vrot.slane %v483_v25, 5  ;;  %v517_v28 = vrot.slane %v515_v26, 2  ;;  %v490_v29 = vld [vmem:[#allocation2 + $0x2d] sm:$0x7] }
 0x117   :  { %544 = vrot.lane.b32.xlu1 %v543_v42, %s3023_s2  ;;  %441 = vrot.lane.b32.xlu0 %v440_v35, %s3024_s12  ;;  %v450_v30 = vld [vmem:[#allocation2 + $0x24] sm:$0x7]  ;;  %v700_v31 = vld [vmem:[#allocation2 + $0x55] sm:$0x7]  ;;  %v492_v32 = vrot.slane %v490_v29, 5  ;;  %v2875_v11 = vld [vmem:[%s3792_s3 + $0x78] sm:$0xff]  }
 0x118   :  { %v452_v33 = vrot.slane %v450_v30, 5  ;;  %v525_v34 = vld [vmem:[#allocation2 + $0x25] sm:$0x7]  ;;  %v702_v35 = vrot.slane %v700_v31, 7  ;;  %v639_v37 = vld [vmem:[#allocation2 + $0x41] sm:$0x7]  ;;  %2658 = vmatprep.subr.bf16.mxu1 %v2875_v11 }
 0x119   :  { %v527_v36 = vrot.slane %v525_v34, 2  ;;  %v457_v38 = vld [vmem:[#allocation2 + $0x21] sm:$0x7]  ;;  %v641_v39 = vrot.slane %v639_v37, 7  ;;  %v647_v41 = vld [vmem:[#allocation2 + $0x45] sm:$0x7] }
 0x11a   :  { %v459_v40 = vrot.slane %v457_v38, 5  ;;  %v601_v42 = vld [vmem:[#allocation2 + $0x3c] sm:$0x7]  ;;  %v649_v43 = vrot.slane %v647_v41, 7  ;;  %v775_v45 = vld [vmem:[#allocation2 + $0x59] sm:$0x7] }
 0x11b   :  { %552 = vrot.lane.b32.xlu1 %v551_v50, %s3022_s0  ;;  %582 = vrot.lane.b32.xlu0 %v581_v46, %s3022_s0  ;;  %v603_v44 = vrot.slane %v601_v42, 2  ;;  %v609_v46 = vld [vmem:[#allocation2 + $0x39] sm:$0x7]  ;;  %v712_v49 = vld [vmem:[#allocation2 + $0x5c] sm:$0x7]  ;;  %v2877_v18 = vld [vmem:[%s3792_s3 + $0x70] sm:$0xff]  }
 0x11c   :  { %v611_v48 = vrot.slane %v609_v46, 2  ;;  %v739_v50 = vld [vmem:[#allocation2 + $0x54] sm:$0x7]  ;;  %v714_v51 = vrot.slane %v712_v49, 7  ;;  %v747_v54 = vld [vmem:[#allocation2 + $0x51] sm:$0x7] }
 0x11d   :  { %v741_v52 = vrot.slane %v739_v50, 4  ;;  %v749_v56 = vrot.slane %v747_v54, 4  ;;  %v719_v57 = vld [vmem:[#allocation2 + $0x59] sm:$0x7]  ;;  %v686_v58 = vld [vmem:[#allocation2 + $0x54] sm:$0x7] }
 0x11e   :  { %v721_v59 = vrot.slane %v719_v57, 7  ;;  %v688_v60 = vrot.slane %v686_v58, 7  ;;  %v726_v61 = vld [vmem:[#allocation2 + $0x5d] sm:$0x7]  ;;  %v755_v62 = vld [vmem:[#allocation2 + $0x55] sm:$0x7] }
 0x11f   :  { %479 = vrot.lane.b32.xlu1 %v478_v53, %s3023_s2  ;;  %590 = vrot.lane.b32.xlu0 %v589_v47, %s3024_s12  ;;  %v777_v47 = vrot.slane %v775_v45, 4  ;;  %v782_v53 = vld [vmem:[#allocation2 + $0x5d] sm:$0x7]  ;;  %v728_v63 = vrot.slane %v726_v61, 7  ;;  %v757_v0 = vrot.slane %v755_v62, 4  ;;  %v2878_v19 = vld [vmem:[%s3792_s3 + $0x30] sm:$0xff]  }
 0x120   :  { %v784_v55 = vrot.slane %v782_v53, 4  ;;  %v660_v1 = vld [vmem:[#allocation2 + $0x4c] sm:$0x7]  ;;  %v693_v2 = vld [vmem:[#allocation2 + $0x51] sm:$0x7]  ;;  %v2876_v12 = vld [vmem:[%s3792_s3 + $0x38] sm:$0xff]  }
 0x121   :  { %v662_v3 = vrot.slane %v660_v1, 7  ;;  %v695_v4 = vrot.slane %v693_v2, 7  ;;  %v667_v5 = vld [vmem:[#allocation2 + $0x49] sm:$0x7]  ;;  %v631_v6 = vld [vmem:[#allocation2 + $0x44] sm:$0x7]  ;;  %2659 = vmatpush3.bf16.msra.mxu1 %v2876_v12 }
 0x122   :  { %v669_v7 = vrot.slane %v667_v5, 7  ;;  %v633_v8 = vrot.slane %v631_v6, 7  ;;  %v768_v9 = vld [vmem:[#allocation2 + $0x5c] sm:$0x7]  ;;  %v859_v10 = vld [vmem:[#allocation2 + $0x61] sm:$0x7]  ;;  %2660 = vmatprep.subr.bf16.mxu1 %v2877_v18 }
 0x123   :  { %560 = vrot.lane.b32.xlu1 %v559_v23, %s3024_s12  ;;  %508 = vrot.lane.b32.xlu0 %v507_v24, %s3023_s2  ;;  %v861_v13 = vrot.slane %v859_v10, 1  ;;  %v770_v14 = vrot.slane %v768_v9, 4  ;;  %v794_v15 = vld [vmem:[#allocation2 + $0x64] sm:$0x7]  ;;  %v674_v17 = vld [vmem:[#allocation2 + $0x4d] sm:$0x7] }
 0x124   :  { %v2879_v20 = vld [vmem:[%s3792_s3 + $0xf8] sm:$0xff]   ;;  %v796_v16 = vrot.slane %v794_v15, 4  ;;  %v676_v22 = vrot.slane %v674_v17, 7  ;;  %v869_v23 = vld [vmem:[#allocation2 + $0x65] sm:$0x7]  ;;  %v2881_v25 = vld [vmem:[%s3792_s3 + $0x68] sm:$0xff]  }
 0x125   :  { %v2880_v21 = vld [vmem:[%s3792_s3 + $0xb8] sm:$0xff]   ;;  %2686 = vmatprep.subr.bf16.mxu0 %v2879_v20  ;;  %2661 = vmatpush3.bf16.msra.mxu1 %v2878_v19  ;;  %v915_v24 = vld [vmem:[#allocation2 + $0x74] sm:$0x7]  ;;  %v2882_v26 = vld [vmem:[%s3792_s3 + $0x28] sm:$0xff]   ;;  %v871_v29 = vrot.slane %v869_v23, 1  ;;  %vm523_vm2 = vcmask 778752  }
 0x126   :  { %2687 = vmatpush3.bf16.msra.mxu0 %v2880_v21  ;;  %v917_v30 = vrot.slane %v915_v24, 1  ;;  %v945_v31 = vld [vmem:[#allocation2 + $0x7c] sm:$0x7]  ;;  %2662 = vmatprep.subr.bf16.mxu1 %v2881_v25  ;;  %v2886_v34 = vld [vmem:[%s3792_s3 + $0x20] sm:$0xff]   ;;  %v953_v41 = vld [vmem:[#allocation2 + $0x79] sm:$0x7] }
 0x127   :  { %486 = vrot.lane.b32.xlu1 %v485_v27, %s3022_s0  ;;  %518 = vrot.lane.b32.xlu0 %v517_v28, %s3022_s0  ;;  %v2883_v27 = vld [vmem:[%s3792_s3 + $0xf0] sm:$0xff]   ;;  %v849_v42 = vld [vmem:[#allocation2 + $0x64] sm:$0x7]  ;;  %v955_v49 = vrot.slane %v953_v41, 1  ;;  %v885_v61 = vld [vmem:[#allocation2 + $0x6c] sm:$0x7] }
 0x128   :  { %v2884_v28 = vld [vmem:[%s3792_s3 + $0xb0] sm:$0xff]   ;;  %2688 = vmatprep.subr.bf16.mxu0 %v2883_v27  ;;  %v2891_v45 = vld [vmem:[%s3792_s3 + $0xe0] sm:$0xff]   ;;  %v851_v50 = vrot.slane %v849_v42, 1  ;;  %v820_v62 = vld [vmem:[#allocation2 + $0x6c] sm:$0x7]  ;;  %v887_v1 = vrot.slane %v885_v61, 1 }
 0x129   :  { %2663 = vmatpush3.bf16.msra.mxu1 %v2882_v26  ;;  %v2892_v46 = vld [vmem:[%s3792_s3 + $0xa0] sm:$0xff]   ;;  %v2893_v53 = vld [vmem:[%s3792_s3 + $0x50] sm:$0xff]   ;;  %v822_v6 = vrot.slane %v820_v62, 4  ;;  %v2903_v11 = vld [vmem:[%s3792_s3 + $0xc8] sm:$0xff]   ;;  %vm531_vm3 = vcmask 1048326   ;;  %vm533_vm4 = vcmask 1041152  }
 0x12a   :  { %2689 = vmatpush3.bf16.msra.mxu0 %v2884_v28  ;;  %v2894_v54 = vld [vmem:[%s3792_s3 + $0x10] sm:$0xff]   ;;  %v2901_v9 = vld [vmem:[%s3792_s3 + $0x40] sm:$0xff]   ;;  %v2904_v12 = vld [vmem:[%s3792_s3 + $0x88] sm:$0xff]   ;;  %vm637_vm5 = vcmask 519425   ;;  %vm745_vm6 = vcmask 522500   ;;  %vm753_vm7 = vcmask 784900  }
 0x12b   :  { %493 = vrot.lane.b32.xlu1 %v492_v32, %s3024_s12  ;;  %453 = vrot.lane.b32.xlu0 %v452_v33, %s3023_s2  ;;  %v923_v32 = vld [vmem:[#allocation2 + $0x71] sm:$0x7]  ;;  %v2885_v33 = vld [vmem:[%s3792_s3 + $0x60] sm:$0xff]   ;;  %v834_v18 = vld [vmem:[#allocation2 + $0x6d] sm:$0x7]  ;;  %vm645_vm8 = vcmask 781825  }
 0x12c   :  { %2664 = vmatprep.subr.bf16.mxu1 %v2885_v33  ;;  %v2899_v2 = vld [vmem:[%s3792_s3 + $0xd0] sm:$0xff]   ;;  %v2902_v10 = vld [vmem:[%s3792_s3] sm:$0xff]   ;;  %v827_v19 = vld [vmem:[#allocation2 + $0x69] sm:$0x7]  ;;  %v836_v23 = vrot.slane %v834_v18, 4 }
 0x12d   :  { %2665 = vmatpush3.bf16.msra.mxu1 %v2886_v34  ;;  %v2905_v20 = vld [vmem:[%s3792_s3 + $0xc0] sm:$0xff]   ;;  %v829_v24 = vrot.slane %v827_v19, 4  ;;  %v931_v25 = vld [vmem:[#allocation2 + $0x75] sm:$0x7] }
 0x12e   :  { %v2906_v21 = vld [vmem:[%s3792_s3 + $0x80] sm:$0xff]  }
 0x12f   :  { %703 = vrot.lane.b32.xlu1 %v702_v35, %s3024_s12  ;;  %528 = vrot.lane.b32.xlu0 %v527_v36, %s3024_s12  ;;  %v2887_v35 = vld [vmem:[%s3792_s3 + $0xe8] sm:$0xff]   ;;  %v808_v26 = vld [vmem:[#allocation2 + $0x65] sm:$0x7] }
 0x130   :  { %v2888_v36 = vld [vmem:[%s3792_s3 + $0xa8] sm:$0xff]   ;;  %2690 = vmatprep.subr.bf16.mxu0 %v2887_v35 }
 0x131   :  { %2691 = vmatpush3.bf16.msra.mxu0 %v2888_v36 }
 0x132   :  { %2692 = vmatprep.subr.bf16.mxu0 %v2891_v45 }
 0x133   :  { %642 = vrot.lane.b32.xlu1 %v641_v39, %s3022_s0  ;;  %460 = vrot.lane.b32.xlu0 %v459_v40, %s3022_s0  ;;  %v947_v39 = vrot.slane %v945_v31, 1  ;;  %v925_v40 = vrot.slane %v923_v32, 1 }
 0x135   :  { %2693 = vmatpush3.bf16.msra.mxu0 %v2892_v46 }
 0x137   :  { %650 = vrot.lane.b32.xlu1 %v649_v43, %s3024_s12  ;;  %604 = vrot.lane.b32.xlu0 %v603_v44, %s3023_s2  ;;  %v2889_v43 = vld [vmem:[%s3792_s3 + $0x58] sm:$0xff]  }
 0x138   :  { %v2890_v44 = vld [vmem:[%s3792_s3 + $0x18] sm:$0xff]   ;;  %2666 = vmatprep.subr.bf16.mxu1 %v2889_v43 }
 0x139   :  { %2667 = vmatpush3.bf16.msra.mxu1 %v2890_v44 }
 0x13a   :  { %2668 = vmatprep.subr.bf16.mxu1 %v2893_v53 }
 0x13b   :  { %778 = vrot.lane.b32.xlu1 %v777_v47, %s3022_s0  ;;  %612 = vrot.lane.b32.xlu0 %v611_v48, %s3022_s0 }
 0x13d   :  { %2669 = vmatpush3.bf16.msra.mxu1 %v2894_v54 }
 0x13f   :  { %715 = vrot.lane.b32.xlu1 %v714_v51, %s3023_s2  ;;  %742 = vrot.lane.b32.xlu0 %v741_v52, %s3023_s2  ;;  %v961_v51 = vld [vmem:[#allocation2 + $0x7d] sm:$0x7]  ;;  %v801_v52 = vld [vmem:[#allocation2 + $0x61] sm:$0x7] }
 0x143   :  { %785 = vrot.lane.b32.xlu1 %v784_v55, %s3024_s12  ;;  %750 = vrot.lane.b32.xlu0 %v749_v56, %s3022_s0  ;;  %v2895_v55 = vld [vmem:[%s3792_s3 + $0xd8] sm:$0xff]  }
 0x144   :  { %v2896_v56 = vld [vmem:[%s3792_s3 + $0x98] sm:$0xff]   ;;  %2694 = vmatprep.subr.bf16.mxu0 %v2895_v55 }
 0x145   :  { %2695 = vmatpush3.bf16.msra.mxu0 %v2896_v56 }
 0x146   :  { %2696 = vmatprep.subr.bf16.mxu0 %v2899_v2 }
 0x147   :  { %722 = vrot.lane.b32.xlu1 %v721_v59, %s3022_s0  ;;  %689 = vrot.lane.b32.xlu0 %v688_v60, %s3023_s2  ;;  %v963_v59 = vrot.slane %v961_v51, 1  ;;  %v803_v60 = vrot.slane %v801_v52, 4 }
 0x14b   :  { %729 = vrot.lane.b32.xlu1 %v728_v63, %s3024_s12  ;;  %758 = vrot.lane.b32.xlu0 %v757_v0, %s3024_s12  ;;  %v2897_v63 = vld [vmem:[%s3792_s3 + $0x48] sm:$0xff]  }
 0x14c   :  { %v2898_v0 = vld [vmem:[%s3792_s3 + $0x8] sm:$0xff]   ;;  %2670 = vmatprep.subr.bf16.mxu1 %v2897_v63 }
 0x14d   :  { %2671 = vmatpush3.bf16.msra.mxu1 %v2898_v0 }
 0x14e   :  { %2672 = vmatprep.subr.bf16.mxu1 %v2901_v9 }
 0x14f   :  { %663 = vrot.lane.b32.xlu1 %v662_v3, %s3023_s2  ;;  %696 = vrot.lane.b32.xlu0 %v695_v4, %s3022_s0  ;;  %v2900_v3 = vld [vmem:[%s3792_s3 + $0x90] sm:$0xff]   ;;  %s3000_s3 = scalar_lea.vmem %s2486_s18, 32 }
 0x150   :  { %2697 = vmatpush3.bf16.msra.mxu0 %v2900_v3  ;;  %p3001_p0 = scmp.ne.s32.totalorder %s2486_s18, %s3000_s3  ;;  %p3006_p2 = scmp.lt.s32.totalorder %s3000_s3, %s3000_s3 }
 0x151   :  { %2698 = vmatprep.subr.bf16.mxu0 %v2903_v11  ;;  %2673 = vmatpush3.bf16.msra.mxu1 %v2902_v10 }
 0x152   :  { %p3007_p3 = por %p3006_p2, %p3005_p1 }
 0x153   :  { %670 = vrot.lane.b32.xlu1 %v669_v7, %s3022_s0  ;;  %634 = vrot.lane.b32.xlu0 %v633_v8, %s3023_s2  ;;  %v893_v7 = vld [vmem:[#allocation2 + $0x69] sm:$0x7]  ;;  %v901_v8 = vld [vmem:[#allocation2 + $0x6d] sm:$0x7] }
 0x154   :  { %v895_v15 = vrot.slane %v893_v7, 1  ;;  %v903_v17 = vrot.slane %v901_v8, 1  ;;  %2699 = vmatpush3.bf16.msra.mxu0 %v2904_v12  ;;  %p3008_p4 = pnand %p3007_p3, %p3001_p0 }
 0x155   :  { %2700 = vmatprep.subr.bf16.mxu0 %v2905_v20 }
 0x157   :  { %862 = vrot.lane.b32.xlu1 %v861_v13, %s3022_s0  ;;  %771 = vrot.lane.b32.xlu0 %v770_v14, %s3023_s2 }
 0x158   :  { %2701 = vmatpush3.bf16.msra.mxu0 %v2906_v21 }
 0x15b   :  { %797 = vrot.lane.b32.xlu1 %v796_v16, %s3023_s2  ;;  %677 = vrot.lane.b32.xlu0 %v676_v22, %s3024_s12 }
 0x15f   :  { %872 = vrot.lane.b32.xlu1 %v871_v29, %s3024_s12  ;;  %918 = vrot.lane.b32.xlu0 %v917_v30, %s3023_s2  ;;  %v933_v29 = vrot.slane %v931_v25, 1  ;;  %v810_v30 = vrot.slane %v808_v26, 4 }
 0x161   :  { %v360_v37 = vpop.permute.xlu0 %359  ;;  %v354_v38 = vpop.permute.xlu1 %353 }
 0x162   :  { %356 = vst.msk [vmem:[#allocation3 + $0x10] sm:$0x7] %vm313_vm9, %v354_v38 }
 0x163   :  { %948 = vrot.lane.b32.xlu1 %v947_v39, %s3023_s2  ;;  %926 = vrot.lane.b32.xlu0 %v925_v40, %s3022_s0  ;;  %362 = vst.msk [vmem:[#allocation3 + $0x10] sm:$0x7] %vm320_vm10, %v360_v37 }
 0x165   :  { %v366_v47 = vpop.permute.xlu0 %365  ;;  %v407_v48 = vpop.permute.xlu1 %406 }
 0x166   :  { %368 = vst.msk [vmem:[#allocation3 + $0x10] sm:$0x7] %vm327_vm11, %v366_v47 }
 0x167   :  { %956 = vrot.lane.b32.xlu1 %v955_v49, %s3022_s0  ;;  %852 = vrot.lane.b32.xlu0 %v851_v50, %s3023_s2 }
 0x169   :  { %v415_v57 = vpop.permute.xlu1 %414  ;;  %v311_v58 = vpop.permute.xlu0 %310 }
 0x16a   :  { %314 = vst.msk [vmem:[#allocation3] sm:$0x7] %vm313_vm9, %v311_v58 }
 0x16b   :  { %964 = vrot.lane.b32.xlu1 %v963_v59, %s3024_s12  ;;  %804 = vrot.lane.b32.xlu0 %v803_v60, %s3022_s0 }
 0x16d   :  { %v386_v4 = vpop.permute.xlu1 %385  ;;  %v399_v5 = vpop.permute.xlu0 %398 }
 0x16e   :  { %402 = vst.msk [vmem:[#allocation3] sm:$0x38] %vm401_vm12, %v399_v5 }
 0x16f   :  { %410 = vst.msk [vmem:[#allocation3] sm:$0x38] %vm409_vm13, %v407_v48  ;;  %888 = vrot.lane.b32.xlu1 %v887_v1, %s3023_s2  ;;  %823 = vrot.lane.b32.xlu0 %v822_v6, %s3023_s2 }
 0x170   :  { %418 = vst.msk [vmem:[#allocation3] sm:$0x38] %vm417_vm14, %v415_v57 }
 0x171   :  { %v340_v13 = vpop.permute.xlu1 %339  ;;  %v318_v14 = vpop.permute.xlu0 %317 }
 0x172   :  { %321 = vst.msk [vmem:[#allocation3] sm:$0x7] %vm320_vm10, %v318_v14 }
 0x173   :  { %896 = vrot.lane.b32.xlu1 %v895_v15, %s3022_s0  ;;  %904 = vrot.lane.b32.xlu0 %v903_v17, %s3024_s12 }
 0x175   :  { %v435_v16 = vpop.permute.xlu1 %434  ;;  %v325_v22 = vpop.permute.xlu0 %324 }
 0x176   :  { %328 = vst.msk [vmem:[#allocation3] sm:$0x7] %vm327_vm11, %v325_v22 }
 0x177   :  { %837 = vrot.lane.b32.xlu1 %v836_v23, %s3024_s12  ;;  %830 = vrot.lane.b32.xlu0 %v829_v24, %s3022_s0 }
 0x179   :  { %v346_v27 = vpop.permute.xlu1 %345  ;;  %v374_v28 = vpop.permute.xlu0 %373 }
 0x17a   :  { %376 = vst.msk [vmem:[#allocation3 + $0x18] sm:$0x7] %vm313_vm9, %v374_v28 }
 0x17b   :  { %934 = vrot.lane.b32.xlu1 %v933_v29, %s3024_s12  ;;  %811 = vrot.lane.b32.xlu0 %v810_v30, %s3024_s12 }
 0x17d   :  { %v575_v31 = vpop.permute.xlu1 %574  ;;  %v380_v32 = vpop.permute.xlu0 %379 }
 0x17e   :  { %577 = vst.msk [vmem:[#allocation3 + $0x10] sm:$0xc0] %vm511_vm15, %v575_v31 }
 0x17f   :  { %578 = vst.msk [vmem:[#allocation3 + $0x30] sm:$0x1] %vm513_vm0, %v575_v31 }
 0x180   :  { %382 = vst.msk [vmem:[#allocation3 + $0x18] sm:$0x7] %vm320_vm10, %v380_v32 }
 0x181   :  { %388 = vst.msk [vmem:[#allocation3 + $0x18] sm:$0x7] %vm327_vm11, %v386_v4  ;;  %v468_v33 = vpop.permute.xlu1 %467  ;;  %v334_v34 = vpop.permute.xlu0 %333 }
 0x182   :  { %336 = vst.msk [vmem:[#allocation3 + $0x8] sm:$0x7] %vm313_vm9, %v334_v34  ;;  %vm653_vm9 = vcmask 1044225  }
 0x183   :  { %342 = vst.msk [vmem:[#allocation3 + $0x8] sm:$0x7] %vm320_vm10, %v340_v13  ;;  %vm761_vm10 = vcmask 1047300  }
 0x184   :  { %348 = vst.msk [vmem:[#allocation3 + $0x8] sm:$0x7] %vm327_vm11, %v346_v27  ;;  %vm855_vm11 = vcmask 523527  }
 0x185   :  { %v621_v35 = vpop.permute.xlu1 %620  ;;  %v428_v36 = vpop.permute.xlu0 %427 }
 0x186   :  { %430 = vst.msk [vmem:[#allocation3 + $0x8] sm:$0x38] %vm401_vm12, %v428_v36 }
 0x187   :  { %437 = vst.msk [vmem:[#allocation3 + $0x8] sm:$0x38] %vm409_vm13, %v435_v16 }
 0x189   :  { %v545_v37 = vpop.permute.xlu1 %544  ;;  %v442_v38 = vpop.permute.xlu0 %441 }
 0x18a   :  { %547 = vst.msk [vmem:[#allocation3 + $0x8] sm:$0xc0] %vm511_vm15, %v545_v37 }
 0x18b   :  { %548 = vst.msk [vmem:[#allocation3 + $0x28] sm:$0x1] %vm513_vm0, %v545_v37 }
 0x18c   :  { %444 = vst.msk [vmem:[#allocation3 + $0x8] sm:$0x38] %vm417_vm14, %v442_v38 }
 0x18d   :  { %v553_v39 = vpop.permute.xlu1 %552  ;;  %v583_v40 = vpop.permute.xlu0 %582 }
 0x18e   :  { %555 = vst.msk [vmem:[#allocation3 + $0x8] sm:$0xc0] %vm521_vm1, %v553_v39  ;;  %585 = vst.msk [vmem:[#allocation3 + $0x10] sm:$0xc0] %vm521_vm1, %v583_v40 }
 0x18f   :  { %556 = vst.msk [vmem:[#allocation3 + $0x28] sm:$0x1] %vm523_vm2, %v553_v39  ;;  %586 = vst.msk [vmem:[#allocation3 + $0x30] sm:$0x1] %vm523_vm2, %v583_v40 }
 0x191   :  { %v480_v41 = vpop.permute.xlu1 %479  ;;  %v591_v42 = vpop.permute.xlu0 %590 }
 0x192   :  { %482 = vst.msk [vmem:[#allocation3 + $0x18] sm:$0x38] %vm401_vm12, %v480_v41 }
 0x193   :  { %593 = vst.msk [vmem:[#allocation3 + $0x10] sm:$0xc0] %vm531_vm3, %v591_v42 }
 0x194   :  { %594 = vst.msk [vmem:[#allocation3 + $0x30] sm:$0x1] %vm533_vm4, %v591_v42 }
 0x195   :  { %v561_v43 = vpop.permute.xlu1 %560  ;;  %v509_v44 = vpop.permute.xlu0 %508 }
 0x196   :  { %563 = vst.msk [vmem:[#allocation3 + $0x8] sm:$0xc0] %vm531_vm3, %v561_v43 }
 0x197   :  { %564 = vst.msk [vmem:[#allocation3 + $0x28] sm:$0x1] %vm533_vm4, %v561_v43 }
 0x198   :  { %512 = vst.msk [vmem:[#allocation3] sm:$0xc0] %vm511_vm15, %v509_v44 }
 0x199   :  { %514 = vst.msk [vmem:[#allocation3 + $0x20] sm:$0x1] %vm513_vm0, %v509_v44  ;;  %v487_v45 = vpop.permute.xlu1 %486  ;;  %v519_v46 = vpop.permute.xlu0 %518 }
 0x19a   :  { %489 = vst.msk [vmem:[#allocation3 + $0x18] sm:$0x38] %vm409_vm13, %v487_v45  ;;  %v2907_v45 = vld [vmem:[%s3794_s5 + $0x78] sm:$0xff]  }
 0x19b   :  { %522 = vst.msk [vmem:[#allocation3] sm:$0xc0] %vm521_vm1, %v519_v46  ;;  %2714 = vmatprep.subr.bf16.mxu1 %v2907_v45 }
 0x19c   :  { %524 = vst.msk [vmem:[#allocation3 + $0x20] sm:$0x1] %vm523_vm2, %v519_v46  ;;  %v2908_v46 = vld [vmem:[%s3794_s5 + $0x38] sm:$0xff]  }
 0x19d   :  { %v494_v47 = vpop.permute.xlu1 %493  ;;  %v454_v48 = vpop.permute.xlu0 %453  ;;  %v970_v26 = vld [vmem:[#allocation3 + $0x8] sm:$0xff] }
 0x19e   :  { %496 = vst.msk [vmem:[#allocation3 + $0x18] sm:$0x38] %vm417_vm14, %v494_v47  ;;  %v2909_v47 = vld [vmem:[%s3794_s5 + $0xf8] sm:$0xff]  }
 0x19f   :  { %456 = vst.msk [vmem:[#allocation3 + $0x10] sm:$0x38] %vm401_vm12, %v454_v48  ;;  %vm857_vm12 = vcmask 517376   ;;  %2736 = vmatprep.subr.bf16.mxu0 %v2909_v47  ;;  %v2926_v47 = vld [vmem:[%s3794_s5 + $0x50] sm:$0xff]  }
 0x1a1   :  { %v704_v49 = vpop.permute.xlu1 %703  ;;  %v529_v50 = vpop.permute.xlu0 %528 }
 0x1a2   :  { %532 = vst.msk [vmem:[#allocation3] sm:$0xc0] %vm531_vm3, %v529_v50 }
 0x1a3   :  { %534 = vst.msk [vmem:[#allocation3 + $0x20] sm:$0x1] %vm533_vm4, %v529_v50  ;;  %v3025_v50 = vmov 1983009808  }
 0x1a5   :  { %v643_v51 = vpop.permute.xlu1 %642  ;;  %v461_v52 = vpop.permute.xlu0 %460 }
 0x1a6   :  { %463 = vst.msk [vmem:[#allocation3 + $0x10] sm:$0x38] %vm409_vm13, %v461_v52  ;;  %vm865_vm13 = vcmask 785927   ;;  %v1357_v52 = vlaneseq }
 0x1a7   :  { %470 = vst.msk [vmem:[#allocation3 + $0x10] sm:$0x38] %vm417_vm14, %v468_v33  ;;  %vm867_vm14 = vcmask 779776  }
 0x1a9   :  { %v651_v53 = vpop.permute.xlu1 %650  ;;  %v605_v54 = vpop.permute.xlu0 %604  ;;  %v969_v30 = vld [vmem:[#allocation3] sm:$0xff] }
 0x1aa   :  { %607 = vst.msk [vmem:[#allocation3 + $0x18] sm:$0xc0] %vm511_vm15, %v605_v54  ;;  %vm875_vm15 = vcmask 1048327  }
 0x1ab   :  { %608 = vst.msk [vmem:[#allocation3 + $0x38] sm:$0x1] %vm513_vm0, %v605_v54  ;;  %vm877_vm0 = vcmask 1042176   ;;  %v2510_v54 = vld [vmem:[%s3793_s4] ss:$0 sm:$0xff] }
 0x1ad   :  { %v779_v55 = vpop.permute.xlu1 %778  ;;  %v613_v56 = vpop.permute.xlu0 %612 }
 0x1ae   :  { %615 = vst.msk [vmem:[#allocation3 + $0x18] sm:$0xc0] %vm521_vm1, %v613_v56  ;;  %v971_v37 = vld [vmem:[#allocation3 + $0x10] sm:$0xff]  ;;  %vm1351_vm1 = vcmask 516096  }
 0x1af   :  { %616 = vst.msk [vmem:[#allocation3 + $0x38] sm:$0x1] %vm523_vm2, %v613_v56  ;;  %vm1366_vm2 = vcmask 1040896  }
 0x1b0   :  { %623 = vst.msk [vmem:[#allocation3 + $0x18] sm:$0xc0] %vm531_vm3, %v621_v35  ;;  %vm3027_vm3 = vmmov 0  }
 0x1b1   :  { %624 = vst.msk [vmem:[#allocation3 + $0x38] sm:$0x1] %vm533_vm4, %v621_v35  ;;  %v716_v57 = vpop.permute.xlu1 %715  ;;  %v743_v58 = vpop.permute.xlu0 %742  ;;  %vm1798_vm4 = vcmask 523264  }
 0x1b2   :  { %718 = vst.msk [vmem:[#allocation3 + $0x38] sm:$0xe] %vm637_vm5, %v716_v57 }
 0x1b3   :  { %746 = vst.msk [vmem:[#allocation3 + $0x20] sm:$0x70] %vm745_vm6, %v743_v58  ;;  %v2910_v58 = vld [vmem:[%s3794_s5 + $0x70] sm:$0xff]  }
 0x1b5   :  { %v786_v59 = vpop.permute.xlu1 %785  ;;  %v751_v60 = vpop.permute.xlu0 %750 }
 0x1b6   :  { %754 = vst.msk [vmem:[#allocation3 + $0x20] sm:$0x70] %vm753_vm7, %v751_v60  ;;  %v2912_v60 = vld [vmem:[%s3794_s5 + $0x30] sm:$0xff]  }
 0x1b7   :  { %v972_v33 = vld [vmem:[#allocation3 + $0x18] sm:$0xff] }
 0x1b9   :  { %v723_v61 = vpop.permute.xlu1 %722  ;;  %v690_v62 = vpop.permute.xlu0 %689 }
 0x1ba   :  { %725 = vst.msk [vmem:[#allocation3 + $0x38] sm:$0xe] %vm645_vm8, %v723_v61 }
 0x1bb   :  { %692 = vst.msk [vmem:[#allocation3 + $0x30] sm:$0xe] %vm637_vm5, %v690_v62  ;;  %v3498_v62 = vshrl.u32 %v1357_v52, 7 }
 0x1bd   :  { %v730_v63 = vpop.permute.xlu1 %729  ;;  %v759_v0 = vpop.permute.xlu0 %758 }
 0x1be   :  { %732 = vst.msk [vmem:[#allocation3 + $0x38] sm:$0xe] %vm653_vm9, %v730_v63 }
 0x1bf   :  { %762 = vst.msk [vmem:[#allocation3 + $0x20] sm:$0x70] %vm761_vm10, %v759_v0 }
 0x1c1   :  { %v664_v1 = vpop.permute.xlu1 %663  ;;  %v697_v2 = vpop.permute.xlu0 %696 }
 0x1c2   :  { %666 = vst.msk [vmem:[#allocation3 + $0x28] sm:$0xe] %vm637_vm5, %v664_v1  ;;  %v2913_v1 = vld [vmem:[%s3794_s5 + $0xf0] sm:$0xff]  }
 0x1c3   :  { %699 = vst.msk [vmem:[#allocation3 + $0x30] sm:$0xe] %vm645_vm8, %v697_v2 }
 0x1c4   :  { %706 = vst.msk [vmem:[#allocation3 + $0x30] sm:$0xe] %vm653_vm9, %v704_v49 }
 0x1c5   :  { %v671_v3 = vpop.permute.xlu1 %670  ;;  %v635_v4 = vpop.permute.xlu0 %634 }
 0x1c6   :  { %673 = vst.msk [vmem:[#allocation3 + $0x28] sm:$0xe] %vm645_vm8, %v671_v3 }
 0x1c7   :  { %638 = vst.msk [vmem:[#allocation3 + $0x20] sm:$0xe] %vm637_vm5, %v635_v4 }
 0x1c8   :  { %646 = vst.msk [vmem:[#allocation3 + $0x20] sm:$0xe] %vm645_vm8, %v643_v51  ;;  %v1355_v51 = vunpack.c.l.s4 %v3025_v50 }
 0x1c9   :  { %654 = vst.msk [vmem:[#allocation3 + $0x20] sm:$0xe] %vm653_vm9, %v651_v53  ;;  %v863_v5 = vpop.permute.xlu1 %862  ;;  %v772_v6 = vpop.permute.xlu0 %771 }
 0x1ca   :  { %774 = vst.msk [vmem:[#allocation3 + $0x28] sm:$0x70] %vm745_vm6, %v772_v6  ;;  %v1356_v61 = vunpack.c.0.s8 %v1355_v51 }
 0x1cb   :  { %781 = vst.msk [vmem:[#allocation3 + $0x28] sm:$0x70] %vm753_vm7, %v779_v55 }
 0x1cc   :  { %788 = vst.msk [vmem:[#allocation3 + $0x28] sm:$0x70] %vm761_vm10, %v786_v59  ;;  %v2911_v59 = vld [vmem:[%s3794_s5 + $0xb8] sm:$0xff]  }
 0x1cd   :  { %v798_v7 = vpop.permute.xlu1 %797  ;;  %v678_v8 = vpop.permute.xlu0 %677 }
 0x1ce   :  { %800 = vst.msk [vmem:[#allocation3 + $0x30] sm:$0x70] %vm745_vm6, %v798_v7  ;;  %v2914_v7 = vld [vmem:[%s3794_s5 + $0x68] sm:$0xff]  }
 0x1cf   :  { %680 = vst.msk [vmem:[#allocation3 + $0x28] sm:$0xe] %vm653_vm9, %v678_v8  ;;  %v2915_v8 = vld [vmem:[%s3794_s5 + $0xb0] sm:$0xff]  }
 0x1d1   :  { %v873_v9 = vpop.permute.xlu1 %872  ;;  %v919_v10 = vpop.permute.xlu0 %918 }
 0x1d2   :  { %921 = vst.msk [vmem:[#allocation3 + $0x30] sm:$0x80] %vm855_vm11, %v919_v10 }
 0x1d3   :  { %922 = vst.msk [vmem:[#allocation3 + $0x50] sm:$0x3] %vm857_vm12, %v919_v10 }
 0x1d5   :  { %v949_v11 = vpop.permute.xlu1 %948  ;;  %v927_v12 = vpop.permute.xlu0 %926 }
 0x1d6   :  { %951 = vst.msk [vmem:[#allocation3 + $0x38] sm:$0x80] %vm855_vm11, %v949_v11 }
 0x1d7   :  { %952 = vst.msk [vmem:[#allocation3 + $0x58] sm:$0x3] %vm857_vm12, %v949_v11  ;;  %v3513_v11 = vsub.s32 %v1356_v61, %v3498_v62  ;;  %v2931_v61 = vld [vmem:[%s3794_s5 + $0x90] sm:$0xff]  }
 0x1d8   :  { %929 = vst.msk [vmem:[#allocation3 + $0x30] sm:$0x80] %vm865_vm13, %v927_v12 }
 0x1d9   :  { %930 = vst.msk [vmem:[#allocation3 + $0x50] sm:$0x3] %vm867_vm14, %v927_v12  ;;  %v957_v13 = vpop.permute.xlu1 %956  ;;  %v853_v14 = vpop.permute.xlu0 %852 }
 0x1da   :  { %959 = vst.msk [vmem:[#allocation3 + $0x38] sm:$0x80] %vm865_vm13, %v957_v13 }
 0x1db   :  { %960 = vst.msk [vmem:[#allocation3 + $0x58] sm:$0x3] %vm867_vm14, %v957_v13 }
 0x1dc   :  { %856 = vst.msk [vmem:[#allocation3 + $0x20] sm:$0x80] %vm855_vm11, %v853_v14 }
 0x1dd   :  { %858 = vst.msk [vmem:[#allocation3 + $0x40] sm:$0x3] %vm857_vm12, %v853_v14  ;;  %v965_v15 = vpop.permute.xlu1 %964  ;;  %v805_v17 = vpop.permute.xlu0 %804 }
 0x1de   :  { %866 = vst.msk [vmem:[#allocation3 + $0x20] sm:$0x80] %vm865_vm13, %v863_v5 }
 0x1df   :  { %868 = vst.msk [vmem:[#allocation3 + $0x40] sm:$0x3] %vm867_vm14, %v863_v5 }
 0x1e0   :  { %876 = vst.msk [vmem:[#allocation3 + $0x20] sm:$0x80] %vm875_vm15, %v873_v9  ;;  %967 = vst.msk [vmem:[#allocation3 + $0x38] sm:$0x80] %vm875_vm15, %v965_v15 }
 0x1e1   :  { %878 = vst.msk [vmem:[#allocation3 + $0x40] sm:$0x3] %vm877_vm0, %v873_v9  ;;  %968 = vst.msk [vmem:[#allocation3 + $0x58] sm:$0x3] %vm877_vm0, %v965_v15  ;;  %v889_v18 = vpop.permute.xlu1 %888  ;;  %v824_v19 = vpop.permute.xlu0 %823  ;;  %v2916_v9 = vld [vmem:[%s3794_s5 + $0x28] sm:$0xff]  }
 0x1e2   :  { %807 = vst.msk [vmem:[#allocation3 + $0x30] sm:$0x70] %vm753_vm7, %v805_v17  ;;  %v2917_v15 = vld [vmem:[%s3794_s5 + $0xe8] sm:$0xff]  }
 0x1e3   :  { %891 = vst.msk [vmem:[#allocation3 + $0x28] sm:$0x80] %vm855_vm11, %v889_v18 }
 0x1e4   :  { %892 = vst.msk [vmem:[#allocation3 + $0x48] sm:$0x3] %vm857_vm12, %v889_v18 }
 0x1e5   :  { %826 = vst.msk [vmem:[#allocation3 + $0x38] sm:$0x70] %vm745_vm6, %v824_v19  ;;  %v897_v20 = vpop.permute.xlu1 %896  ;;  %v905_v21 = vpop.permute.xlu0 %904 }
 0x1e6   :  { %899 = vst.msk [vmem:[#allocation3 + $0x28] sm:$0x80] %vm865_vm13, %v897_v20 }
 0x1e7   :  { %900 = vst.msk [vmem:[#allocation3 + $0x48] sm:$0x3] %vm867_vm14, %v897_v20  ;;  %v973_v25 = vld [vmem:[#allocation3 + $0x20] sm:$0xff] }
 0x1e8   :  { %907 = vst.msk [vmem:[#allocation3 + $0x28] sm:$0x80] %vm875_vm15, %v905_v21  ;;  %v981_v31 = vpack.c.bf16 %v973_v25, %v969_v30  ;;  %v980_v36 = vld [vmem:[#allocation3 + $0x58] sm:$0x3]  ;;  %v977_v39 = vld [vmem:[#allocation3 + $0x40] sm:$0x3] }
 0x1e9   :  { %908 = vst.msk [vmem:[#allocation3 + $0x48] sm:$0x3] %vm877_vm0, %v905_v21  ;;  %v838_v16 = vpop.permute.xlu1 %837  ;;  %v831_v22 = vpop.permute.xlu0 %830  ;;  %v988_v41 = vpack.c.bf16 %v980_v36, %v980_v36  ;;  %v985_v42 = vpack.c.bf16 %v977_v39, %v977_v39  ;;  %v2922_v36 = vld [vmem:[%s3794_s5 + $0x58] sm:$0xff]  }
 0x1ea   :  { %833 = vst.msk [vmem:[#allocation3 + $0x38] sm:$0x70] %vm753_vm7, %v831_v22  ;;  %v2919_v22 = vld [vmem:[%s3794_s5 + $0xa8] sm:$0xff]  }
 0x1eb   :  { %840 = vst.msk [vmem:[#allocation3 + $0x38] sm:$0x70] %vm761_vm10, %v838_v16  ;;  %v2918_v16 = vld [vmem:[%s3794_s5 + $0x60] sm:$0xff]  }
 0x1ed   :  { %v935_v23 = vpop.permute.xlu1 %934  ;;  %v812_v24 = vpop.permute.xlu0 %811 }
 0x1ee   :  { %937 = vst.msk [vmem:[#allocation3 + $0x30] sm:$0x80] %vm875_vm15, %v935_v23 }
 0x1ef   :  { %938 = vst.msk [vmem:[#allocation3 + $0x50] sm:$0x3] %vm877_vm0, %v935_v23  ;;  %v974_v27 = vld [vmem:[#allocation3 + $0x28] sm:$0xff]  ;;  %v2920_v23 = vld [vmem:[%s3794_s5 + $0x20] sm:$0xff]  }
 0x1f0   :  { %814 = vst.msk [vmem:[#allocation3 + $0x30] sm:$0x70] %vm761_vm10, %v812_v24  ;;  %v978_v28 = vld [vmem:[#allocation3 + $0x48] sm:$0x3]  ;;  %v982_v29 = vpack.c.bf16 %v974_v27, %v970_v26 }
 0x1f1   :  { %v986_v32 = vpack.c.bf16 %v978_v28, %v978_v28 }
 0x1f2   :  { %1284 = vmatprep.mubr.bf16.mxu1 %v982_v29  ;;  %v976_v34 = vld [vmem:[#allocation3 + $0x38] sm:$0xff]  ;;  %v2921_v29 = vld [vmem:[%s3794_s5 + $0xe0] sm:$0xff]  }
 0x1f3   :  { %1285 = vmatmul.mubr.bf16.vlgmr.msra.gmra.mxu1 %v981_v31  ;;  %v984_v35 = vpack.c.bf16 %v976_v34, %v972_v33 }
 0x1f4   :  { %1292 = vmatprep.mubr.bf16.mxu1 %v986_v32  ;;  %2715 = vmatpush3.bf16.msra.mxu1 %v2908_v46  ;;  %v2925_v46 = vld [vmem:[%s3794_s5 + $0xd8] sm:$0xff]  }
 0x1f5   :  { %1332 = vmatprep.mubr.bf16.mxu0 %v984_v35  ;;  %2716 = vmatprep.subr.bf16.mxu1 %v2910_v58 }
 0x1f6   :  { %v979_v43 = vld [vmem:[#allocation3 + $0x50] sm:$0x3] }
 0x1f7   :  { %v975_v38 = vld [vmem:[#allocation3 + $0x30] sm:$0xff]  ;;  %v987_v44 = vpack.c.bf16 %v979_v43, %v979_v43 }
 0x1f8   :  { %v983_v40 = vpack.c.bf16 %v975_v38, %v971_v37  ;;  %2717 = vmatpush3.bf16.msra.mxu1 %v2912_v60  ;;  %v2923_v37 = vld [vmem:[%s3794_s5 + $0xa0] sm:$0xff]   ;;  %v2924_v38 = vld [vmem:[%s3794_s5 + $0x18] sm:$0xff]  }
 0x1f9   :  { %2718 = vmatprep.subr.bf16.mxu1 %v2914_v7  ;;  %v2938_v7 = vld [vmem:[%s3794_s5 + $0x80] sm:$0xff]  }
 0x1fa   :  { %1333 = vmatmul.mubr.bf16.vlgmr.msra.gmra.mxu0 %v983_v40 }
 0x1fb   :  { %1340 = vmatprep.mubr.bf16.mxu0 %v988_v41  ;;  %1293 = vmatmul.mubr.bf16.gmra.mxu1 %v985_v42 }
 0x1fc   :  { %2737 = vmatpush3.bf16.msra.mxu0 %v2911_v59  ;;  %2719 = vmatpush3.bf16.msra.mxu1 %v2916_v9 }
 0x1fd   :  { %2738 = vmatprep.subr.bf16.mxu0 %v2913_v1  ;;  %2720 = vmatprep.subr.bf16.mxu1 %v2918_v16  ;;  %v2932_v1 = vld [vmem:[%s3794_s5 + $0x8] sm:$0xff]  }
 0x200   :  { %2739 = vmatpush3.bf16.msra.mxu0 %v2915_v8  ;;  %2721 = vmatpush3.bf16.msra.mxu1 %v2920_v23  ;;  %v3026_v8 = vmov 0.0  }
 0x201   :  { %2740 = vmatprep.subr.bf16.mxu0 %v2917_v15  ;;  %2722 = vmatprep.subr.bf16.mxu1 %v2922_v36  ;;  %v2949_v36 = vld [vmem:[%s3796_s7 + $0x6c] ss:$16 sps:$4 sm:$0xff]  }
 0x202   :  { %1341 = vmatmul.mubr.bf16.gmra.mxu0 %v987_v44 }
 0x204   :  { %2741 = vmatpush3.bf16.msra.mxu0 %v2919_v22  ;;  %2723 = vmatpush3.bf16.msra.mxu1 %v2924_v38  ;;  %v2950_v38 = vld [vmem:[%s3796_s7 + $0x40] ss:$16 sps:$4 sm:$0xff]  }
 0x205   :  { %2742 = vmatprep.subr.bf16.mxu0 %v2921_v29  ;;  %2724 = vmatprep.subr.bf16.mxu1 %v2926_v47  ;;  %v2941_v29 = vld [vmem:[%s3794_s5 + $0x110] sm:$0xff]   ;;  %v2965_v47 = vld [vmem:[%s3796_s7 + $0x8] ss:$16 sps:$4 sm:$0xff]  }
 0x208   :  { %2743 = vmatpush3.bf16.msra.mxu0 %v2923_v37  ;;  %v2952_v37 = vld [vmem:[%s3796_s7 + $0x44] ss:$16 sps:$4 sm:$0xff]  }
 0x209   :  { %2744 = vmatprep.subr.bf16.mxu0 %v2925_v46  ;;  %v2964_v46 = vld [vmem:[%s3796_s7 + $0x4] ss:$16 sps:$4 sm:$0xff]  }
 0x2b3   :  { %v2674_v48 = vpop.f32.mrf.mxu1 }
 0x2b5   :  { %v2675_v49 = vpop.f32.mrf.mxu1 }
 0x2b6   :  { %v2676_v55 = vadd.f32 %v2675_v49, %v2674_v48  ;;  %v2927_v48 = vld [vmem:[%s3794_s5 + $0x98] sm:$0xff]  }
 0x2b7   :  { %v2677_v53 = vpop.f32.mrf.mxu1  ;;  %2745 = vmatpush3.bf16.msra.mxu0 %v2927_v48  ;;  %v2967_v48 = vld [vmem:[%s3796_s7 + $0xc] ss:$16 sps:$4 sm:$0xff]  }
 0x2b8   :  { %v1287_v2 = vadd.f32 %v2676_v55, %v2510_v54  ;;  %v2929_v55 = vld [vmem:[%s3794_s5 + $0xd0] sm:$0xff]  }
 0x2b9   :  { %v2678_v56 = vpop.f32.mrf.mxu1  ;;  %2746 = vmatprep.subr.bf16.mxu0 %v2929_v55 }
 0x2ba   :  { %v2702_v57 = vpop.f32.mrf.mxu0  ;;  %v2679_v3 = vadd.f32 %v2678_v56, %v2677_v53  ;;  %v2928_v53 = vld [vmem:[%s3794_s5 + $0x10] sm:$0xff]   ;;  %v2930_v56 = vld [vmem:[%s3794_s5 + $0x48] sm:$0xff]  }
 0x2bb   :  { %v2680_v63 = vpop.f32.mrf.mxu1  ;;  %2725 = vmatpush3.bf16.msra.mxu1 %v2928_v53  ;;  %2747 = vmatpush3.bf16.msra.mxu0 %v2931_v61 }
 0x2bc   :  { %v2703_v0 = vpop.f32.mrf.mxu0  ;;  %v1290_v17 = vadd.f32 %v2679_v3, %v2510_v54  ;;  %2726 = vmatprep.subr.bf16.mxu1 %v2930_v56  ;;  %v2934_v3 = vld [vmem:[%s3794_s5 + $0x40] sm:$0xff]  }
 0x2bd   :  { %v2704_v4 = vadd.f32 %v2703_v0, %v2702_v57  ;;  %v2681_v5 = vpop.f32.mrf.mxu1 }
 0x2be   :  { %v2705_v6 = vpop.f32.mrf.mxu0  ;;  %v2682_v12 = vadd.f32 %v2681_v5, %v2680_v63  ;;  %v2936_v5 = vld [vmem:[%s3794_s5] sm:$0xff]  }
 0x2bf   :  { %v1335_v10 = vadd.f32 %v2704_v4, %v1287_v2  ;;  %v2683_v13 = vpop.f32.mrf.mxu1  ;;  %v2933_v2 = vld [vmem:[%s3794_s5 + $0xc8] sm:$0xff]   ;;  %2727 = vmatpush3.bf16.msra.mxu1 %v2932_v1 }
 0x2c0   :  { %v2706_v14 = vpop.f32.mrf.mxu0  ;;  %v1295_v27 = vadd.f32 %v2682_v12, %v2510_v54  ;;  %v2935_v4 = vld [vmem:[%s3794_s5 + $0x88] sm:$0xff]   ;;  %2748 = vmatprep.subr.bf16.mxu0 %v2933_v2  ;;  %2728 = vmatprep.subr.bf16.mxu1 %v2934_v3 }
 0x2c1   :  { %v1348_v18 = vmax.f32 %v1335_v10, 0.0  ;;  %v2707_v19 = vadd.f32 %v2706_v14, %v2705_v6  ;;  %v2684_v20 = vpop.f32.mrf.mxu1  ;;  %v2937_v6 = vld [vmem:[%s3794_s5 + $0xc0] sm:$0xff]   ;;  %2749 = vmatpush3.bf16.msra.mxu0 %v2935_v4 }
 0x2c2   :  { %v2708_v21 = vpop.f32.mrf.mxu0  ;;  %2750 = vmatprep.subr.bf16.mxu0 %v2937_v6 }
 0x2c3   :  { %v1377_v24 = vcombine.high %v1348_v18, %v1348_v18  ;;  %v1338_v25 = vadd.f32 %v2707_v19, %v1290_v17  ;;  %1352 = vst.msk [vmem:[#allocation4] sm:$0x1] %vm1351_vm1, %v1348_v18  ;;  %v1360_v26 = vrot.slane %v1348_v18, %v3513_v11  ;;  %2729 = vmatpush3.bf16.msra.mxu1 %v2936_v5 }
 0x2c4   :  { %v2709_v28 = vpop.f32.mrf.mxu0  ;;  %2839 = vmatprep.subr.bf16.mxu1 %v3026_v8 }
 0x2c5   :  { %v1349_v30 = vmax.f32 %v1338_v25, 0.0  ;;  %v2710_v31 = vadd.f32 %v2709_v28, %v2708_v21  ;;  %v2543_v32 = vrot.slane %v1360_v26, 9  ;;  %v1368_v33 = vcombine.high %v1360_v26, %v1360_v26  ;;  %2751 = vmatpush3.bf16.msra.mxu0 %v2938_v7  ;;  %v2970_v7 = vld [vmem:[%s3798_s9 + $0x38] sm:$0xff]  }
 0x2c6   :  { %v2711_v34 = vpop.f32.mrf.mxu0  ;;  %v1384_v35 = vrot.slane %v1377_v24, %v3513_v11  ;;  %v2939_v24 = vld [vmem:[%s3794_s5 + $0x118] sm:$0xff]   ;;  %2094 = vmatprep.subr.bf16.mxu0 %v2949_v36  ;;  %v2997_v36 = vld [vmem:[%s3798_s9 + $0xc0] sm:$0xff]  }
 0x2c7   :  { %1402 = vst.msk [vmem:[#allocation4 + $0x8] sm:$0x1] %vm1351_vm1, %v1349_v30  ;;  %v1343_v39 = vadd.f32 %v2710_v31, %v1295_v27  ;;  %1363 = vrot.lane.b32.xlu0 %v2543_v32, %s3022_s0  ;;  %v2544_v40 = vrot.slane %v1368_v33, 9  ;;  %1370 = vst.msk [vmem:[#allocation4 + $0x2] sm:$0x1] %vm1351_vm1, %v1368_v33  ;;  %v1410_v41 = vrot.slane %v1349_v30, %v3513_v11 }
 0x2c8   :  { %v1424_v42 = vcombine.high %v1349_v30, %v1349_v30  ;;  %v2712_v43 = vpop.f32.mrf.mxu0  ;;  %v2545_v44 = vrot.slane %v1384_v35, 9  ;;  %1386 = vst.msk [vmem:[#allocation4 + $0x4] sm:$0x1] %vm1351_vm1, %v1384_v35  ;;  %v1393_v45 = vcombine.high %v1384_v35, %v1384_v35  ;;  %v2943_v30 = vld [vmem:[%s3794_s5 + $0x100] sm:$0xff]   ;;  %v2947_v35 = vld [vmem:[%s3796_s7 + $0x68] ss:$16 sps:$4 sm:$0xff]  }
 0x2c9   :  { %v1350_v49 = vmax.f32 %v1343_v39, 0.0  ;;  %1373 = vrot.lane.b32.xlu1 %v2544_v40, %s3022_s0  ;;  %v1415_v50 = vcombine.high %v1410_v41, %v1410_v41  ;;  %v2547_v52 = vrot.slane %v1410_v41, 9  ;;  %v2944_v33 = vld [vmem:[%s3796_s7 + $0x60] ss:$16 sps:$4 sm:$0xff]   ;;  %v2946_v34 = vld [vmem:[%s3796_s7 + $0x64] ss:$16 sps:$4 sm:$0xff]  }
 0x2ca   :  { %v1431_v51 = vrot.slane %v1424_v42, %v3513_v11  ;;  %v2546_v54 = vrot.slane %v1393_v45, 9  ;;  %1395 = vst.msk [vmem:[#allocation4 + $0x6] sm:$0x1] %vm1351_vm1, %v1393_v45  ;;  %v2955_v39 = vld [vmem:[%s3796_s7 + $0x4c] ss:$16 sps:$4 sm:$0xff]  }
 0x2cb   :  { %1389 = vrot.lane.b32.xlu0 %v2545_v44, %s3022_s0  ;;  %v1456_v58 = vrot.slane %v1350_v49, %v3513_v11  ;;  %1414 = vst.msk [vmem:[#allocation4 + $0x1] sm:$0x1] %vm1351_vm1, %v2547_v52  ;;  %v2548_v59 = vrot.slane %v1415_v50, 9  ;;  %v2953_v40 = vld [vmem:[%s3796_s7 + $0x48] ss:$16 sps:$4 sm:$0xff]   ;;  %v3028_v49 = vmov 0  }
 0x2cc   :  { %v1440_v57 = vcombine.high %v1431_v51, %v1431_v51  ;;  %v2549_v60 = vrot.slane %v1431_v51, 9  ;;  %v2958_v41 = vld [vmem:[%s3796_s7 + $0x24] ss:$16 sps:$4 sm:$0xff]   ;;  %v2961_v42 = vld [vmem:[%s3796_s7 + $0x2c] ss:$16 sps:$4 sm:$0xff]  }
 0x2cd   :  { %1398 = vrot.lane.b32.xlu1 %v2546_v54, %s3022_s0  ;;  %v2551_v63 = vrot.slane %v1456_v58, 9  ;;  %1423 = vst.msk [vmem:[#allocation4 + $0x3] sm:$0x1] %vm1351_vm1, %v2548_v59  ;;  %v2956_v43 = vld [vmem:[%s3796_s7 + $0x20] ss:$16 sps:$4 sm:$0xff]  }
 0x2ce   :  { %1439 = vst.msk [vmem:[#allocation4 + $0x5] sm:$0x1] %vm1351_vm1, %v2549_v60  ;;  %v2550_v0 = vrot.slane %v1440_v57, 9  ;;  %v2959_v44 = vld [vmem:[%s3796_s7 + $0x28] ss:$16 sps:$4 sm:$0xff]  }
 0x2cf   :  { %1416 = vrot.lane.b32.xlu0 %v1415_v50, %s3022_s0  ;;  %1464 = vst.msk [vmem:[#allocation4 + $0x9] sm:$0x1] %vm1351_vm1, %v2551_v63  ;;  %v2962_v45 = vld [vmem:[%s3796_s7] ss:$16 sps:$4 sm:$0xff]   ;;  %v2968_v50 = vld [vmem:[%s3798_s9 + $0x78] sm:$0xff]  }
 0x2d0   :  { %1448 = vst.msk [vmem:[#allocation4 + $0x7] sm:$0x1] %vm1351_vm1, %v2550_v0  ;;  %v2553_v60 = vld [vmem:[%s3795_s6] ss:$0 sm:$0xff] }
 0x2d1   :  { %1432 = vrot.lane.b32.xlu1 %v1431_v51, %s3022_s0  ;;  %v2969_v51 = vld [vmem:[%s3798_s9 + $0xf8] sm:$0xff]  }
 0x2d3   :  { %1441 = vrot.lane.b32.xlu0 %v1440_v57, %s3022_s0 }
 0x2d5   :  { %1457 = vrot.lane.b32.xlu1 %v1456_v58, %s3022_s0 }
 0x2d6   :  { %v2552_v31 = vld.sshfl [vmem:[#allocation4 + $0x8] sm:$0x3 pattern:$0x76325410] }
 0x2d7   :  { %v1502_v32 = vpack.c.bf16 %v2552_v31, %v2552_v31  ;;  %v2992_v31 = vld [vmem:[%s3798_s9 + $0x48] sm:$0xff]  }
 0x339   :  { %v1364_v9 = vpop.permute.xlu0 %1363 }
 0x33a   :  { %1367 = vst.msk [vmem:[#allocation4] sm:$0x1] %vm1366_vm2, %v1364_v9 }
 0x33b   :  { %v1374_v10 = vpop.permute.xlu1 %1373 }
 0x33c   :  { %1376 = vst.msk [vmem:[#allocation4 + $0x2] sm:$0x1] %vm1366_vm2, %v1374_v10  ;;  %v2972_v10 = vld [vmem:[%s3798_s9 + $0x70] sm:$0xff]  }
 0x33d   :  { %v1390_v12 = vpop.permute.xlu0 %1389 }
 0x33e   :  { %1392 = vst.msk [vmem:[#allocation4 + $0x4] sm:$0x1] %vm1366_vm2, %v1390_v12  ;;  %v2973_v12 = vld [vmem:[%s3798_s9 + $0xf0] sm:$0xff]  }
 0x33f   :  { %v1399_v13 = vpop.permute.xlu1 %1398 }
 0x340   :  { %1401 = vst.msk [vmem:[#allocation4 + $0x6] sm:$0x1] %vm1366_vm2, %v1399_v13 }
 0x341   :  { %v1417_v14 = vpop.permute.xlu0 %1416 }
 0x342   :  { %1419 = vst.msk [vmem:[#allocation4 + $0x1] sm:$0x1] %vm1366_vm2, %v1417_v14  ;;  %v2974_v14 = vld [vmem:[%s3798_s9 + $0x30] sm:$0xff]  }
 0x343   :  { %v1433_v15 = vpop.permute.xlu1 %1432 }
 0x344   :  { %1435 = vst.msk [vmem:[#allocation4 + $0x3] sm:$0x1] %vm1366_vm2, %v1433_v15  ;;  %v2975_v15 = vld [vmem:[%s3798_s9 + $0xb0] sm:$0xff]  }
 0x345   :  { %v1442_v17 = vpop.permute.xlu0 %1441 }
 0x346   :  { %1444 = vst.msk [vmem:[#allocation4 + $0x5] sm:$0x1] %vm1366_vm2, %v1442_v17  ;;  %v2976_v17 = vld [vmem:[%s3798_s9 + $0x68] sm:$0xff]  }
 0x347   :  { %v1458_v18 = vpop.permute.xlu1 %1457 }
 0x348   :  { %1460 = vst.msk [vmem:[#allocation4 + $0x7] sm:$0x1] %vm1366_vm2, %v1458_v18  ;;  %v2977_v18 = vld [vmem:[%s3798_s9 + $0xe8] sm:$0xff]  }
 0x34f   :  { %v1465_v19 = vld [vmem:[#allocation4] sm:$0xff] }
 0x350   :  { %v1476_v20 = vrot.slane %v1465_v19, %v3513_v11  ;;  %v1469_v21 = vcombine.high %v1465_v19, %v1465_v19  ;;  %v2978_v19 = vld [vmem:[%s3798_s9 + $0x28] sm:$0xff]  }
 0x352   :  { %v1484_v16 = vcombine.high %v1476_v20, %v1476_v20  ;;  %v1483_v22 = vrot.slane %v1469_v21, %v3513_v11  ;;  %v1498_v26 = vpack.c.bf16 %v1476_v20, %v1476_v20  ;;  %v2942_v11 = vld [vmem:[%s3794_s5 + $0x108] sm:$0xff]   ;;  %v2980_v21 = vld [vmem:[%s3798_s9 + $0x60] sm:$0xff]  }
 0x353   :  { %v2979_v20 = vld [vmem:[%s3798_s9 + $0xa8] sm:$0xff]  }
 0x354   :  { %v1499_v23 = vpack.c.bf16 %v1484_v16, %v1484_v16  ;;  %v1485_v25 = vcombine.high %v1483_v22, %v1483_v22  ;;  %v1500_v28 = vpack.c.bf16 %v1483_v22, %v1483_v22  ;;  %v2981_v16 = vld [vmem:[%s3798_s9 + $0xe0] sm:$0xff]  }
 0x355   :  { %v2982_v22 = vld [vmem:[%s3798_s9 + $0x20] sm:$0xff]  }
 0x356   :  { %1834 = vmatprep.mubr.bf16.mxu1 %v1499_v23  ;;  %v1501_v27 = vpack.c.bf16 %v1485_v25, %v1485_v25  ;;  %v2983_v23 = vld [vmem:[%s3798_s9 + $0xa0] sm:$0xff]   ;;  %v2985_v25 = vld [vmem:[%s3798_s9 + $0xd8] sm:$0xff]  }
 0x357   :  { %1835 = vmatmul.mubr.bf16.vlgmr.msra.gmra.mxu1 %v1498_v26  ;;  %v2986_v26 = vld [vmem:[%s3798_s9 + $0x18] sm:$0xff]  }
 0x358   :  { %2840 = vmatpush3.bf16.msra.mxu1 %v2939_v24  ;;  %1874 = vmatprep.mubr.bf16.mxu0 %v1501_v27  ;;  %v2984_v24 = vld [vmem:[%s3798_s9 + $0x58] sm:$0xff]  }
 0x359   :  { %1875 = vmatmul.mubr.bf16.vlgmr.msra.gmra.mxu0 %v1500_v28  ;;  %2841 = vmatprep.subr.bf16.mxu1 %v3026_v8  ;;  %v2987_v27 = vld [vmem:[%s3798_s9 + $0x98] sm:$0xff]   ;;  %v2988_v28 = vld [vmem:[%s3798_s9 + $0x50] sm:$0xff]  }
 0x35a   :  { %2847 = vmatprep.mubr.msk.bf16.mxu1 %vm3027_vm3, %v3026_v8  ;;  %2095 = vmatpush1.bf16.msra.mxu0 %v2947_v35  ;;  %v2996_v35 = vld [vmem:[%s3798_s9 + $0x40] sm:$0xff]  }
 0x35b   :  { %2096 = vmatprep.subr.bf16.mxu0 %v2955_v39  ;;  %2118 = vmatprep.mubr.bf16.mxu0 %v3028_v49  ;;  %v1944_v39 = vsub.s32 0, %v3498_v62 }
 0x35c   :  { %2842 = vmatpush3.bf16.msra.mxu1 %v2941_v29  ;;  %v2989_v29 = vld [vmem:[%s3798_s9 + $0xd0] sm:$0xff]  }
 0x35d   :  { %2843 = vmatprep.subr.bf16.mxu1 %v3026_v8 }
 0x35e   :  { %2097 = vmatpush1.bf16.msra.mxu0 %v2953_v40  ;;  %v1952_v40 = vsub.s32 2, %v3498_v62 }
 0x35f   :  { %2098 = vmatprep.subr.bf16.mxu0 %v2961_v42  ;;  %v1948_v42 = vsub.s32 1, %v3498_v62 }
 0x360   :  { %2844 = vmatpush3.bf16.msra.mxu1 %v2942_v11  ;;  %v2990_v11 = vld [vmem:[%s3798_s9 + $0x10] sm:$0xff]  }
 0x361   :  { %2845 = vmatprep.subr.bf16.mxu1 %v3026_v8  ;;  %v2971_v8 = vld [vmem:[%s3798_s9 + $0xb8] sm:$0xff]  }
 0x362   :  { %2099 = vmatpush1.bf16.msra.mxu0 %v2959_v44 }
 0x363   :  { %2100 = vmatprep.subr.bf16.mxu0 %v2967_v48 }
 0x364   :  { %2846 = vmatpush3.bf16.msra.mxu1 %v2943_v30  ;;  %v2991_v30 = vld [vmem:[%s3798_s9 + $0x90] sm:$0xff]  }
 0x365   :  { %2053 = vmatprep.subr.bf16.mxu1 %v2946_v34  ;;  %v2995_v34 = vld [vmem:[%s3798_s9 + $0x88] sm:$0xff]  }
 0x366   :  { %2101 = vmatpush1.bf16.msra.mxu0 %v2965_v47 }
 0x367   :  { %2848 = vmatmul.mubr.msk.bf16.vlgmr.msra.gmra.mxu1 %vm1798_vm4, %v1502_v32  ;;  %2785 = vmatprep.subr.bf16.mxu0 %v2969_v51  ;;  %v2993_v32 = vld [vmem:[%s3798_s9 + $0xc8] sm:$0xff]  }
 0x368   :  { %2054 = vmatpush1.bf16.msra.mxu1 %v2944_v33  ;;  %2077 = vmatprep.mubr.bf16.mxu1 %v3028_v49  ;;  %v2994_v33 = vld [vmem:[%s3798_s9 + $0x8] sm:$0xff]  }
 0x369   :  { %2055 = vmatprep.subr.bf16.mxu1 %v2952_v37  ;;  %v2998_v37 = vld [vmem:[%s3798_s9] sm:$0xff]  }
 0x36c   :  { %2056 = vmatpush1.bf16.msra.mxu1 %v2950_v38  ;;  %v2999_v38 = vld [vmem:[%s3798_s9 + $0x80] sm:$0xff]  }
 0x36d   :  { %2057 = vmatprep.subr.bf16.mxu1 %v2958_v41  ;;  %v1940_v41 = vld [vmem:[%s3797_s8] sm:$0xf] }
 0x36e   :  { %v1945_v44 = vrot.slane %v1940_v41, %v1944_v39 }
 0x370   :  { %2058 = vmatpush1.bf16.msra.mxu1 %v2956_v43  ;;  %v1956_v43 = vsub.s32 3, %v3498_v62 }
 0x371   :  { %2059 = vmatprep.subr.bf16.mxu1 %v2964_v46  ;;  %v1949_v46 = vrot.slane %v1940_v41, %v1948_v42 }
 0x372   :  { %v1957_v47 = vrot.slane %v1940_v41, %v1956_v43 }
 0x374   :  { %2060 = vmatpush1.bf16.msra.mxu1 %v2962_v45  ;;  %v1953_v45 = vrot.slane %v1940_v41, %v1952_v40 }
 0x375   :  { %2763 = vmatprep.subr.bf16.mxu1 %v2968_v50 }
 0x417   :  { %v2730_v52 = vpop.f32.mrf.mxu1 }
 0x419   :  { %v2731_v53 = vpop.f32.mrf.mxu1  ;;  %v2752_v54 = vpop.f32.mrf.mxu0 }
 0x41a   :  { %v2732_v59 = vadd.f32 %v2731_v53, %v2730_v52 }
 0x41b   :  { %v2733_v55 = vpop.f32.mrf.mxu1  ;;  %v2753_v56 = vpop.f32.mrf.mxu0 }
 0x41c   :  { %v1837_v63 = vadd.f32 %v2732_v59, %v2553_v60  ;;  %v2754_v0 = vadd.f32 %v2753_v56, %v2752_v54 }
 0x41d   :  { %v2734_v57 = vpop.f32.mrf.mxu1  ;;  %v2755_v58 = vpop.f32.mrf.mxu0 }
 0x41e   :  { %v1877_v1 = vadd.f32 %v2754_v0, %v1837_v63 }
 0x41f   :  { %v2756_v61 = vpop.f32.mrf.mxu0 }
 0x427   :  { %v1916_v2 = vpop.f32.mrf.mxu1 }
 0x428   :  { %v1917_v3 = vadd.f32 %v1916_v2, %v1877_v1 }
 0x429   :  { %v2849_v4 = vpop.f32.mrf.mxu1 }
 0x42a   :  { %v1922_v5 = vmax.f32 %v1917_v3, 0.0 }
 0x42b   :  { %v1919_v6 = vpop.f32.mrf.mxu1 }
 0x42c   :  { %v1923_v9 = vpack.c.bf16 %v1922_v5, %v1922_v5  ;;  %v2609_v6 = vld [vmem:[%s3799_s10] ss:$0 sm:$0xff] }
 0x42d   :  { %v2850_v13 = vpop.f32.mrf.mxu1 }
 0x42e   :  { %2607 = vmatmul.mubr.msk.bf16.vlgmr.msra.gmra.mxu1 %vm1798_vm4, %v1923_v9  ;;  %2608 = vmatmul.mubr.msk.bf16.vlgmr.msra.gmra.mxu0 %vm1798_vm4, %v1923_v9 }
 0x42f   :  { %2764 = vmatpush3.bf16.msra.mxu1 %v2970_v7  ;;  %2786 = vmatpush3.bf16.msra.mxu0 %v2971_v8 }
 0x430   :  { %2765 = vmatprep.subr.bf16.mxu1 %v2972_v10  ;;  %2787 = vmatprep.subr.bf16.mxu0 %v2973_v12 }
 0x433   :  { %2766 = vmatpush3.bf16.msra.mxu1 %v2974_v14  ;;  %2788 = vmatpush3.bf16.msra.mxu0 %v2975_v15 }
 0x434   :  { %2767 = vmatprep.subr.bf16.mxu1 %v2976_v17  ;;  %2789 = vmatprep.subr.bf16.mxu0 %v2977_v18 }
 0x437   :  { %2768 = vmatpush3.bf16.msra.mxu1 %v2978_v19  ;;  %2790 = vmatpush3.bf16.msra.mxu0 %v2979_v20 }
 0x438   :  { %2769 = vmatprep.subr.bf16.mxu1 %v2980_v21  ;;  %2791 = vmatprep.subr.bf16.mxu0 %v2981_v16 }
 0x43b   :  { %2770 = vmatpush3.bf16.msra.mxu1 %v2982_v22  ;;  %2792 = vmatpush3.bf16.msra.mxu0 %v2983_v23 }
 0x43c   :  { %2771 = vmatprep.subr.bf16.mxu1 %v2984_v24  ;;  %2793 = vmatprep.subr.bf16.mxu0 %v2985_v25 }
 0x43f   :  { %2772 = vmatpush3.bf16.msra.mxu1 %v2986_v26  ;;  %2794 = vmatpush3.bf16.msra.mxu0 %v2987_v27 }
 0x440   :  { %2773 = vmatprep.subr.bf16.mxu1 %v2988_v28  ;;  %2795 = vmatprep.subr.bf16.mxu0 %v2989_v29 }
 0x443   :  { %2774 = vmatpush3.bf16.msra.mxu1 %v2990_v11  ;;  %2796 = vmatpush3.bf16.msra.mxu0 %v2991_v30 }
 0x444   :  { %2775 = vmatprep.subr.bf16.mxu1 %v2992_v31  ;;  %2797 = vmatprep.subr.bf16.mxu0 %v2993_v32 }
 0x447   :  { %2776 = vmatpush3.bf16.msra.mxu1 %v2994_v33  ;;  %2798 = vmatpush3.bf16.msra.mxu0 %v2995_v34 }
 0x448   :  { %2777 = vmatprep.subr.bf16.mxu1 %v2996_v35  ;;  %2799 = vmatprep.subr.bf16.mxu0 %v2997_v36 }
 0x44b   :  { %2778 = vmatpush3.bf16.msra.mxu1 %v2998_v37  ;;  %2800 = vmatpush3.bf16.msra.mxu0 %v2999_v38 }
 0x4ee   :  { %v2079_v48 = vpop.f32.mrf.mxu1  ;;  %v2120_v49 = vpop.f32.mrf.mxu0 }
 0x4ef   :  { %v2080_v50 = vadd.f32 %v2079_v48, %v1945_v44  ;;  %v2121_v51 = vadd.f32 %v2120_v49, %v1953_v45 }
 0x4f0   :  { %v2081_v52 = vpop.f32.mrf.mxu1  ;;  %v2122_v53 = vpop.f32.mrf.mxu0 }
 0x4f1   :  { %v2082_v54 = vadd.f32 %v2081_v52, %v1949_v46  ;;  %v2123_v55 = vadd.f32 %v2122_v53, %v1957_v47  ;;  %v2127_v56 = vmax.f32 %v2080_v50, 0.0  ;;  %v2129_v57 = vmax.f32 %v2121_v51, 0.0 }
 0x4f2   :  { %v2083_v58 = vpop.f32.mrf.mxu1  ;;  %v2124_v59 = vpop.f32.mrf.mxu0 }
 0x4f3   :  { %v2128_v60 = vmax.f32 %v2082_v54, 0.0  ;;  %v2130_v61 = vmax.f32 %v2123_v55, 0.0  ;;  %v2131_v2 = vpack.c.bf16 %v2127_v56, %v2127_v56  ;;  %v2133_v3 = vpack.c.bf16 %v2129_v57, %v2129_v57 }
 0x4f4   :  { %v2084_v63 = vpop.f32.mrf.mxu1  ;;  %v2125_v62 = vpop.f32.mrf.mxu0 }
 0x4f5   :  { %v2132_v0 = vpack.c.bf16 %v2128_v60, %v2128_v60  ;;  %v2134_v1 = vpack.c.bf16 %v2130_v61, %v2130_v61 }
 0x4f7   :  { %2430 = vmatprep.mubr.bf16.mxu1 %v2132_v0  ;;  %2470 = vmatprep.mubr.bf16.mxu0 %v2134_v1 }
 0x4f8   :  { %2431 = vmatmul.mubr.bf16.vlgmr.msra.gmra.mxu1 %v2131_v2  ;;  %2471 = vmatmul.mubr.bf16.vlgmr.msra.gmra.mxu0 %v2133_v3 }
 0x5b8   :  { %v2779_v4 = vpop.f32.mrf.mxu1  ;;  %v2801_v5 = vpop.f32.mrf.mxu0 }
 0x5ba   :  { %v2780_v7 = vpop.f32.mrf.mxu1  ;;  %v2802_v8 = vpop.f32.mrf.mxu0 }
 0x5bb   :  { %v2781_v9 = vadd.f32 %v2780_v7, %v2779_v4  ;;  %v2803_v14 = vadd.f32 %v2802_v8, %v2801_v5 }
 0x5bc   :  { %v2782_v10 = vpop.f32.mrf.mxu1  ;;  %v2804_v12 = vpop.f32.mrf.mxu0 }
 0x5bd   :  { %v2433_v13 = vadd.f32 %v2781_v9, %v2609_v6 }
 0x5be   :  { %v2783_v15 = vpop.f32.mrf.mxu1  ;;  %v2805_v17 = vpop.f32.mrf.mxu0 }
 0x5bf   :  { %v2473_v18 = vadd.f32 %v2803_v14, %v2433_v13 }
 0x5c1   :  { %2478 = vst [vmem:[#allocation5] sm:$0x3] %v2473_v18 }
 0x5c2   :  { %3011 = shalt.err (!%p3008_p4)
}
 0x5c3   :  { %2488 = dma.vmem_to_hbm [thread:$0]  %s2486_s18, 32, %s3800_s11, [#allocation6]  }
 0x5c4   :  { %3020 = dma.done.wait [#allocation6], 32  }
 0x5c5   :  { %3021 = vsyncadd [#allocation6], 4294967264 }
 0x5c6   :  { %2492 = vsyncpa [#allocation6], 1 }

</bundles_post_ra>
